<compile_context>
chip_gen: v7x
topology: tpu7x:2x2x1
jax: 0.10.0
libtpu: 0.0.40
codegen_flags: <defaults>
</compile_context>

<pallas_src>
import functools

import jax
import jax.numpy as jnp
from jax.experimental import pallas as pl
from jax.experimental.pallas import tpu as pltpu


# ------------------------------ fused kernel ------------------------------- #

def _up_fused_kernel(x1_ref, x2_ref, scat_ref, wup_ref, bup_ref,
                     w1_ref, b1_ref, w2_ref, b2_ref,
                     o_ref, pad1_ref, pad2_ref,
                     *, UH, UW, pad_top, pad_left):
    # x1_ref  : (1, H1*W1, C1)      spatial-major, flattened
    # x2_ref  : (1, H2, W2, C2)     skip connection (NHWC)
    # scat_ref: (UH*UW, 4*H1*W1)    one-hot scatter (stacked taps -> 2x interleave)
    # wup_ref : (4, C1, C1)         convT taps, index ky*2+kx, each (Cin, Cout)
    # bup_ref : (1, C1)
    # w1_ref  : (9*Cin1, Cmid)      im2col weight of conv1, Cin1 = C2 + C1
    # b1_ref  : (1, Cmid)
    # w2_ref  : (9*Cmid, Cout)      im2col weight of conv2
    # b2_ref  : (Cout, 1)
    # o_ref   : (1, Cout, H2*W2)    lane-dense output
    # pad1_ref: (H2+2, W2+2, Cin1)  VMEM: cat([x2, up(x1)]) incl. F.pad + conv halo
    # pad2_ref: (H2+2, W2+2, Cmid)  VMEM: conv1 output with conv halo
    Hp, Wp, Cin1 = pad1_ref.shape
    H2, W2 = Hp - 2, Wp - 2
    HW2 = H2 * W2
    C1 = x1_ref.shape[2]
    C2 = x2_ref.shape[3]
    Cmid = pad2_ref.shape[2]

    # ---- 1. ConvTranspose2d(k=2, s=2): 4 channel matmuls + one-hot scatter ----
    x1 = x1_ref[0].astype(jnp.float32)                              # (H1*W1, C1)
    taps = [jnp.dot(x1, wup_ref[t].astype(jnp.float32),
                    preferred_element_type=jnp.float32) for t in range(4)]
    stacked = jnp.concatenate(taps, axis=0)                         # (4*H1*W1, C1)
    up = jnp.dot(scat_ref[...], stacked,
                 preferred_element_type=jnp.float32)                # (UH*UW, C1)
    up = up + bup_ref[...].astype(jnp.float32)                      # bias added once
    up = up.reshape(UH, UW, C1)

    # ---- 2. F.pad + channel concat + conv halo, all inside VMEM scratch ------
    pad1_ref[...] = jnp.zeros_like(pad1_ref)
    pad1_ref[1:1 + H2, 1:1 + W2, 0:C2] = x2_ref[0].astype(jnp.float32)
    pad1_ref[1 + pad_top:1 + pad_top + UH,
             1 + pad_left:1 + pad_left + UW, C2:C2 + C1] = up

    # ---- helper: 3x3 conv as one im2col matmul (K = 9*Cin) -------------------
    def conv3x3(src_ref, w_full, cin):
        cols = []
        for dy in range(3):
            for dx in range(3):
                cols.append(src_ref[dy:dy + H2, dx:dx + W2, :].reshape(HW2, cin))
        xim = jnp.concatenate(cols, axis=1)                         # (HW2, 9*cin)
        return jnp.dot(xim, w_full, preferred_element_type=jnp.float32)

    # ---- 3. conv1 -> InstanceNorm2d -> ReLU ----------------------------------
    y1 = conv3x3(pad1_ref, w1_ref[...].astype(jnp.float32), Cin1)
    y1 = y1 + b1_ref[...].astype(jnp.float32)                       # (HW2, Cmid)
    mu1 = jnp.mean(y1, axis=0, keepdims=True)
    var1 = jnp.mean(jnp.square(y1 - mu1), axis=0, keepdims=True)
    y1 = jnp.maximum((y1 - mu1) * jax.lax.rsqrt(var1 + 1e-5), 0.0)

    pad2_ref[...] = jnp.zeros_like(pad2_ref)
    pad2_ref[1:1 + H2, 1:1 + W2, :] = y1.reshape(H2, W2, Cmid)

    # ---- 4. conv2 -> InstanceNorm2d -> ReLU, lane-dense store ----------------
    y2 = conv3x3(pad2_ref, w2_ref[...].astype(jnp.float32), Cmid).T  # (Cout, HW2)
    y2 = y2 + b2_ref[...].astype(jnp.float32)
    mu2 = jnp.mean(y2, axis=1, keepdims=True)
    var2 = jnp.mean(jnp.square(y2 - mu2), axis=1, keepdims=True)
    y2 = jnp.maximum((y2 - mu2) * jax.lax.rsqrt(var2 + 1e-5), 0.0)
    o_ref[0] = y2.astype(o_ref.dtype)                               # lane-dense


# -------------------------------- wrapper ----------------------------------- #

def _build_scatter(H1, W1):
    """One-hot matrix mapping stacked per-tap convT outputs to the 2x upsampled grid."""
    UH, UW = 2 * H1, 2 * W1
    r = jnp.arange(UH)[:, None]
    s = jnp.arange(UW)[None, :]
    tap = (r % 2) * 2 + (s % 2)                                   # ky*2 + kx
    src = tap * (H1 * W1) + (r // 2) * W1 + (s // 2)              # (UH, UW)
    return jax.nn.one_hot(src.reshape(-1), 4 * H1 * W1, dtype=jnp.float32)


def up_forward(x1_nchw, x2_nchw, params):
    """Exact forward of PyTorch `up` (dim=2). Inputs/outputs are NCHW."""
    N, C1, H1, W1 = x1_nchw.shape
    _, C2, H2, W2 = x2_nchw.shape
    UH, UW = 2 * H1, 2 * W1
    diffY, diffX = H2 - UH, W2 - UW                 # assumed >= 0 (usual UNet case)
    pad_top, pad_left = diffY // 2, diffX // 2
    Cin1 = C2 + C1
    Cmid = params["c1_w"].shape[0]
    Cout = params["c2_w"].shape[0]

    # one-time, tiny layout prep (free reshapes + two small input transposes)
    x1f = jnp.transpose(x1_nchw, (0, 2, 3, 1)).reshape(N, H1 * W1, C1)
    x2n = jnp.transpose(x2_nchw, (0, 2, 3, 1))
    scat = _build_scatter(H1, W1)

    # ConvTranspose2d weight (Cin, Cout, kH, kW) -> (kH*kW, Cin, Cout)
    wup = jnp.transpose(params["up_w"], (2, 3, 0, 1)).reshape(4, C1, C1)
    bup = params["up_b"].reshape(1, C1)
    # Conv2d weight (Cout, Cin, 3, 3) -> im2col (9*Cin, Cout), k = (dy*3+dx)*Cin + ci
    w1 = jnp.transpose(params["c1_w"], (2, 3, 1, 0)).reshape(9 * Cin1, Cmid)
    b1 = params["c1_b"].reshape(1, Cmid)
    w2 = jnp.transpose(params["c2_w"], (2, 3, 1, 0)).reshape(9 * Cmid, Cout)
    b2 = params["c2_b"].reshape(Cout, 1)

    kernel = functools.partial(_up_fused_kernel, UH=UH, UW=UW,
                               pad_top=pad_top, pad_left=pad_left)

    out_flat = pl.pallas_call(
        kernel,
        out_shape=jax.ShapeDtypeStruct((N, Cout, H2 * W2), x1_nchw.dtype),
        grid=(N,),
        in_specs=[
            pl.BlockSpec((1, H1 * W1, C1), lambda n: (n, 0, 0)),
            pl.BlockSpec((1, H2, W2, C2), lambda n: (n, 0, 0, 0)),
            pl.BlockSpec((UH * UW, 4 * H1 * W1), lambda n: (0, 0)),
            pl.BlockSpec((4, C1, C1), lambda n: (0, 0, 0)),
            pl.BlockSpec((1, C1), lambda n: (0, 0)),
            pl.BlockSpec((9 * Cin1, Cmid), lambda n: (0, 0)),
            pl.BlockSpec((1, Cmid), lambda n: (0, 0)),
            pl.BlockSpec((9 * Cmid, Cout), lambda n: (0, 0)),
            pl.BlockSpec((Cout, 1), lambda n: (0, 0)),
        ],
        out_specs=pl.BlockSpec((1, Cout, H2 * W2), lambda n: (n, 0, 0)),
        scratch_shapes=[
            pltpu.VMEM((H2 + 2, W2 + 2, Cin1), jnp.float32),
            pltpu.VMEM((H2 + 2, W2 + 2, Cmid), jnp.float32),
        ],
        compiler_params=pltpu.CompilerParams(
            dimension_semantics=("parallel",)),   # both TCs on v7x for N >= 2
    )(x1f, x2n, scat, wup, bup, w1, b1, w2, b2)

    # (N, Cout, H*W) -> (N, Cout, H, W): contiguous reshape, no data movement.
    return out_flat.reshape(N, Cout, H2, W2)


# --------------------------- pure-JAX reference ----------------------------- #

def up_forward_ref(x1, x2, params):
    N, C1, H1, W1 = x1.shape
    w = params["up_w"]                                   # (Cin, Cout, 2, 2)
    t = jnp.einsum("ncij,cokl->noikjl", x1, w,
                   precision=jax.lax.Precision.HIGHEST)  # (N, Co, H1, 2, W1, 2)
    up = t.reshape(N, w.shape[1], 2 * H1, 2 * W1) + params["up_b"][None, :, None, None]
    dY = x2.shape[2] - up.shape[2]
    dX = x2.shape[3] - up.shape[3]
    up = jnp.pad(up, ((0, 0), (0, 0), (dY // 2, dY - dY // 2), (dX // 2, dX - dX // 2)))
    x = jnp.concatenate([x2, up], axis=1)

    def conv_in_relu(x, w, b):
        H, W = x.shape[2], x.shape[3]
        xp = jnp.pad(x, ((0, 0), (0, 0), (1, 1), (1, 1)))
        y = jnp.broadcast_to(b[None, :, None, None], (x.shape[0], w.shape[0], H, W))
        for dy in range(3):
            for dx in range(3):
                y = y + jnp.einsum("nchw,oc->nohw", xp[:, :, dy:dy + H, dx:dx + W],
                                   w[:, :, dy, dx], precision=jax.lax.Precision.HIGHEST)
        mu = jnp.mean(y, axis=(2, 3), keepdims=True)
        var = jnp.mean(jnp.square(y - mu), axis=(2, 3), keepdims=True)
        return jnp.maximum((y - mu) * jax.lax.rsqrt(var + 1e-5), 0.0)

    x = conv_in_relu(x, params["c1_w"], params["c1_b"])
    x = conv_in_relu(x, params["c2_w"], params["c2_b"])
    return x


# ---------------------------------- main ------------------------------------ #

if __name__ == "__main__":
    key = jax.random.PRNGKey(0)
    N, in_ch, out_ch = 2, 8, 4            # up(in_ch=8, out_ch=4, dim=2)
    H1, W1 = 8, 8                          # x1 spatial (upsampled 2x -> 16x16)
    H2, W2 = 16, 16                        # x2 spatial

    ks = jax.random.split(key, 8)
    x1 = jax.random.normal(ks[0], (N, in_ch // 2, H1, W1), jnp.float32)
    x2 = jax.random.normal(ks[1], (N, in_ch // 2, H2, W2), jnp.float32)

    params = {
        # ConvTranspose2d(in_ch//2, in_ch//2, 2, stride=2): weight (Cin, Cout, 2, 2)
        "up_w": 0.1 * jax.random.normal(ks[2], (in_ch // 2, in_ch // 2, 2, 2), jnp.float32),
        "up_b": 0.1 * jax.random.normal(ks[3], (in_ch // 2,), jnp.float32),
        # Conv2d(in_ch, out_ch, 3, padding=1): weight (Cout, Cin, 3, 3)
        "c1_w": 0.1 * jax.random.normal(ks[4], (out_ch, in_ch, 3, 3), jnp.float32),
        "c1_b": 0.1 * jax.random.normal(ks[5], (out_ch,), jnp.float32),
        # Conv2d(out_ch, out_ch, 3, padding=1)
        "c2_w": 0.1 * jax.random.normal(ks[6], (out_ch, out_ch, 3, 3), jnp.float32),
        "c2_b": 0.1 * jax.random.normal(ks[7], (out_ch,), jnp.float32),
    }

    out = jax.jit(up_forward)(x1, x2, params)
    jax.block_until_ready(out)
    assert out.shape == (N, out_ch, H2, W2), out.shape
    assert bool(jnp.all(jnp.isfinite(out)))

    ref = up_forward_ref(x1, x2, params)
    assert float(jnp.max(jnp.abs(out - ref))) < 5e-2, float(jnp.max(jnp.abs(out - ref)))

    print("KERNEL_OK")
</pallas_src>

<mosaic_0001>
module attributes {stable_mosaic.version = 11 : i64} {
  func.func @_up_fused_kernel(%arg0: i32, %arg1: memref<1x64x4xf32, #tpu.memory_space<vmem>>, %arg2: memref<1x16x16x4xf32, #tpu.memory_space<vmem>>, %arg3: memref<256x256xf32, #tpu.memory_space<vmem>>, %arg4: memref<4x4x4xf32, #tpu.memory_space<vmem>>, %arg5: memref<1x4xf32, #tpu.memory_space<vmem>>, %arg6: memref<72x4xf32, #tpu.memory_space<vmem>>, %arg7: memref<1x4xf32, #tpu.memory_space<vmem>>, %arg8: memref<36x4xf32, #tpu.memory_space<vmem>>, %arg9: memref<4x1xf32, #tpu.memory_space<vmem>>, %arg10: memref<1x4x256xf32, #tpu.memory_space<vmem>>, %arg11: memref<18x18x8xf32, #tpu.memory_space<vmem>>, %arg12: memref<18x18x4xf32, #tpu.memory_space<vmem>>) attributes {dimension_semantics = [#tpu.dimension_semantics<parallel>], iteration_bounds = array<i64: 2>, scalar_prefetch = 0 : i64, scratch_operands = 2 : i64, tpu.core_type = #tpu.core_type<tc>, window_params = [{transform_indices = @transform_0, window_bounds = array<i64: 1, 64, 4>}, {transform_indices = @transform_1, window_bounds = array<i64: 1, 16, 16, 4>}, {pipeline_mode = #tpu.pipeline_mode<synchronous>, transform_indices = @transform_2, window_bounds = array<i64: 256, 256>}, {pipeline_mode = #tpu.pipeline_mode<synchronous>, transform_indices = @transform_3, window_bounds = array<i64: 4, 4, 4>}, {pipeline_mode = #tpu.pipeline_mode<synchronous>, transform_indices = @transform_4, window_bounds = array<i64: 1, 4>}, {pipeline_mode = #tpu.pipeline_mode<synchronous>, transform_indices = @transform_5, window_bounds = array<i64: 72, 4>}, {pipeline_mode = #tpu.pipeline_mode<synchronous>, transform_indices = @transform_6, window_bounds = array<i64: 1, 4>}, {pipeline_mode = #tpu.pipeline_mode<synchronous>, transform_indices = @transform_7, window_bounds = array<i64: 36, 4>}, {pipeline_mode = #tpu.pipeline_mode<synchronous>, transform_indices = @transform_8, window_bounds = array<i64: 4, 1>}, {transform_indices = @transform_9, window_bounds = array<i64: 1, 4, 256>}]} {
    %c0 = arith.constant 0 : index
    %c0_0 = arith.constant 0 : index
    %c0_1 = arith.constant 0 : index
    %0 = vector.load %arg1[%c0, %c0_0, %c0_1] : memref<1x64x4xf32, #tpu.memory_space<vmem>>, vector<1x64x4xf32>
    %1 = vector.shape_cast %0 : vector<1x64x4xf32> to vector<64x4xf32>
    %c0_2 = arith.constant 0 : index
    %c0_3 = arith.constant 0 : index
    %c0_4 = arith.constant 0 : index
    %2 = vector.load %arg4[%c0_2, %c0_3, %c0_4] : memref<4x4x4xf32, #tpu.memory_space<vmem>>, vector<1x4x4xf32>
    %3 = vector.shape_cast %2 : vector<1x4x4xf32> to vector<4x4xf32>
    %cst = arith.constant dense<0.000000e+00> : vector<64x4xf32>
    %4 = tpu.matmul %1, %3, %cst {dimension_numbers = #tpu.dot_dimension_numbers<[1], [0], [0], [1], [0, 0, 1, 1], [], []>} : vector<64x4xf32>, vector<4x4xf32>, vector<64x4xf32> -> vector<64x4xf32>
    %c1 = arith.constant 1 : index
    %c0_5 = arith.constant 0 : index
    %c0_6 = arith.constant 0 : index
    %5 = vector.load %arg4[%c1, %c0_5, %c0_6] : memref<4x4x4xf32, #tpu.memory_space<vmem>>, vector<1x4x4xf32>
    %6 = vector.shape_cast %5 : vector<1x4x4xf32> to vector<4x4xf32>
    %cst_7 = arith.constant dense<0.000000e+00> : vector<64x4xf32>
    %7 = tpu.matmul %1, %6, %cst_7 {dimension_numbers = #tpu.dot_dimension_numbers<[1], [0], [0], [1], [0, 0, 1, 1], [], []>} : vector<64x4xf32>, vector<4x4xf32>, vector<64x4xf32> -> vector<64x4xf32>
    %c2 = arith.constant 2 : index
    %c0_8 = arith.constant 0 : index
    %c0_9 = arith.constant 0 : index
    %8 = vector.load %arg4[%c2, %c0_8, %c0_9] : memref<4x4x4xf32, #tpu.memory_space<vmem>>, vector<1x4x4xf32>
    %9 = vector.shape_cast %8 : vector<1x4x4xf32> to vector<4x4xf32>
    %cst_10 = arith.constant dense<0.000000e+00> : vector<64x4xf32>
    %10 = tpu.matmul %1, %9, %cst_10 {dimension_numbers = #tpu.dot_dimension_numbers<[1], [0], [0], [1], [0, 0, 1, 1], [], []>} : vector<64x4xf32>, vector<4x4xf32>, vector<64x4xf32> -> vector<64x4xf32>
    %c3 = arith.constant 3 : index
    %c0_11 = arith.constant 0 : index
    %c0_12 = arith.constant 0 : index
    %11 = vector.load %arg4[%c3, %c0_11, %c0_12] : memref<4x4x4xf32, #tpu.memory_space<vmem>>, vector<1x4x4xf32>
    %12 = vector.shape_cast %11 : vector<1x4x4xf32> to vector<4x4xf32>
    %cst_13 = arith.constant dense<0.000000e+00> : vector<64x4xf32>
    %13 = tpu.matmul %1, %12, %cst_13 {dimension_numbers = #tpu.dot_dimension_numbers<[1], [0], [0], [1], [0, 0, 1, 1], [], []>} : vector<64x4xf32>, vector<4x4xf32>, vector<64x4xf32> -> vector<64x4xf32>
    %14 = tpu.concatenate %4, %7, %10, %13 in 0 : vector<64x4xf32>, vector<64x4xf32>, vector<64x4xf32>, vector<64x4xf32> -> vector<256x4xf32>
    %c0_14 = arith.constant 0 : index
    %c0_15 = arith.constant 0 : index
    %15 = vector.load %arg3[%c0_14, %c0_15] : memref<256x256xf32, #tpu.memory_space<vmem>>, vector<256x256xf32>
    %cst_16 = arith.constant dense<0.000000e+00> : vector<256x4xf32>
    %16 = tpu.matmul %15, %14, %cst_16 {dimension_numbers = #tpu.dot_dimension_numbers<[1], [0], [0], [1], [0, 0, 1, 1], [], []>} : vector<256x256xf32>, vector<256x4xf32>, vector<256x4xf32> -> vector<256x4xf32>
    %c0_17 = arith.constant 0 : index
    %c0_18 = arith.constant 0 : index
    %17 = vector.load %arg5[%c0_17, %c0_18] : memref<1x4xf32, #tpu.memory_space<vmem>>, vector<1x4xf32>
    %18 = vector.broadcast %17 : vector<1x4xf32> to vector<256x4xf32>
    %19 = arith.addf %16, %18 : vector<256x4xf32>
    %20 = vector.shape_cast %19 : vector<256x4xf32> to vector<16x16x4xf32>
    %cst_19 = arith.constant 0.000000e+00 : f32
    %21 = vector.broadcast %cst_19 : f32 to vector<18x18x8xf32>
    %c0_20 = arith.constant 0 : index
    %c0_21 = arith.constant 0 : index
    %c0_22 = arith.constant 0 : index
    %22 = vector.load %arg11[%c0_20, %c0_21, %c0_22] : memref<18x18x8xf32, #tpu.memory_space<vmem>>, vector<18x18x8xf32>
    tpu.vector_store %arg11[%c0_20, %c0_21, %c0_22], %21 {strides = array<i32>} : memref<18x18x8xf32, #tpu.memory_space<vmem>>, vector<18x18x8xf32>,
    %c0_23 = arith.constant 0 : index
    %c0_24 = arith.constant 0 : index
    %c0_25 = arith.constant 0 : index
    %c0_26 = arith.constant 0 : index
    %23 = vector.load %arg2[%c0_23, %c0_24, %c0_25, %c0_26] : memref<1x16x16x4xf32, #tpu.memory_space<vmem>>, vector<1x16x16x4xf32>
    %24 = vector.shape_cast %23 : vector<1x16x16x4xf32> to vector<16x16x4xf32>
    %c1_27 = arith.constant 1 : index
    %c1_28 = arith.constant 1 : index
    %c0_29 = arith.constant 0 : index
    %25 = vector.load %arg11[%c1_27, %c1_28, %c0_29] : memref<18x18x8xf32, #tpu.memory_space<vmem>>, vector<16x16x4xf32>
    tpu.vector_store %arg11[%c1_27, %c1_28, %c0_29], %24 {strides = array<i32>} : memref<18x18x8xf32, #tpu.memory_space<vmem>>, vector<16x16x4xf32>,
    %c1_30 = arith.constant 1 : index
    %c1_31 = arith.constant 1 : index
    %c4 = arith.constant 4 : index
    %26 = vector.load %arg11[%c1_30, %c1_31, %c4] : memref<18x18x8xf32, #tpu.memory_space<vmem>>, vector<16x16x4xf32>
    tpu.vector_store %arg11[%c1_30, %c1_31, %c4], %20 {strides = array<i32>} : memref<18x18x8xf32, #tpu.memory_space<vmem>>, vector<16x16x4xf32>,
    %c0_32 = arith.constant 0 : index
    %c0_33 = arith.constant 0 : index
    %27 = vector.load %arg6[%c0_32, %c0_33] : memref<72x4xf32, #tpu.memory_space<vmem>>, vector<72x4xf32>
    %c0_34 = arith.constant 0 : index
    %c0_35 = arith.constant 0 : index
    %c0_36 = arith.constant 0 : index
    %28 = vector.load %arg11[%c0_34, %c0_35, %c0_36] : memref<18x18x8xf32, #tpu.memory_space<vmem>>, vector<16x16x8xf32>
    %29 = vector.shape_cast %28 : vector<16x16x8xf32> to vector<256x8xf32>
    %c0_37 = arith.constant 0 : index
    %c1_38 = arith.constant 1 : index
    %c0_39 = arith.constant 0 : index
    %30 = vector.load %arg11[%c0_37, %c1_38, %c0_39] : memref<18x18x8xf32, #tpu.memory_space<vmem>>, vector<16x16x8xf32>
    %31 = vector.shape_cast %30 : vector<16x16x8xf32> to vector<256x8xf32>
    %c0_40 = arith.constant 0 : index
    %c2_41 = arith.constant 2 : index
    %c0_42 = arith.constant 0 : index
    %32 = vector.load %arg11[%c0_40, %c2_41, %c0_42] : memref<18x18x8xf32, #tpu.memory_space<vmem>>, vector<16x16x8xf32>
    %33 = vector.shape_cast %32 : vector<16x16x8xf32> to vector<256x8xf32>
    %c1_43 = arith.constant 1 : index
    %c0_44 = arith.constant 0 : index
    %c0_45 = arith.constant 0 : index
    %34 = vector.load %arg11[%c1_43, %c0_44, %c0_45] : memref<18x18x8xf32, #tpu.memory_space<vmem>>, vector<16x16x8xf32>
    %35 = vector.shape_cast %34 : vector<16x16x8xf32> to vector<256x8xf32>
    %c1_46 = arith.constant 1 : index
    %c1_47 = arith.constant 1 : index
    %c0_48 = arith.constant 0 : index
    %36 = vector.load %arg11[%c1_46, %c1_47, %c0_48] : memref<18x18x8xf32, #tpu.memory_space<vmem>>, vector<16x16x8xf32>
    %37 = vector.shape_cast %36 : vector<16x16x8xf32> to vector<256x8xf32>
    %c1_49 = arith.constant 1 : index
    %c2_50 = arith.constant 2 : index
    %c0_51 = arith.constant 0 : index
    %38 = vector.load %arg11[%c1_49, %c2_50, %c0_51] : memref<18x18x8xf32, #tpu.memory_space<vmem>>, vector<16x16x8xf32>
    %39 = vector.shape_cast %38 : vector<16x16x8xf32> to vector<256x8xf32>
    %c2_52 = arith.constant 2 : index
    %c0_53 = arith.constant 0 : index
    %c0_54 = arith.constant 0 : index
    %40 = vector.load %arg11[%c2_52, %c0_53, %c0_54] : memref<18x18x8xf32, #tpu.memory_space<vmem>>, vector<16x16x8xf32>
    %41 = vector.shape_cast %40 : vector<16x16x8xf32> to vector<256x8xf32>
    %c2_55 = arith.constant 2 : index
    %c1_56 = arith.constant 1 : index
    %c0_57 = arith.constant 0 : index
    %42 = vector.load %arg11[%c2_55, %c1_56, %c0_57] : memref<18x18x8xf32, #tpu.memory_space<vmem>>, vector<16x16x8xf32>
    %43 = vector.shape_cast %42 : vector<16x16x8xf32> to vector<256x8xf32>
    %c2_58 = arith.constant 2 : index
    %c2_59 = arith.constant 2 : index
    %c0_60 = arith.constant 0 : index
    %44 = vector.load %arg11[%c2_58, %c2_59, %c0_60] : memref<18x18x8xf32, #tpu.memory_space<vmem>>, vector<16x16x8xf32>
    %45 = vector.shape_cast %44 : vector<16x16x8xf32> to vector<256x8xf32>
    %46 = tpu.concatenate %29, %31, %33, %35, %37, %39, %41, %43, %45 in 1 : vector<256x8xf32>, vector<256x8xf32>, vector<256x8xf32>, vector<256x8xf32>, vector<256x8xf32>, vector<256x8xf32>, vector<256x8xf32>, vector<256x8xf32>, vector<256x8xf32> -> vector<256x72xf32>
    %cst_61 = arith.constant dense<0.000000e+00> : vector<256x4xf32>
    %47 = tpu.matmul %46, %27, %cst_61 {dimension_numbers = #tpu.dot_dimension_numbers<[1], [0], [0], [1], [0, 0, 1, 1], [], []>} : vector<256x72xf32>, vector<72x4xf32>, vector<256x4xf32> -> vector<256x4xf32>
    %c0_62 = arith.constant 0 : index
    %c0_63 = arith.constant 0 : index
    %48 = vector.load %arg7[%c0_62, %c0_63] : memref<1x4xf32, #tpu.memory_space<vmem>>, vector<1x4xf32>
    %49 = vector.broadcast %48 : vector<1x4xf32> to vector<256x4xf32>
    %50 = arith.addf %47, %49 : vector<256x4xf32>
    %cst_64 = arith.constant dense<0.000000e+00> : vector<4xf32>
    %51 = vector.multi_reduction <add>, %50, %cst_64 [0] : vector<256x4xf32> to vector<4xf32>
    %52 = vector.shape_cast %51 : vector<4xf32> to vector<1x4xf32>
    %cst_65 = arith.constant 2.560000e+02 : f32
    %53 = vector.broadcast %cst_65 : f32 to vector<1x4xf32>
    %54 = arith.divf %52, %53 : vector<1x4xf32>
    %55 = vector.broadcast %54 : vector<1x4xf32> to vector<256x4xf32>
    %56 = arith.subf %50, %55 : vector<256x4xf32>
    %57 = arith.mulf %56, %56 : vector<256x4xf32>
    %cst_66 = arith.constant dense<0.000000e+00> : vector<4xf32>
    %58 = vector.multi_reduction <add>, %57, %cst_66 [0] : vector<256x4xf32> to vector<4xf32>
    %59 = vector.shape_cast %58 : vector<4xf32> to vector<1x4xf32>
    %cst_67 = arith.constant 2.560000e+02 : f32
    %60 = vector.broadcast %cst_67 : f32 to vector<1x4xf32>
    %61 = arith.divf %59, %60 : vector<1x4xf32>
    %62 = vector.broadcast %54 : vector<1x4xf32> to vector<256x4xf32>
    %63 = arith.subf %50, %62 : vector<256x4xf32>
    %cst_68 = arith.constant 9.99999974E-6 : f32
    %64 = vector.broadcast %cst_68 : f32 to vector<1x4xf32>
    %65 = arith.addf %61, %64 : vector<1x4xf32>
    %66 = math.rsqrt %65 : vector<1x4xf32>
    %67 = vector.broadcast %66 : vector<1x4xf32> to vector<256x4xf32>
    %68 = arith.mulf %63, %67 : vector<256x4xf32>
    %cst_69 = arith.constant 0.000000e+00 : f32
    %69 = vector.broadcast %cst_69 : f32 to vector<256x4xf32>
    %70 = arith.maximumf %68, %69 : vector<256x4xf32>
    %cst_70 = arith.constant 0.000000e+00 : f32
    %71 = vector.broadcast %cst_70 : f32 to vector<18x18x4xf32>
    %c0_71 = arith.constant 0 : index
    %c0_72 = arith.constant 0 : index
    %c0_73 = arith.constant 0 : index
    %72 = vector.load %arg12[%c0_71, %c0_72, %c0_73] : memref<18x18x4xf32, #tpu.memory_space<vmem>>, vector<18x18x4xf32>
    tpu.vector_store %arg12[%c0_71, %c0_72, %c0_73], %71 {strides = array<i32>} : memref<18x18x4xf32, #tpu.memory_space<vmem>>, vector<18x18x4xf32>,
    %73 = vector.shape_cast %70 : vector<256x4xf32> to vector<16x16x4xf32>
    %c1_74 = arith.constant 1 : index
    %c1_75 = arith.constant 1 : index
    %c0_76 = arith.constant 0 : index
    %74 = vector.load %arg12[%c1_74, %c1_75, %c0_76] : memref<18x18x4xf32, #tpu.memory_space<vmem>>, vector<16x16x4xf32>
    tpu.vector_store %arg12[%c1_74, %c1_75, %c0_76], %73 {strides = array<i32>} : memref<18x18x4xf32, #tpu.memory_space<vmem>>, vector<16x16x4xf32>,
    %c0_77 = arith.constant 0 : index
    %c0_78 = arith.constant 0 : index
    %75 = vector.load %arg8[%c0_77, %c0_78] : memref<36x4xf32, #tpu.memory_space<vmem>>, vector<36x4xf32>
    %c0_79 = arith.constant 0 : index
    %c0_80 = arith.constant 0 : index
    %c0_81 = arith.constant 0 : index
    %76 = vector.load %arg12[%c0_79, %c0_80, %c0_81] : memref<18x18x4xf32, #tpu.memory_space<vmem>>, vector<16x16x4xf32>
    %77 = vector.shape_cast %76 : vector<16x16x4xf32> to vector<256x4xf32>
    %c0_82 = arith.constant 0 : index
    %c1_83 = arith.constant 1 : index
    %c0_84 = arith.constant 0 : index
    %78 = vector.load %arg12[%c0_82, %c1_83, %c0_84] : memref<18x18x4xf32, #tpu.memory_space<vmem>>, vector<16x16x4xf32>
    %79 = vector.shape_cast %78 : vector<16x16x4xf32> to vector<256x4xf32>
    %c0_85 = arith.constant 0 : index
    %c2_86 = arith.constant 2 : index
    %c0_87 = arith.constant 0 : index
    %80 = vector.load %arg12[%c0_85, %c2_86, %c0_87] : memref<18x18x4xf32, #tpu.memory_space<vmem>>, vector<16x16x4xf32>
    %81 = vector.shape_cast %80 : vector<16x16x4xf32> to vector<256x4xf32>
    %c1_88 = arith.constant 1 : index
    %c0_89 = arith.constant 0 : index
    %c0_90 = arith.constant 0 : index
    %82 = vector.load %arg12[%c1_88, %c0_89, %c0_90] : memref<18x18x4xf32, #tpu.memory_space<vmem>>, vector<16x16x4xf32>
    %83 = vector.shape_cast %82 : vector<16x16x4xf32> to vector<256x4xf32>
    %c1_91 = arith.constant 1 : index
    %c1_92 = arith.constant 1 : index
    %c0_93 = arith.constant 0 : index
    %84 = vector.load %arg12[%c1_91, %c1_92, %c0_93] : memref<18x18x4xf32, #tpu.memory_space<vmem>>, vector<16x16x4xf32>
    %85 = vector.shape_cast %84 : vector<16x16x4xf32> to vector<256x4xf32>
    %c1_94 = arith.constant 1 : index
    %c2_95 = arith.constant 2 : index
    %c0_96 = arith.constant 0 : index
    %86 = vector.load %arg12[%c1_94, %c2_95, %c0_96] : memref<18x18x4xf32, #tpu.memory_space<vmem>>, vector<16x16x4xf32>
    %87 = vector.shape_cast %86 : vector<16x16x4xf32> to vector<256x4xf32>
    %c2_97 = arith.constant 2 : index
    %c0_98 = arith.constant 0 : index
    %c0_99 = arith.constant 0 : index
    %88 = vector.load %arg12[%c2_97, %c0_98, %c0_99] : memref<18x18x4xf32, #tpu.memory_space<vmem>>, vector<16x16x4xf32>
    %89 = vector.shape_cast %88 : vector<16x16x4xf32> to vector<256x4xf32>
    %c2_100 = arith.constant 2 : index
    %c1_101 = arith.constant 1 : index
    %c0_102 = arith.constant 0 : index
    %90 = vector.load %arg12[%c2_100, %c1_101, %c0_102] : memref<18x18x4xf32, #tpu.memory_space<vmem>>, vector<16x16x4xf32>
    %91 = vector.shape_cast %90 : vector<16x16x4xf32> to vector<256x4xf32>
    %c2_103 = arith.constant 2 : index
    %c2_104 = arith.constant 2 : index
    %c0_105 = arith.constant 0 : index
    %92 = vector.load %arg12[%c2_103, %c2_104, %c0_105] : memref<18x18x4xf32, #tpu.memory_space<vmem>>, vector<16x16x4xf32>
    %93 = vector.shape_cast %92 : vector<16x16x4xf32> to vector<256x4xf32>
    %94 = tpu.concatenate %77, %79, %81, %83, %85, %87, %89, %91, %93 in 1 : vector<256x4xf32>, vector<256x4xf32>, vector<256x4xf32>, vector<256x4xf32>, vector<256x4xf32>, vector<256x4xf32>, vector<256x4xf32>, vector<256x4xf32>, vector<256x4xf32> -> vector<256x36xf32>
    %cst_106 = arith.constant dense<0.000000e+00> : vector<256x4xf32>
    %95 = tpu.matmul %94, %75, %cst_106 {dimension_numbers = #tpu.dot_dimension_numbers<[1], [0], [0], [1], [0, 0, 1, 1], [], []>} : vector<256x36xf32>, vector<36x4xf32>, vector<256x4xf32> -> vector<256x4xf32>
    %96 = tpu.transpose %95, [1, 0] : vector<256x4xf32> -> vector<4x256xf32>
    %c0_107 = arith.constant 0 : index
    %c0_108 = arith.constant 0 : index
    %97 = vector.load %arg9[%c0_107, %c0_108] : memref<4x1xf32, #tpu.memory_space<vmem>>, vector<4x1xf32>
    %98 = vector.broadcast %97 : vector<4x1xf32> to vector<4x256xf32>
    %99 = arith.addf %96, %98 : vector<4x256xf32>
    %cst_109 = arith.constant dense<0.000000e+00> : vector<4xf32>
    %100 = vector.multi_reduction <add>, %99, %cst_109 [1] : vector<4x256xf32> to vector<4xf32>
    %101 = vector.shape_cast %100 : vector<4xf32> to vector<4x1xf32>
    %cst_110 = arith.constant 2.560000e+02 : f32
    %102 = vector.broadcast %cst_110 : f32 to vector<4x1xf32>
    %103 = arith.divf %101, %102 : vector<4x1xf32>
    %104 = vector.broadcast %103 : vector<4x1xf32> to vector<4x256xf32>
    %105 = arith.subf %99, %104 : vector<4x256xf32>
    %106 = arith.mulf %105, %105 : vector<4x256xf32>
    %cst_111 = arith.constant dense<0.000000e+00> : vector<4xf32>
    %107 = vector.multi_reduction <add>, %106, %cst_111 [1] : vector<4x256xf32> to vector<4xf32>
    %108 = vector.shape_cast %107 : vector<4xf32> to vector<4x1xf32>
    %cst_112 = arith.constant 2.560000e+02 : f32
    %109 = vector.broadcast %cst_112 : f32 to vector<4x1xf32>
    %110 = arith.divf %108, %109 : vector<4x1xf32>
    %111 = vector.broadcast %103 : vector<4x1xf32> to vector<4x256xf32>
    %112 = arith.subf %99, %111 : vector<4x256xf32>
    %cst_113 = arith.constant 9.99999974E-6 : f32
    %113 = vector.broadcast %cst_113 : f32 to vector<4x1xf32>
    %114 = arith.addf %110, %113 : vector<4x1xf32>
    %115 = math.rsqrt %114 : vector<4x1xf32>
    %116 = vector.broadcast %115 : vector<4x1xf32> to vector<4x256xf32>
    %117 = arith.mulf %112, %116 : vector<4x256xf32>
    %cst_114 = arith.constant 0.000000e+00 : f32
    %118 = vector.broadcast %cst_114 : f32 to vector<4x256xf32>
    %119 = arith.maximumf %117, %118 : vector<4x256xf32>
    %c0_115 = arith.constant 0 : index
    %c0_116 = arith.constant 0 : index
    %c0_117 = arith.constant 0 : index
    %120 = vector.load %arg10[%c0_115, %c0_116, %c0_117] : memref<1x4x256xf32, #tpu.memory_space<vmem>>, vector<1x4x256xf32>
    %121 = vector.shape_cast %120 : vector<1x4x256xf32> to vector<4x256xf32>
    %122 = vector.shape_cast %119 : vector<4x256xf32> to vector<1x4x256xf32>
    tpu.vector_store %arg10[%c0_115, %c0_116, %c0_117], %122 {strides = array<i32>} : memref<1x4x256xf32, #tpu.memory_space<vmem>>, vector<1x4x256xf32>,
    return
  }
  func.func @transform_0(%arg0: i32) -> (i32, i32, i32) {
    %c0_i32 = arith.constant 0 : i32
    %c0_i32_0 = arith.constant 0 : i32
    %c0_i32_1 = arith.constant 0 : i32
    return %arg0, %c0_i32, %c0_i32_0 : i32, i32, i32
  }
  func.func @transform_1(%arg0: i32) -> (i32, i32, i32, i32) {
    %c0_i32 = arith.constant 0 : i32
    %c0_i32_0 = arith.constant 0 : i32
    %c0_i32_1 = arith.constant 0 : i32
    %c0_i32_2 = arith.constant 0 : i32
    return %arg0, %c0_i32, %c0_i32_0, %c0_i32_1 : i32, i32, i32, i32
  }
  func.func @transform_2(%arg0: i32) -> (i32, i32) {
    %c0_i32 = arith.constant 0 : i32
    %c0_i32_0 = arith.constant 0 : i32
    %c0_i32_1 = arith.constant 0 : i32
    return %c0_i32, %c0_i32_0 : i32, i32
  }
  func.func @transform_3(%arg0: i32) -> (i32, i32, i32) {
    %c0_i32 = arith.constant 0 : i32
    %c0_i32_0 = arith.constant 0 : i32
    %c0_i32_1 = arith.constant 0 : i32
    %c0_i32_2 = arith.constant 0 : i32
    return %c0_i32, %c0_i32_0, %c0_i32_1 : i32, i32, i32
  }
  func.func @transform_4(%arg0: i32) -> (i32, i32) {
    %c0_i32 = arith.constant 0 : i32
    %c0_i32_0 = arith.constant 0 : i32
    %c0_i32_1 = arith.constant 0 : i32
    return %c0_i32, %c0_i32_0 : i32, i32
  }
  func.func @transform_5(%arg0: i32) -> (i32, i32) {
    %c0_i32 = arith.constant 0 : i32
    %c0_i32_0 = arith.constant 0 : i32
    %c0_i32_1 = arith.constant 0 : i32
    return %c0_i32, %c0_i32_0 : i32, i32
  }
  func.func @transform_6(%arg0: i32) -> (i32, i32) {
    %c0_i32 = arith.constant 0 : i32
    %c0_i32_0 = arith.constant 0 : i32
    %c0_i32_1 = arith.constant 0 : i32
    return %c0_i32, %c0_i32_0 : i32, i32
  }
  func.func @transform_7(%arg0: i32) -> (i32, i32) {
    %c0_i32 = arith.constant 0 : i32
    %c0_i32_0 = arith.constant 0 : i32
    %c0_i32_1 = arith.constant 0 : i32
    return %c0_i32, %c0_i32_0 : i32, i32
  }
  func.func @transform_8(%arg0: i32) -> (i32, i32) {
    %c0_i32 = arith.constant 0 : i32
    %c0_i32_0 = arith.constant 0 : i32
    %c0_i32_1 = arith.constant 0 : i32
    return %c0_i32, %c0_i32_0 : i32, i32
  }
  func.func @transform_9(%arg0: i32) -> (i32, i32, i32) {
    %c0_i32 = arith.constant 0 : i32
    %c0_i32_0 = arith.constant 0 : i32
    %c0_i32_1 = arith.constant 0 : i32
    return %arg0, %c0_i32, %c0_i32_0 : i32, i32, i32
  }
}

</mosaic_0001>

<bundles_post_ra>
// kernel: up_forward.1
= control target key start
LH: loop header
LB: loop body
LE: loop exit
PB: predicated region body
PF: predicated region fallthrough
CT: control target
= control target key end

     0   :  { %s6334_s30 = smov 0   ;;  %s9587_s0 = inlined_call_operand.vmem [shape: f32[2,64,4], index: 0, kind: input, shape index: {}]   ;;  %s9588_s1 = inlined_call_operand.vmem [shape: f32[2,16,16,4], index: 1, kind: input, shape index: {}]   ;;  %s9589_s2 = inlined_call_operand.vmem [shape: f32[256,256], index: 2, kind: input, shape index: {}]   ;;  %s9590_s3 = inlined_call_operand.vmem [shape: f32[4,4,4], index: 3, kind: input, shape index: {}]   ;;  %s9591_s4 = inlined_call_operand.vmem [shape: f32[1,4], index: 4, kind: input, shape index: {}]   ;;  %s9592_s5 = inlined_call_operand.vmem [shape: f32[72,4], index: 5, kind: input, shape index: {}]   ;;  %s9593_s6 = inlined_call_operand.vmem [shape: f32[1,4], index: 6, kind: input, shape index: {}]   ;;  %s9594_s7 = inlined_call_operand.vmem [shape: f32[36,4], index: 7, kind: input, shape index: {}]   ;;  %s9595_s8 = inlined_call_operand.vmem [shape: f32[4,1], index: 8, kind: input, shape index: {}]   ;;  %s9596_s9 = inlined_call_operand.vmem [shape: f32[2,4,256], index: 9, kind: output, shape index: {}]  }
   0x1 LB: > { %s5745_s10 = sadd.s32 4294967295, %s6267_s30   ;;  %p5749_p0 = scmp.ge.s32.totalorder %s6267_s30, 1  ;;  %s6267_s30 = sphi %s6334_s30, %s19_s30  }
   0x2   : > { %p297_p1 = scmp.lt.s32.totalorder %s6267_s30, 3 }
   0x4   : > { %p298_p2 = pnand %p5749_p0, %p297_p1 }
   0x6   : > { %301 = sbr.rel (%p298_p2) target bundleno = 2811 (0xafb), region = 56 }
   0xd   : > { %v361_v0 = vld [vmem:[%s9590_s3] sm:$0xf]  ;;  %vm387_vm0 = vcmask 1043456   ;;  %p338_p3 = scmp.lt.s32.totalorder %s5745_s10, 1  ;;  %v5765_v1 = vld [vmem:[%s9590_s3 + $0x4] sm:$0xf] }
   0xe   : > { %5981 = vmatprep.subr.msk.mxu1 %vm387_vm0, %v361_v0  ;;  %v5775_v2 = vld [vmem:[%s9590_s3 + $0x8] sm:$0xf]  ;;  %vm362_vm1 = vcmask 31744   ;;  %v5785_v6 = vld [vmem:[%s9590_s3 + $0xc] sm:$0xf]  ;;  %v6269_v12 = vmov 0.0|0.0  }
   0xf   : > { %5982 = vmatpush3.msk.msra.mxu1 %vm387_vm0, %v361_v0  ;;  %s9630_s10 = smov (!%p338_p3, %s5745_s10), 1  ;;  %6009 = vmatprep.subr.msk.mxu0 %vm387_vm0, %v5775_v2  ;;  %v827_v13 = vld [vmem:[%s9589_s2 + $0x8] sm:$0xff]  ;;  %vm1122_vm2 = vcmask 64512   ;;  %vm1125_vm3 = vcmask 58368   ;;  %vm3591_vm4 = vcmask 25600   ;;  %v6422_v62 = vld [vmem:[%s9589_s2] sm:$0xff] }
  0x10   : > { %5995 = vmatprep.subr.msk.mxu1 %vm387_vm0, %v5765_v1  ;;  %6010 = vmatpush3.msk.msra.mxu0 %vm387_vm0, %v5775_v2  ;;  %s5864_s17 = sshll.u32 %s9630_s10, 6  ;;  %v6270_v63 = vmov 0.0   ;;  %v829_v0 = vld [vmem:[%s9589_s2 + $0x18] sm:$0xff]  ;;  %v831_v2 = vld [vmem:[%s9589_s2 + $0x28] sm:$0xff]  ;;  %s6271_s16 = smov 8   ;;  %vm1371_vm5 = vcmask 64544  }
  0x11   : > { %s342_s20 = scalar_lea.vmem %s9587_s0, %s5864_s17  ;;  %6161 = vmatprep.subr.bf16.mxu0 %v6269_v12  ;;  %1123 = vst.msk [vmem:[#allocation2] sm:$0xff] %vm1122_vm2, %v6270_v63  ;;  %1124 = vst.msk [vmem:[#allocation2 + $0x8] sm:$0xff] %vm1122_vm2, %v6270_v63  ;;  %s6272_s21 = smov 16   ;;  %vm2758_vm6 = vcmask 130048   ;;  %vm2791_vm7 = vcmask 195584   ;;  %vm2824_vm8 = vcmask 261120  }
  0x12   : > { %v353_v3 = vld [vmem:[%s342_s20] sm:$0xff]  ;;  %v354_v4 = vld [vmem:[%s342_s20 + $0x8] sm:$0xff]  ;;  %v355_v5 = vld [vmem:[%s342_s20 + $0x10] sm:$0xff]  ;;  %1127 = vst.msk [vmem:[#allocation2 + $0x18] sm:$0xff] %vm1122_vm2, %v6270_v63  ;;  %s6273_s26 = smov 48   ;;  %s6274_s12 = smov 56  }
  0x13   : > { %5983 = vmatprep.mubr.msk.f32.mxu1 %vm362_vm1, %v353_v3  ;;  %6011 = vmatprep.mubr.msk.f32.mxu0 %vm362_vm1, %v353_v3  ;;  %v356_v7 = vld [vmem:[%s342_s20 + $0x18] sm:$0xff]  ;;  %v357_v8 = vld [vmem:[%s342_s20 + $0x20] sm:$0xff]  ;;  %v358_v9 = vld [vmem:[%s342_s20 + $0x28] sm:$0xff]  ;;  %1128 = vst.msk [vmem:[#allocation2 + $0x20] sm:$0xff] %vm1122_vm2, %v6270_v63  ;;  %s6275_s18 = smov 64   ;;  %s6276_s24 = smov 4  }
  0x14   : > { %5984 = vmatmul.mubr.msk.f32.vlgmr.msra.gmra.mrb[0].mxu1 %vm362_vm1, %v354_v4  ;;  %6012 = vmatmul.mubr.msk.f32.vlgmr.msra.gmra.mrb[0].mxu0 %vm362_vm1, %v354_v4  ;;  %v359_v10 = vld [vmem:[%s342_s20 + $0x30] sm:$0xff]  ;;  %v360_v11 = vld [vmem:[%s342_s20 + $0x38] sm:$0xff]  ;;  %1130 = vst.msk [vmem:[#allocation2 + $0x30] sm:$0xff] %vm1122_vm2, %v6270_v63  ;;  %1131 = vst.msk [vmem:[#allocation2 + $0x38] sm:$0xff] %vm1122_vm2, %v6270_v63  ;;  %s6277_s17 = smov 24   ;;  %s6278_s25 = smov 28  }
  0x15   : > { %5996 = vmatpush3.msk.msra.mxu1 %vm387_vm0, %v5765_v1  ;;  %5986 = vmatprep.mubr.msk.f32.mxu1 %vm362_vm1, %v355_v5  ;;  %1133 = vst.msk [vmem:[#allocation2 + $0x48] sm:$0xff] %vm1122_vm2, %v6270_v63  ;;  %1134 = vst.msk [vmem:[#allocation2 + $0x50] sm:$0xff] %vm1122_vm2, %v6270_v63  ;;  %v828_v1 = vld [vmem:[%s9589_s2 + $0x10] sm:$0xff]  ;;  %s5865_s19 = sshll.u32 %s9630_s10, 8  ;;  %s6279_s29 = smov 32   ;;  %vm2890_vm9 = vcmask 392192  }
  0x16   : > { %6023 = vmatprep.subr.msk.mxu1 %vm387_vm0, %v5785_v6  ;;  %6014 = vmatprep.mubr.msk.f32.mxu0 %vm362_vm1, %v355_v5  ;;  %1136 = vst.msk [vmem:[#allocation2 + $0x60] sm:$0xff] %vm1122_vm2, %v6270_v63  ;;  %1137 = vst.msk [vmem:[#allocation2 + $0x68] sm:$0xff] %vm1122_vm2, %v6270_v63  ;;  %s6849_s23 = scalar_lea.vmem %s9588_s1, %s5865_s19  ;;  %s6280_s11 = smov 40   ;;  %vm2857_vm10 = vcmask 326656   ;;  %vm2923_vm11 = vcmask 457728   ;;  %vm2956_vm12 = vcmask 523264  }
  0x17   : > { %1139 = vst.msk [vmem:[#allocation2 + $0x78] sm:$0xff] %vm1122_vm2, %v6270_v63  ;;  %1140 = vst.msk [vmem:[#allocation2 + $0x80] sm:$0xff] %vm1122_vm2, %v6270_v63  ;;  %vm2996_vm13 = vcmask 588800   ;;  %vm5059_vm14 = vcmask 97280   ;;  %vm5124_vm15 = vcmask 162816  }
  0x18   : > { %5987 = vmatmul.mubr.msk.f32.gmra.mrb[2].mxu1 %vm362_vm1, %v356_v7  ;;  %6015 = vmatmul.mubr.msk.f32.gmra.mrb[2].mxu0 %vm362_vm1, %v356_v7  ;;  %1142 = vst.msk [vmem:[#allocation2 + $0x90] sm:$0xff] %vm1122_vm2, %v6270_v63  ;;  %1143 = vst.msk [vmem:[#allocation2 + $0x98] sm:$0xff] %vm1122_vm2, %v6270_v63 }
  0x19   : > { %5989 = vmatprep.mubr.msk.f32.mxu1 %vm362_vm1, %v357_v8  ;;  %6017 = vmatprep.mubr.msk.f32.mxu0 %vm362_vm1, %v357_v8  ;;  %1145 = vst.msk [vmem:[#allocation2 + $0xa8] sm:$0xff] %vm1122_vm2, %v6270_v63  ;;  %1146 = vst.msk [vmem:[#allocation2 + $0xb0] sm:$0xff] %vm1122_vm2, %v6270_v63 }
  0x1a   : > { %1148 = vst.msk [vmem:[#allocation2 + $0xc0] sm:$0xff] %vm1122_vm2, %v6270_v63  ;;  %1149 = vst.msk [vmem:[#allocation2 + $0xc8] sm:$0xff] %vm1122_vm2, %v6270_v63 }
  0x1b   : > { %1151 = vst.msk [vmem:[#allocation2 + $0xd8] sm:$0xff] %vm1122_vm2, %v6270_v63  ;;  %1152 = vst.msk [vmem:[#allocation2 + $0xe0] sm:$0xff] %vm1122_vm2, %v6270_v63 }
  0x1c   : > { %5990 = vmatmul.mubr.msk.f32.gmra.mrb[4].mxu1 %vm362_vm1, %v358_v9  ;;  %6018 = vmatmul.mubr.msk.f32.gmra.mrb[4].mxu0 %vm362_vm1, %v358_v9  ;;  %1154 = vst.msk [vmem:[#allocation2 + $0xf0] sm:$0xff] %vm1122_vm2, %v6270_v63  ;;  %1155 = vst.msk [vmem:[#allocation2 + $0xf8] sm:$0xff] %vm1122_vm2, %v6270_v63 }
  0x1d   : > { %5992 = vmatprep.mubr.msk.f32.mxu1 %vm362_vm1, %v359_v10  ;;  %6020 = vmatprep.mubr.msk.f32.mxu0 %vm362_vm1, %v359_v10  ;;  %1157 = vst.msk [vmem:[#allocation2 + $0x108] sm:$0xff] %vm1122_vm2, %v6270_v63  ;;  %1158 = vst.msk [vmem:[#allocation2 + $0x110] sm:$0xff] %vm1122_vm2, %v6270_v63 }
  0x1e   : > { %1160 = vst.msk [vmem:[#allocation2 + $0x120] sm:$0xff] %vm1122_vm2, %v6270_v63  ;;  %1161 = vst.msk [vmem:[#allocation2 + $0x128] sm:$0xff] %vm1122_vm2, %v6270_v63 }
  0x1f   : > { %1163 = vst.msk [vmem:[#allocation2 + $0x138] sm:$0xff] %vm1122_vm2, %v6270_v63  ;;  %1164 = vst.msk [vmem:[#allocation2 + $0x140] sm:$0xff] %vm1122_vm2, %v6270_v63 }
  0x20   : > { %5993 = vmatmul.mubr.msk.f32.gmra.mrb[6].mxu1 %vm362_vm1, %v360_v11  ;;  %6021 = vmatmul.mubr.msk.f32.gmra.mrb[6].mxu0 %vm362_vm1, %v360_v11  ;;  %1166 = vst.msk [vmem:[#allocation2 + $0x150] sm:$0xff] %vm1122_vm2, %v6270_v63  ;;  %1167 = vst.msk [vmem:[#allocation2 + $0x158] sm:$0xff] %vm1122_vm2, %v6270_v63 }
  0x21   : > { %5997 = vmatprep.mubr.msk.f32.mxu1 %vm362_vm1, %v353_v3  ;;  %961 = vmatprep.mubr.f32.mxu0 %v827_v13  ;;  %1169 = vst.msk [vmem:[#allocation2 + $0x168] sm:$0xff] %vm1122_vm2, %v6270_v63  ;;  %1170 = vst.msk [vmem:[#allocation2 + $0x170] sm:$0xff] %vm1122_vm2, %v6270_v63  ;;  %v834_v13 = vld [vmem:[%s9589_s2 + $0x40] sm:$0xff] }
  0x22   : > { %1172 = vst.msk [vmem:[#allocation2 + $0x180] sm:$0xff] %vm1122_vm2, %v6270_v63  ;;  %1173 = vst.msk [vmem:[#allocation2 + $0x188] sm:$0xff] %vm1122_vm2, %v6270_v63 }
  0x23   : > { %1175 = vst.msk [vmem:[#allocation2 + $0x198] sm:$0xff] %vm1122_vm2, %v6270_v63  ;;  %1176 = vst.msk [vmem:[#allocation2 + $0x1a0] sm:$0xff] %vm1122_vm2, %v6270_v63 }
  0x24   : > { %5998 = vmatmul.mubr.msk.f32.vlgmr.msra.gmra.mrb[8].mxu1 %vm362_vm1, %v354_v4  ;;  %3589 = vst.msk [vmem:[#allocation3] sm:$0xff] %vm362_vm1, %v6270_v63  ;;  %3590 = vst.msk [vmem:[#allocation3 + $0x8] sm:$0xff] %vm362_vm1, %v6270_v63 }
  0x25   : > { %6000 = vmatprep.mubr.msk.f32.mxu1 %vm362_vm1, %v355_v5  ;;  %6024 = vmatpush3.msk.msra.mxu1 %vm387_vm0, %v5785_v6  ;;  %3593 = vst.msk [vmem:[#allocation3 + $0x18] sm:$0xff] %vm362_vm1, %v6270_v63  ;;  %3594 = vst.msk [vmem:[#allocation3 + $0x20] sm:$0xff] %vm362_vm1, %v6270_v63  ;;  %v833_v6 = vld [vmem:[%s9589_s2 + $0x38] sm:$0xff] }
  0x26   : > { %3596 = vst.msk [vmem:[#allocation3 + $0x30] sm:$0xff] %vm362_vm1, %v6270_v63  ;;  %3597 = vst.msk [vmem:[#allocation3 + $0x38] sm:$0xff] %vm362_vm1, %v6270_v63 }
  0x27   : > { %3599 = vst.msk [vmem:[#allocation3 + $0x48] sm:$0xff] %vm362_vm1, %v6270_v63  ;;  %3600 = vst.msk [vmem:[#allocation3 + $0x50] sm:$0xff] %vm362_vm1, %v6270_v63 }
  0x28   : > { %6001 = vmatmul.mubr.msk.f32.gmra.mrb[10].mxu1 %vm362_vm1, %v356_v7  ;;  %3602 = vst.msk [vmem:[#allocation3 + $0x60] sm:$0xff] %vm362_vm1, %v6270_v63  ;;  %3603 = vst.msk [vmem:[#allocation3 + $0x68] sm:$0xff] %vm362_vm1, %v6270_v63 }
  0x29   : > { %6003 = vmatprep.mubr.msk.f32.mxu1 %vm362_vm1, %v357_v8  ;;  %3605 = vst.msk [vmem:[#allocation3 + $0x78] sm:$0xff] %vm362_vm1, %v6270_v63  ;;  %3606 = vst.msk [vmem:[#allocation3 + $0x80] sm:$0xff] %vm362_vm1, %v6270_v63 }
  0x2a   : > { %3608 = vst.msk [vmem:[#allocation3 + $0x90] sm:$0xff] %vm362_vm1, %v6270_v63  ;;  %3609 = vst.msk [vmem:[#allocation3 + $0x98] sm:$0xff] %vm362_vm1, %v6270_v63 }
  0x2b   : > { %3611 = vst.msk [vmem:[#allocation3 + $0xa8] sm:$0xff] %vm362_vm1, %v6270_v63  ;;  %3612 = vst.msk [vmem:[#allocation3 + $0xb0] sm:$0xff] %vm362_vm1, %v6270_v63 }
  0x2c   : > { %6004 = vmatmul.mubr.msk.f32.gmra.mrb[12].mxu1 %vm362_vm1, %v358_v9  ;;  %3614 = vst.msk [vmem:[#allocation3 + $0xc0] sm:$0xff] %vm362_vm1, %v6270_v63  ;;  %3615 = vst.msk [vmem:[#allocation3 + $0xc8] sm:$0xff] %vm362_vm1, %v6270_v63 }
  0x2d   : > { %6006 = vmatprep.mubr.msk.f32.mxu1 %vm362_vm1, %v359_v10  ;;  %3617 = vst.msk [vmem:[#allocation3 + $0xd8] sm:$0xff] %vm362_vm1, %v6270_v63  ;;  %3618 = vst.msk [vmem:[#allocation3 + $0xe0] sm:$0xff] %vm362_vm1, %v6270_v63 }
  0x2e   : > { %3620 = vst.msk [vmem:[#allocation3 + $0xf0] sm:$0xff] %vm362_vm1, %v6270_v63  ;;  %3621 = vst.msk [vmem:[#allocation3 + $0xf8] sm:$0xff] %vm362_vm1, %v6270_v63 }
  0x2f   : > { %3623 = vst.msk [vmem:[#allocation3 + $0x108] sm:$0xff] %vm362_vm1, %v6270_v63  ;;  %3624 = vst.msk [vmem:[#allocation3 + $0x110] sm:$0xff] %vm362_vm1, %v6270_v63 }
  0x30   : > { %6007 = vmatmul.mubr.msk.f32.gmra.mrb[14].mxu1 %vm362_vm1, %v360_v11  ;;  %3626 = vst.msk [vmem:[#allocation3 + $0x120] sm:$0xff] %vm362_vm1, %v6270_v63  ;;  %3627 = vst.msk [vmem:[#allocation3 + $0x128] sm:$0xff] %vm362_vm1, %v6270_v63 }
  0x31   : > { %6025 = vmatprep.mubr.msk.f32.mxu1 %vm362_vm1, %v353_v3  ;;  %3629 = vst.msk [vmem:[#allocation3 + $0x138] sm:$0xff] %vm362_vm1, %v6270_v63  ;;  %3630 = vst.msk [vmem:[#allocation3 + $0x140] sm:$0xff] %vm362_vm1, %v6270_v63  ;;  %v1445_v3 = vld [vmem:[#allocation2 + $0x1] sm:$0xff] }
  0x32   : > { %3632 = vst.msk [vmem:[#allocation3 + $0x150] sm:$0xff] %vm362_vm1, %v6270_v63  ;;  %3633 = vst.msk [vmem:[#allocation3 + $0x158] sm:$0xff] %vm362_vm1, %v6270_v63  ;;  %1734 = vrot.lane.b32.xlu0 %v1445_v3, %s6271_s16  ;;  %v876_v3 = vld [vmem:[%s9589_s2 + $0x190] sm:$0xff] }
  0x33   : > { %3635 = vst.msk [vmem:[#allocation3 + $0x168] sm:$0xff] %vm362_vm1, %v6270_v63  ;;  %3636 = vst.msk [vmem:[#allocation3 + $0x170] sm:$0xff] %vm362_vm1, %v6270_v63 }
  0x34   : > { %6026 = vmatmul.mubr.msk.f32.vlgmr.msra.gmra.mrb[16].mxu1 %vm362_vm1, %v354_v4  ;;  %3638 = vst.msk [vmem:[#allocation3 + $0x180] sm:$0xff] %vm362_vm1, %v6270_v63  ;;  %3639 = vst.msk [vmem:[#allocation3 + $0x188] sm:$0xff] %vm362_vm1, %v6270_v63  ;;  %v830_v4 = vld [vmem:[%s9589_s2 + $0x20] sm:$0xff] }
  0x35   : > { %6028 = vmatprep.mubr.msk.f32.mxu1 %vm362_vm1, %v355_v5  ;;  %3641 = vst.msk [vmem:[#allocation3 + $0x198] sm:$0xff] %vm362_vm1, %v6270_v63  ;;  %3642 = vst.msk [vmem:[#allocation3 + $0x1a0] sm:$0xff] %vm362_vm1, %v6270_v63 }
  0x36   : > { %1126 = vst.msk [vmem:[#allocation2 + $0x10] sm:$0x3] %vm1125_vm3, %v6270_v63  ;;  %1129 = vst.msk [vmem:[#allocation2 + $0x28] sm:$0x3] %vm1125_vm3, %v6270_v63 }
  0x37   : > { %1132 = vst.msk [vmem:[#allocation2 + $0x40] sm:$0x3] %vm1125_vm3, %v6270_v63  ;;  %1135 = vst.msk [vmem:[#allocation2 + $0x58] sm:$0x3] %vm1125_vm3, %v6270_v63 }
  0x38   : > { %6029 = vmatmul.mubr.msk.f32.gmra.mrb[18].mxu1 %vm362_vm1, %v356_v7  ;;  %1138 = vst.msk [vmem:[#allocation2 + $0x70] sm:$0x3] %vm1125_vm3, %v6270_v63  ;;  %1141 = vst.msk [vmem:[#allocation2 + $0x88] sm:$0x3] %vm1125_vm3, %v6270_v63  ;;  %v1477_v7 = vld [vmem:[#allocation2 + $0x2] sm:$0xff] }
  0x39   : > { %6031 = vmatprep.mubr.msk.f32.mxu1 %vm362_vm1, %v357_v8  ;;  %1144 = vst.msk [vmem:[#allocation2 + $0xa0] sm:$0x3] %vm1125_vm3, %v6270_v63  ;;  %1147 = vst.msk [vmem:[#allocation2 + $0xb8] sm:$0x3] %vm1125_vm3, %v6270_v63  ;;  %1862 = vrot.lane.b32.xlu0 %v1477_v7, %s6272_s21  ;;  %v880_v7 = vld [vmem:[%s9589_s2 + $0x1b0] sm:$0xff] }
  0x3a   : > { %1150 = vst.msk [vmem:[#allocation2 + $0xd0] sm:$0x3] %vm1125_vm3, %v6270_v63  ;;  %1153 = vst.msk [vmem:[#allocation2 + $0xe8] sm:$0x3] %vm1125_vm3, %v6270_v63 }
  0x3b   : > { %1156 = vst.msk [vmem:[#allocation2 + $0x100] sm:$0x3] %vm1125_vm3, %v6270_v63  ;;  %1159 = vst.msk [vmem:[#allocation2 + $0x118] sm:$0x3] %vm1125_vm3, %v6270_v63 }
  0x3c   : > { %6032 = vmatmul.mubr.msk.f32.gmra.mrb[20].mxu1 %vm362_vm1, %v358_v9  ;;  %1162 = vst.msk [vmem:[#allocation2 + $0x130] sm:$0x3] %vm1125_vm3, %v6270_v63  ;;  %1165 = vst.msk [vmem:[#allocation2 + $0x148] sm:$0x3] %vm1125_vm3, %v6270_v63  ;;  %v832_v9 = vld [vmem:[%s9589_s2 + $0x30] sm:$0xff] }
  0x3d   : > { %6034 = vmatprep.mubr.msk.f32.mxu1 %vm362_vm1, %v359_v10  ;;  %1168 = vst.msk [vmem:[#allocation2 + $0x160] sm:$0x3] %vm1125_vm3, %v6270_v63  ;;  %1171 = vst.msk [vmem:[#allocation2 + $0x178] sm:$0x3] %vm1125_vm3, %v6270_v63  ;;  %v1446_v5 = vld [vmem:[#allocation2 + $0x9] sm:$0xff] }
  0x3e   : > { %1174 = vst.msk [vmem:[#allocation2 + $0x190] sm:$0x3] %vm1125_vm3, %v6270_v63  ;;  %1177 = vst.msk [vmem:[#allocation2 + $0x1a8] sm:$0x3] %vm1125_vm3, %v6270_v63  ;;  %1736 = vrot.lane.b32.xlu1 %v1446_v5, %s6271_s16  ;;  %v1478_v8 = vld [vmem:[#allocation2 + $0xa] sm:$0xff]  ;;  %v878_v5 = vld [vmem:[%s9589_s2 + $0x1a0] sm:$0xff] }
  0x3f   : > { %3592 = vst.msk [vmem:[#allocation3 + $0x10] sm:$0x3] %vm3591_vm4, %v6270_v63  ;;  %3595 = vst.msk [vmem:[#allocation3 + $0x28] sm:$0x3] %vm3591_vm4, %v6270_v63  ;;  %v835_v10 = vld [vmem:[%s9589_s2 + $0x48] sm:$0xff]  ;;  %vm5189_vm3 = vcmask 228352  }
  0x40   : > { %6035 = vmatmul.mubr.msk.f32.gmra.mrb[22].mxu1 %vm362_vm1, %v360_v11  ;;  %3598 = vst.msk [vmem:[#allocation3 + $0x40] sm:$0x3] %vm3591_vm4, %v6270_v63  ;;  %3601 = vst.msk [vmem:[#allocation3 + $0x58] sm:$0x3] %vm3591_vm4, %v6270_v63  ;;  %v1636_v11 = vld [vmem:[#allocation2 + $0x198] sm:$0xff] }
  0x41   : > { %3604 = vst.msk [vmem:[#allocation3 + $0x70] sm:$0x3] %vm3591_vm4, %v6270_v63  ;;  %3607 = vst.msk [vmem:[#allocation3 + $0x88] sm:$0x3] %vm3591_vm4, %v6270_v63  ;;  %2434 = vrot.lane.b32.xlu0 %v1636_v11, %s6273_s26  ;;  %v884_v11 = vld [vmem:[%s9589_s2 + $0x1d0] sm:$0xff] }
  0x42   : > { %3610 = vst.msk [vmem:[#allocation3 + $0xa0] sm:$0x3] %vm3591_vm4, %v6270_v63  ;;  %3613 = vst.msk [vmem:[#allocation3 + $0xb8] sm:$0x3] %vm3591_vm4, %v6270_v63  ;;  %1864 = vrot.lane.b32.xlu1 %v1478_v8, %s6272_s21  ;;  %v883_v8 = vld [vmem:[%s9589_s2 + $0x1c8] sm:$0xff] }
  0x43   : > { %3616 = vst.msk [vmem:[#allocation3 + $0xd0] sm:$0x3] %vm3591_vm4, %v6270_v63  ;;  %3619 = vst.msk [vmem:[#allocation3 + $0xe8] sm:$0x3] %vm3591_vm4, %v6270_v63 }
  0x44   : > { %3622 = vst.msk [vmem:[#allocation3 + $0x100] sm:$0x3] %vm3591_vm4, %v6270_v63  ;;  %3625 = vst.msk [vmem:[#allocation3 + $0x118] sm:$0x3] %vm3591_vm4, %v6270_v63 }
  0x45   : > { %3628 = vst.msk [vmem:[#allocation3 + $0x130] sm:$0x3] %vm3591_vm4, %v6270_v63  ;;  %3631 = vst.msk [vmem:[#allocation3 + $0x148] sm:$0x3] %vm3591_vm4, %v6270_v63 }
  0x46   : > { %3634 = vst.msk [vmem:[#allocation3 + $0x160] sm:$0x3] %vm3591_vm4, %v6270_v63  ;;  %3637 = vst.msk [vmem:[#allocation3 + $0x178] sm:$0x3] %vm3591_vm4, %v6270_v63 }
  0x47   : > { %3640 = vst.msk [vmem:[#allocation3 + $0x190] sm:$0x3] %vm3591_vm4, %v6270_v63  ;;  %3643 = vst.msk [vmem:[#allocation3 + $0x1a8] sm:$0x3] %vm3591_vm4, %v6270_v63  ;;  %v872_v63 = vld [vmem:[%s9589_s2 + $0x170] sm:$0xff]  ;;  %vm5254_vm4 = vcmask 293888  }
  0xe7   : > { %v5985_v14 = vpop.f32.mrb[0].mxu1  ;;  %v6013_v15 = vpop.f32.mrb[0].mxu0 }
  0xe8   : > { %v457_v16 = vpop.f32.mrb[1].mxu1  ;;  %v677_v17 = vpop.f32.mrb[1].mxu0 }
  0xe9   : > { %v6162_v18 = vpack.c.bf16 %v5985_v14, %v457_v16  ;;  %v6186_v19 = vpack.c.bf16 %v6013_v15, %v677_v17  ;;  %v837_v14 = vld [vmem:[%s9589_s2 + $0x58] sm:$0xff]  ;;  %v1669_v16 = vld [vmem:[#allocation2 + $0x1a1] sm:$0xff]  ;;  %v836_v17 = vld [vmem:[%s9589_s2 + $0x50] sm:$0xff] }
  0xea   : > { %v1668_v15 = vld [vmem:[#allocation2 + $0x199] sm:$0xff] }
  0xeb   : > { %v5988_v20 = vpop.f32.mrb[2].mxu1  ;;  %6163 = vmatpush1.bf16.msra.mxu0 %v6162_v18  ;;  %v6016_v21 = vpop.f32.mrb[2].mxu0  ;;  %2562 = vrot.lane.b32.xlu0 %v1668_v15, %s6274_s12  ;;  %v839_v18 = vld [vmem:[%s9589_s2 + $0x68] sm:$0xff]  ;;  %v888_v15 = vld [vmem:[%s9589_s2 + $0x1f0] sm:$0xff] }
  0xec   : > { %v467_v22 = vpop.f32.mrb[3].mxu1  ;;  %6164 = vmatprep.subr.bf16.mxu0 %v6269_v12  ;;  %v687_v23 = vpop.f32.mrb[3].mxu0 }
  0xed   : > { %v6165_v24 = vpack.c.bf16 %v5988_v20, %v467_v22  ;;  %v6189_v25 = vpack.c.bf16 %v6016_v21, %v687_v23  ;;  %v1701_v20 = vld [vmem:[#allocation2 + $0x1a2] sm:$0xff]  ;;  %v841_v22 = vld [vmem:[%s9589_s2 + $0x78] sm:$0xff] }
  0xee   : > { %v838_v21 = vld [vmem:[%s9589_s2 + $0x60] sm:$0xff]  ;;  %v3714_v23 = vld [vmem:[#allocation3 + $0x1] sm:$0xff] }
  0xef   : > { %v5991_v26 = vpop.f32.mrb[4].mxu1  ;;  %6166 = vmatpush1.bf16.msra.mxu0 %v6165_v24  ;;  %v6019_v27 = vpop.f32.mrb[4].mxu0  ;;  %v3715_v24 = vld [vmem:[#allocation3 + $0x9] sm:$0xff] }
  0xf0   : > { %v477_v28 = vpop.f32.mrb[5].mxu1  ;;  %6167 = vmatprep.subr.bf16.mxu0 %v6269_v12  ;;  %v697_v29 = vpop.f32.mrb[5].mxu0 }
  0xf1   : > { %v6168_v30 = vpack.c.bf16 %v5991_v26, %v477_v28  ;;  %v6192_v31 = vpack.c.bf16 %v6019_v27, %v697_v29  ;;  %v843_v26 = vld [vmem:[%s9589_s2 + $0x88] sm:$0xff]  ;;  %v3746_v27 = vld [vmem:[#allocation3 + $0x2] sm:$0xff]  ;;  %v3747_v28 = vld [vmem:[#allocation3 + $0xa] sm:$0xff] }
  0xf2   : > { %v842_v29 = vld [vmem:[%s9589_s2 + $0x80] sm:$0xff] }
  0xf3   : > { %v5994_v32 = vpop.f32.mrb[6].mxu1  ;;  %6169 = vmatpush1.bf16.msra.mxu0 %v6168_v30  ;;  %v6022_v33 = vpop.f32.mrb[6].mxu0  ;;  %v845_v30 = vld [vmem:[%s9589_s2 + $0x98] sm:$0xff] }
  0xf4   : > { %v487_v34 = vpop.f32.mrb[7].mxu1  ;;  %6170 = vmatprep.subr.bf16.mxu0 %v6269_v12  ;;  %v707_v35 = vpop.f32.mrb[7].mxu0 }
  0xf5   : > { %v6171_v36 = vpack.c.bf16 %v5994_v32, %v487_v34  ;;  %v6195_v37 = vpack.c.bf16 %v6022_v33, %v707_v35  ;;  %v844_v32 = vld [vmem:[%s9589_s2 + $0x90] sm:$0xff]  ;;  %v847_v33 = vld [vmem:[%s9589_s2 + $0xa8] sm:$0xff]  ;;  %v846_v35 = vld [vmem:[%s9589_s2 + $0xa0] sm:$0xff] }
  0xf6   : > { %v3937_v34 = vld [vmem:[#allocation3 + $0x199] sm:$0xff] }
  0xf7   : > { %v5999_v38 = vpop.f32.mrb[8].mxu1  ;;  %6172 = vmatpush1.bf16.msra.mxu0 %v6171_v36  ;;  %v849_v36 = vld [vmem:[%s9589_s2 + $0xb8] sm:$0xff] }
  0xf8   : > { %v567_v39 = vpop.f32.mrb[9].mxu1  ;;  %6173 = vmatprep.subr.bf16.mxu0 %v6269_v12 }
  0xf9   : > { %v6174_v40 = vpack.c.bf16 %v5999_v38, %v567_v39  ;;  %v851_v38 = vld [vmem:[%s9589_s2 + $0xc8] sm:$0xff]  ;;  %v850_v39 = vld [vmem:[%s9589_s2 + $0xc0] sm:$0xff] }
  0xfb   : > { %v6002_v41 = vpop.f32.mrb[10].mxu1  ;;  %6175 = vmatpush1.bf16.msra.mxu0 %v6174_v40  ;;  %v853_v40 = vld [vmem:[%s9589_s2 + $0xd8] sm:$0xff] }
  0xfc   : > { %v577_v42 = vpop.f32.mrb[11].mxu1  ;;  %6176 = vmatprep.subr.bf16.mxu0 %v6269_v12 }
  0xfd   : > { %v6177_v43 = vpack.c.bf16 %v6002_v41, %v577_v42  ;;  %v852_v41 = vld [vmem:[%s9589_s2 + $0xd0] sm:$0xff]  ;;  %v855_v42 = vld [vmem:[%s9589_s2 + $0xe8] sm:$0xff] }
  0xff   : > { %v6005_v44 = vpop.f32.mrb[12].mxu1  ;;  %6178 = vmatpush1.bf16.msra.mxu0 %v6177_v43  ;;  %v854_v43 = vld [vmem:[%s9589_s2 + $0xe0] sm:$0xff] }
 0x100   : > { %v587_v45 = vpop.f32.mrb[13].mxu1  ;;  %6179 = vmatprep.subr.bf16.mxu0 %v6269_v12 }
 0x101   : > { %v6180_v46 = vpack.c.bf16 %v6005_v44, %v587_v45  ;;  %v857_v44 = vld [vmem:[%s9589_s2 + $0xf8] sm:$0xff]  ;;  %v856_v45 = vld [vmem:[%s9589_s2 + $0xf0] sm:$0xff] }
 0x103   : > { %v6008_v47 = vpop.f32.mrb[14].mxu1  ;;  %6181 = vmatpush1.bf16.msra.mxu0 %v6180_v46  ;;  %v859_v46 = vld [vmem:[%s9589_s2 + $0x108] sm:$0xff] }
 0x104   : > { %v597_v48 = vpop.f32.mrb[15].mxu1  ;;  %6182 = vmatprep.subr.bf16.mxu0 %v6269_v12 }
 0x105   : > { %v6183_v49 = vpack.c.bf16 %v6008_v47, %v597_v48  ;;  %v858_v47 = vld [vmem:[%s9589_s2 + $0x100] sm:$0xff]  ;;  %v861_v48 = vld [vmem:[%s9589_s2 + $0x118] sm:$0xff] }
 0x107   : > { %6184 = vmatpush1.bf16.msra.mxu0 %v6183_v49  ;;  %v6027_v50 = vpop.f32.mrb[16].mxu1  ;;  %v860_v49 = vld [vmem:[%s9589_s2 + $0x110] sm:$0xff] }
 0x108   : > { %6185 = vmatprep.subr.bf16.mxu0 %v6269_v12  ;;  %v787_v51 = vpop.f32.mrb[17].mxu1 }
 0x109   : > { %v6198_v52 = vpack.c.bf16 %v6027_v50, %v787_v51  ;;  %v863_v50 = vld [vmem:[%s9589_s2 + $0x128] sm:$0xff]  ;;  %v862_v51 = vld [vmem:[%s9589_s2 + $0x120] sm:$0xff] }
 0x10b   : > { %6187 = vmatpush1.bf16.msra.mxu0 %v6186_v19  ;;  %v6030_v53 = vpop.f32.mrb[18].mxu1  ;;  %v1700_v19 = vld [vmem:[#allocation2 + $0x19a] sm:$0xff] }
 0x10c   : > { %6188 = vmatprep.subr.bf16.mxu0 %v6269_v12  ;;  %v797_v54 = vpop.f32.mrb[19].mxu1  ;;  %2690 = vrot.lane.b32.xlu0 %v1700_v19, %s6275_s18  ;;  %v6860_v19 = vld [vmem:[%s9591_s4] ss:$0 sm:$0xff] }
 0x10d   : > { %v6201_v55 = vpack.c.bf16 %v6030_v53, %v797_v54  ;;  %v864_v53 = vld [vmem:[%s9589_s2 + $0x130] sm:$0xff]  ;;  %v867_v54 = vld [vmem:[%s9589_s2 + $0x148] sm:$0xff] }
 0x10f   : > { %6190 = vmatpush1.bf16.msra.mxu0 %v6189_v25  ;;  %v6033_v56 = vpop.f32.mrb[20].mxu1  ;;  %v840_v25 = vld [vmem:[%s9589_s2 + $0x70] sm:$0xff] }
 0x110   : > { %6191 = vmatprep.subr.bf16.mxu0 %v6269_v12  ;;  %v807_v57 = vpop.f32.mrb[21].mxu1  ;;  %4003 = vrot.lane.b32.xlu0 %v3714_v23, %s6276_s24 }
 0x111   : > { %v6204_v58 = vpack.c.bf16 %v6033_v56, %v807_v57  ;;  %v869_v56 = vld [vmem:[%s9589_s2 + $0x158] sm:$0xff]  ;;  %v868_v57 = vld [vmem:[%s9589_s2 + $0x150] sm:$0xff] }
 0x113   : > { %6193 = vmatpush1.bf16.msra.mxu0 %v6192_v31  ;;  %v6036_v59 = vpop.f32.mrb[22].mxu1  ;;  %v3905_v31 = vld [vmem:[#allocation3 + $0x198] sm:$0xff] }
 0x114   : > { %6194 = vmatprep.subr.bf16.mxu0 %v6269_v12  ;;  %v817_v60 = vpop.f32.mrb[23].mxu1  ;;  %4131 = vrot.lane.b32.xlu0 %v3746_v27, %s6271_s16  ;;  %v1182_v27 = vld [vmem:[%s6849_s23 + $0x20] sm:$0xff] }
 0x115   : > { %v6207_v61 = vpack.c.bf16 %v6036_v59, %v817_v60  ;;  %v3906_v59 = vld [vmem:[#allocation3 + $0x1a0] sm:$0xff]  ;;  %v870_v60 = vld [vmem:[%s9589_s2 + $0x160] sm:$0xff]  ;;  %1215 = vst.msk [vmem:[#allocation2 + $0x49] sm:$0xff] %vm362_vm1, %v1182_v27 }
 0x117   : > { %6196 = vmatpush1.bf16.msra.mxu0 %v6195_v37  ;;  %v848_v37 = vld [vmem:[%s9589_s2 + $0xb0] sm:$0xff] }
 0x118   : > { %6197 = vmatprep.subr.bf16.mxu0 %v6269_v12  ;;  %4703 = vrot.lane.b32.xlu0 %v3905_v31, %s6277_s17 }
 0x11b   : > { %6199 = vmatpush1.bf16.msra.mxu0 %v6198_v52  ;;  %v865_v52 = vld [vmem:[%s9589_s2 + $0x138] sm:$0xff] }
 0x11c   : > { %6200 = vmatprep.subr.bf16.mxu0 %v6269_v12  ;;  %4831 = vrot.lane.b32.xlu0 %v3937_v34, %s6278_s25 }
 0x11f   : > { %6202 = vmatpush1.bf16.msra.mxu0 %v6201_v55  ;;  %v866_v55 = vld [vmem:[%s9589_s2 + $0x140] sm:$0xff] }
 0x120   : > { %6203 = vmatprep.subr.bf16.mxu0 %v6269_v12 }
 0x123   : > { %6205 = vmatpush1.bf16.msra.mxu0 %v6204_v58  ;;  %v871_v58 = vld [vmem:[%s9589_s2 + $0x168] sm:$0xff] }
 0x124   : > { %6206 = vmatprep.subr.bf16.mxu0 %v6269_v12  ;;  %v1637_v12 = vld [vmem:[#allocation2 + $0x1a0] sm:$0xff] }
 0x125   : > { %2436 = vrot.lane.b32.xlu1 %v1637_v12, %s6273_s26  ;;  %v887_v12 = vld [vmem:[%s9589_s2 + $0x1e8] sm:$0xff] }
 0x127   : > { %6208 = vmatpush1.bf16.msra.mxu0 %v6207_v61  ;;  %v873_v61 = vld [vmem:[%s9589_s2 + $0x178] sm:$0xff] }
 0x129   : > { %2564 = vrot.lane.b32.xlu1 %v1669_v16, %s6274_s12  ;;  %v1178_v16 = vld [vmem:[%s6849_s23] sm:$0xff] }
 0x12a   : > { %962 = vmatmul.mubr.f32.vlgmr.msra.gmra.mrb[8].mxu0 %v6422_v62  ;;  %v3938_v62 = vld [vmem:[#allocation3 + $0x1a1] sm:$0xff]  ;;  %1211 = vst.msk [vmem:[#allocation2 + $0x19] sm:$0xff] %vm362_vm1, %v1178_v16 }
 0x12b   : > { %966 = vmatprep.mubr.f32.mxu0 %v829_v0  ;;  %v875_v0 = vld [vmem:[%s9589_s2 + $0x188] sm:$0xff] }
 0x12d   : > { %2692 = vrot.lane.b32.xlu1 %v1701_v20, %s6275_s18  ;;  %v1181_v20 = vld [vmem:[%s6849_s23 + $0x18] sm:$0xff] }
 0x12e   : > { %967 = vmatmul.mubr.f32.gmra.mrb[10].mxu0 %v828_v1  ;;  %v874_v1 = vld [vmem:[%s9589_s2 + $0x180] sm:$0xff]  ;;  %1214 = vst.msk [vmem:[#allocation2 + $0x39] sm:$0xff] %vm362_vm1, %v1181_v20  ;;  %v1196_v20 = vld [vmem:[%s6849_s23 + $0x90] sm:$0xff] }
 0x12f   : > { %971 = vmatprep.mubr.f32.mxu0 %v831_v2  ;;  %v877_v2 = vld [vmem:[%s9589_s2 + $0x198] sm:$0xff]  ;;  %1229 = vst.msk [vmem:[#allocation2 + $0xf1] sm:$0xff] %vm362_vm1, %v1196_v20 }
 0x131   : > { %4005 = vrot.lane.b32.xlu1 %v3715_v24, %s6276_s24 }
 0x132   : > { %972 = vmatmul.mubr.f32.gmra.mrb[12].mxu0 %v830_v4  ;;  %v879_v4 = vld [vmem:[%s9589_s2 + $0x1a8] sm:$0xff] }
 0x133   : > { %976 = vmatprep.mubr.f32.mxu0 %v833_v6  ;;  %v881_v6 = vld [vmem:[%s9589_s2 + $0x1b8] sm:$0xff] }
 0x135   : > { %4133 = vrot.lane.b32.xlu1 %v3747_v28, %s6271_s16  ;;  %v1183_v28 = vld [vmem:[%s6849_s23 + $0x28] sm:$0xff] }
 0x136   : > { %977 = vmatmul.mubr.f32.gmra.mrb[14].mxu0 %v832_v9  ;;  %v882_v9 = vld [vmem:[%s9589_s2 + $0x1c0] sm:$0xff]  ;;  %1216 = vst.msk [vmem:[#allocation2 + $0x51] sm:$0xff] %vm362_vm1, %v1183_v28 }
 0x137   : > { %981 = vmatprep.mubr.f32.mxu0 %v835_v10  ;;  %v885_v10 = vld [vmem:[%s9589_s2 + $0x1d8] sm:$0xff] }
 0x139   : > { %4705 = vrot.lane.b32.xlu1 %v3906_v59, %s6277_s17  ;;  %v1190_v59 = vld [vmem:[%s6849_s23 + $0x60] sm:$0xff] }
 0x13a   : > { %982 = vmatmul.mubr.f32.gmra.mrb[16].mxu0 %v834_v13  ;;  %v886_v13 = vld [vmem:[%s9589_s2 + $0x1e0] sm:$0xff]  ;;  %1223 = vst.msk [vmem:[#allocation2 + $0xa9] sm:$0xff] %vm362_vm1, %v1190_v59 }
 0x13b   : > { %986 = vmatprep.mubr.f32.mxu0 %v837_v14  ;;  %v889_v14 = vld [vmem:[%s9589_s2 + $0x1f8] sm:$0xff] }
 0x13d   : > { %4833 = vrot.lane.b32.xlu1 %v3938_v62, %s6278_s25 }
 0x13e   : > { %987 = vmatmul.mubr.f32.gmra.mrb[18].mxu0 %v836_v17  ;;  %v1179_v17 = vld [vmem:[%s6849_s23 + $0x8] sm:$0xff] }
 0x13f   : > { %991 = vmatprep.mubr.f32.mxu0 %v839_v18  ;;  %1212 = vst.msk [vmem:[#allocation2 + $0x21] sm:$0xff] %vm362_vm1, %v1179_v17  ;;  %v1180_v18 = vld [vmem:[%s6849_s23 + $0x10] sm:$0xff] }
 0x140   : > { %1213 = vst.msk [vmem:[#allocation2 + $0x31] sm:$0xff] %vm362_vm1, %v1180_v18 }
 0x142   : > { %992 = vmatmul.mubr.f32.gmra.mrb[20].mxu0 %v838_v21 }
 0x143   : > { %996 = vmatprep.mubr.f32.mxu0 %v841_v22 }
 0x146   : > { %997 = vmatmul.mubr.f32.gmra.mrb[22].mxu0 %v840_v25 }
 0x147   : > { %1001 = vmatprep.mubr.f32.mxu0 %v843_v26 }
 0x14a   : > { %1002 = vmatmul.mubr.f32.gmra.mrb[24].mxu0 %v842_v29 }
 0x14b   : > { %1006 = vmatprep.mubr.f32.mxu0 %v845_v30 }
 0x14e   : > { %1007 = vmatmul.mubr.f32.gmra.mrb[26].mxu0 %v844_v32 }
 0x14f   : > { %1011 = vmatprep.mubr.f32.mxu0 %v847_v33 }
 0x152   : > { %1012 = vmatmul.mubr.f32.gmra.mrb[28].mxu0 %v846_v35  ;;  %v1184_v35 = vld [vmem:[%s6849_s23 + $0x30] sm:$0xff] }
 0x153   : > { %1016 = vmatprep.mubr.f32.mxu0 %v849_v36  ;;  %1217 = vst.msk [vmem:[#allocation2 + $0x61] sm:$0xff] %vm362_vm1, %v1184_v35  ;;  %v1185_v36 = vld [vmem:[%s6849_s23 + $0x38] sm:$0xff] }
 0x154   : > { %1218 = vst.msk [vmem:[#allocation2 + $0x69] sm:$0xff] %vm362_vm1, %v1185_v36 }
 0x156   : > { %1017 = vmatmul.mubr.f32.gmra.mrb[30].mxu0 %v848_v37 }
 0x157   : > { %1021 = vmatprep.mubr.f32.mxu0 %v851_v38 }
 0x15a   : > { %1022 = vmatmul.mubr.f32.gmra.mrb[32].mxu0 %v850_v39 }
 0x15b   : > { %1026 = vmatprep.mubr.f32.mxu0 %v853_v40 }
 0x15e   : > { %1027 = vmatmul.mubr.f32.gmra.mrb[34].mxu0 %v852_v41 }
 0x15f   : > { %1031 = vmatprep.mubr.f32.mxu0 %v855_v42 }
 0x162   : > { %1032 = vmatmul.mubr.f32.gmra.mrb[36].mxu0 %v854_v43  ;;  %v1186_v43 = vld [vmem:[%s6849_s23 + $0x40] sm:$0xff] }
 0x163   : > { %1036 = vmatprep.mubr.f32.mxu0 %v857_v44  ;;  %1219 = vst.msk [vmem:[#allocation2 + $0x79] sm:$0xff] %vm362_vm1, %v1186_v43  ;;  %v1187_v44 = vld [vmem:[%s6849_s23 + $0x48] sm:$0xff] }
 0x164   : > { %1220 = vst.msk [vmem:[#allocation2 + $0x81] sm:$0xff] %vm362_vm1, %v1187_v44 }
 0x166   : > { %1037 = vmatmul.mubr.f32.gmra.mrb[38].mxu0 %v856_v45 }
 0x167   : > { %1041 = vmatprep.mubr.f32.mxu0 %v859_v46 }
 0x16a   : > { %1042 = vmatmul.mubr.f32.gmra.mrb[40].mxu0 %v858_v47 }
 0x16b   : > { %1046 = vmatprep.mubr.f32.mxu0 %v861_v48 }
 0x16e   : > { %1047 = vmatmul.mubr.f32.gmra.mrb[42].mxu0 %v860_v49 }
 0x16f   : > { %1051 = vmatprep.mubr.f32.mxu0 %v863_v50 }
 0x172   : > { %1052 = vmatmul.mubr.f32.gmra.mrb[44].mxu0 %v862_v51  ;;  %v1188_v51 = vld [vmem:[%s6849_s23 + $0x50] sm:$0xff] }
 0x173   : > { %1056 = vmatprep.mubr.f32.mxu0 %v865_v52  ;;  %1221 = vst.msk [vmem:[#allocation2 + $0x91] sm:$0xff] %vm362_vm1, %v1188_v51  ;;  %v1189_v52 = vld [vmem:[%s6849_s23 + $0x58] sm:$0xff]  ;;  %v1202_v51 = vld [vmem:[%s6849_s23 + $0xc0] sm:$0xff] }
 0x174   : > { %1222 = vst.msk [vmem:[#allocation2 + $0x99] sm:$0xff] %vm362_vm1, %v1189_v52  ;;  %v1203_v52 = vld [vmem:[%s6849_s23 + $0xc8] sm:$0xff]  ;;  %1235 = vst.msk [vmem:[#allocation2 + $0x139] sm:$0xff] %vm362_vm1, %v1202_v51 }
 0x175   : > { %1236 = vst.msk [vmem:[#allocation2 + $0x141] sm:$0xff] %vm362_vm1, %v1203_v52 }
 0x176   : > { %1057 = vmatmul.mubr.f32.gmra.mrb[46].mxu0 %v864_v53 }
 0x177   : > { %1061 = vmatprep.mubr.f32.mxu0 %v867_v54 }
 0x17a   : > { %1062 = vmatmul.mubr.f32.gmra.mrb[48].mxu0 %v866_v55 }
 0x17b   : > { %1066 = vmatprep.mubr.f32.mxu0 %v869_v56 }
 0x17e   : > { %1067 = vmatmul.mubr.f32.gmra.mrb[50].mxu0 %v868_v57 }
 0x17f   : > { %1071 = vmatprep.mubr.f32.mxu0 %v871_v58 }
 0x182   : > { %1072 = vmatmul.mubr.f32.gmra.mrb[52].mxu0 %v870_v60  ;;  %v1191_v60 = vld [vmem:[%s6849_s23 + $0x68] sm:$0xff] }
 0x183   : > { %1076 = vmatprep.mubr.f32.mxu0 %v873_v61  ;;  %1224 = vst.msk [vmem:[#allocation2 + $0xb1] sm:$0xff] %vm362_vm1, %v1191_v60 }
 0x186   : > { %1077 = vmatmul.mubr.f32.gmra.mrb[54].mxu0 %v872_v63 }
 0x187   : > { %1081 = vmatprep.mubr.f32.mxu0 %v875_v0 }
 0x18a   : > { %1082 = vmatmul.mubr.f32.gmra.mrb[56].mxu0 %v874_v1 }
 0x18b   : > { %1086 = vmatprep.mubr.f32.mxu0 %v877_v2 }
 0x18e   : > { %1087 = vmatmul.mubr.f32.gmra.mrb[58].mxu0 %v876_v3  ;;  %v1192_v3 = vld [vmem:[%s6849_s23 + $0x70] sm:$0xff] }
 0x18f   : > { %1091 = vmatprep.mubr.f32.mxu0 %v879_v4  ;;  %v1193_v4 = vld [vmem:[%s6849_s23 + $0x78] sm:$0xff]  ;;  %1225 = vst.msk [vmem:[#allocation2 + $0xc1] sm:$0xff] %vm362_vm1, %v1192_v3 }
 0x190   : > { %1226 = vst.msk [vmem:[#allocation2 + $0xc9] sm:$0xff] %vm362_vm1, %v1193_v4 }
 0x192   : > { %1092 = vmatmul.mubr.f32.gmra.mrb[60].mxu0 %v878_v5 }
 0x193   : > { %1096 = vmatprep.mubr.f32.mxu0 %v881_v6 }
 0x196   : > { %1097 = vmatmul.mubr.f32.gmra.mrb[62].mxu0 %v880_v7 }
 0x197   : > { %1101 = vmatprep.mubr.f32.mxu0 %v883_v8 }
 0x19a   : > { %1102 = vmatmul.mubr.f32.gmra.mrb[64].mxu0 %v882_v9 }
 0x19b   : > { %1106 = vmatprep.mubr.f32.mxu0 %v885_v10 }
 0x19e   : > { %1107 = vmatmul.mubr.f32.gmra.mrb[66].mxu0 %v884_v11  ;;  %v1194_v11 = vld [vmem:[%s6849_s23 + $0x80] sm:$0xff] }
 0x19f   : > { %1111 = vmatprep.mubr.f32.mxu0 %v887_v12  ;;  %v1195_v12 = vld [vmem:[%s6849_s23 + $0x88] sm:$0xff]  ;;  %1227 = vst.msk [vmem:[#allocation2 + $0xd9] sm:$0xff] %vm362_vm1, %v1194_v11 }
 0x1a0   : > { %1228 = vst.msk [vmem:[#allocation2 + $0xe1] sm:$0xff] %vm362_vm1, %v1195_v12 }
 0x1a2   : > { %1112 = vmatmul.mubr.f32.gmra.mrb[68].mxu0 %v886_v13 }
 0x1a3   : > { %1116 = vmatprep.mubr.f32.mxu0 %v889_v14 }
 0x1a6   : > { %1117 = vmatmul.mubr.f32.gmra.mrb[70].mxu0 %v888_v15 }
 0x1fd   : > { %v963_v21 = vpop.f32.mrb[8].mxu0 }
 0x1fe   : > { %v964_v22 = vadd.f32 %v6860_v19, %v963_v21  ;;  %v965_v23 = vpop.f32.mrb[9].mxu0  ;;  %v1197_v21 = vld [vmem:[%s6849_s23 + $0x98] sm:$0xff] }
 0x1ff   : > { %v6926_v23 = vpop.permute.xlu0 %1734  ;;  %1230 = vst.msk [vmem:[#allocation2 + $0xf9] sm:$0xff] %vm362_vm1, %v1197_v21 }
 0x200   : > { %1275 = vrot.lane.b32.xlu0 %v964_v22, %s6276_s24 }
 0x201   : > { %v968_v24 = vpop.f32.mrb[10].mxu0 }
 0x202   : > { %v969_v25 = vadd.f32 %v6860_v19, %v968_v24  ;;  %v970_v26 = vpop.f32.mrb[11].mxu0 }
 0x204   : > { %1277 = vrot.lane.b32.xlu0 %v969_v25, %s6276_s24 }
 0x205   : > { %v973_v29 = vpop.f32.mrb[12].mxu0 }
 0x206   : > { %v974_v30 = vadd.f32 %v6860_v19, %v973_v29  ;;  %v975_v31 = vpop.f32.mrb[13].mxu0  ;;  %v6933_v29 = vpop.permute.xlu0 %1862 }
 0x207   : > { %v1198_v31 = vld [vmem:[%s6849_s23 + $0xa0] sm:$0xff] }
 0x208   : > { %1279 = vrot.lane.b32.xlu1 %v974_v30, %s6276_s24  ;;  %v6936_v30 = vpop.permute.xlu1 %1736  ;;  %1231 = vst.msk [vmem:[#allocation2 + $0x109] sm:$0xff] %vm362_vm1, %v1198_v31 }
 0x209   : > { %v978_v32 = vpop.f32.mrb[14].mxu0 }
 0x20a   : > { %v979_v33 = vadd.f32 %v6860_v19, %v978_v32  ;;  %v980_v34 = vpop.f32.mrb[15].mxu0  ;;  %v1199_v32 = vld [vmem:[%s6849_s23 + $0xa8] sm:$0xff] }
 0x20b   : > { %1232 = vst.msk [vmem:[#allocation2 + $0x111] sm:$0xff] %vm362_vm1, %v1199_v32 }
 0x20c   : > { %1281 = vrot.lane.b32.xlu1 %v979_v33, %s6276_s24 }
 0x20d   : > { %v983_v37 = vpop.f32.mrb[16].mxu0 }
 0x20e   : > { %v984_v38 = vadd.f32 %v6860_v19, %v983_v37  ;;  %v985_v39 = vpop.f32.mrb[17].mxu0  ;;  %v6944_v37 = vpop.permute.xlu0 %2434 }
 0x210   : > { %1283 = vrot.lane.b32.xlu0 %v984_v38, %s6276_s24 }
 0x211   : > { %v988_v40 = vpop.f32.mrb[18].mxu0 }
 0x212   : > { %v989_v41 = vadd.f32 %v6860_v19, %v988_v40  ;;  %v990_v42 = vpop.f32.mrb[19].mxu0  ;;  %v6947_v40 = vpop.permute.xlu1 %1864 }
 0x213   : > { %v1201_v42 = vld [vmem:[%s6849_s23 + $0xb8] sm:$0xff] }
 0x214   : > { %1285 = vrot.lane.b32.xlu1 %v989_v41, %s6276_s24  ;;  %v1200_v41 = vld [vmem:[%s6849_s23 + $0xb0] sm:$0xff]  ;;  %1234 = vst.msk [vmem:[#allocation2 + $0x129] sm:$0xff] %vm362_vm1, %v1201_v42 }
 0x215   : > { %v993_v45 = vpop.f32.mrb[20].mxu0  ;;  %1233 = vst.msk [vmem:[#allocation2 + $0x121] sm:$0xff] %vm362_vm1, %v1200_v41 }
 0x216   : > { %v994_v46 = vadd.f32 %v6860_v19, %v993_v45  ;;  %v995_v47 = vpop.f32.mrb[21].mxu0 }
 0x217   : > { %v6958_v47 = vpop.permute.xlu1 %2436 }
 0x218   : > { %1287 = vrot.lane.b32.xlu0 %v994_v46, %s6276_s24  ;;  %v6955_v46 = vpop.permute.xlu0 %2562 }
 0x219   : > { %v998_v48 = vpop.f32.mrb[22].mxu0 }
 0x21a   : > { %v999_v49 = vadd.f32 %v6860_v19, %v998_v48  ;;  %v1000_v50 = vpop.f32.mrb[23].mxu0 }
 0x21c   : > { %1289 = vrot.lane.b32.xlu1 %v999_v49, %s6276_s24 }
 0x21d   : > { %v1003_v53 = vpop.f32.mrb[24].mxu0 }
 0x21e   : > { %v1004_v54 = vadd.f32 %v6860_v19, %v1003_v53  ;;  %v1005_v55 = vpop.f32.mrb[25].mxu0 }
 0x220   : > { %1291 = vrot.lane.b32.xlu0 %v1004_v54, %s6276_s24  ;;  %v6964_v54 = vpop.permute.xlu0 %2690 }
 0x221   : > { %v1008_v56 = vpop.f32.mrb[26].mxu0 }
 0x222   : > { %v1009_v57 = vadd.f32 %v6860_v19, %v1008_v56  ;;  %v1010_v58 = vpop.f32.mrb[27].mxu0 }
 0x224   : > { %1293 = vrot.lane.b32.xlu1 %v1009_v57, %s6276_s24  ;;  %v6969_v57 = vpop.permute.xlu1 %2564 }
 0x225   : > { %v1013_v61 = vpop.f32.mrb[28].mxu0 }
 0x226   : > { %v1014_v62 = vadd.f32 %v6860_v19, %v1013_v61  ;;  %v1015_v63 = vpop.f32.mrb[29].mxu0  ;;  %v6973_v61 = vpop.permute.xlu0 %4003 }
 0x227   : > { %v1204_v63 = vld [vmem:[%s6849_s23 + $0xd0] sm:$0xff] }
 0x228   : > { %1295 = vrot.lane.b32.xlu0 %v1014_v62, %s6276_s24  ;;  %v6976_v62 = vpop.permute.xlu1 %2692  ;;  %1237 = vst.msk [vmem:[#allocation2 + $0x151] sm:$0xff] %vm362_vm1, %v1204_v63  ;;  %v1405_v63 = vld [vmem:[%s9592_s5 + $0x8] sm:$0xff] }
 0x229   : > { %v1018_v0 = vpop.f32.mrb[30].mxu0 }
 0x22a   : > { %v1019_v1 = vadd.f32 %v6860_v19, %v1018_v0  ;;  %v1020_v2 = vpop.f32.mrb[31].mxu0  ;;  %v1205_v0 = vld [vmem:[%s6849_s23 + $0xd8] sm:$0xff] }
 0x22b   : > { %1238 = vst.msk [vmem:[#allocation2 + $0x159] sm:$0xff] %vm362_vm1, %v1205_v0 }
 0x22c   : > { %1297 = vrot.lane.b32.xlu1 %v1019_v1, %s6276_s24 }
 0x22d   : > { %v1023_v5 = vpop.f32.mrb[32].mxu0 }
 0x22e   : > { %v1024_v6 = vadd.f32 %v6860_v19, %v1023_v5  ;;  %v1025_v7 = vpop.f32.mrb[33].mxu0  ;;  %v6984_v5 = vpop.permute.xlu0 %4131 }
 0x230   : > { %1299 = vrot.lane.b32.xlu0 %v1024_v6, %s6276_s24 }
 0x231   : > { %v1028_v8 = vpop.f32.mrb[34].mxu0 }
 0x232   : > { %v1029_v9 = vadd.f32 %v6860_v19, %v1028_v8  ;;  %v1030_v10 = vpop.f32.mrb[35].mxu0  ;;  %v6987_v8 = vpop.permute.xlu1 %4005 }
 0x233   : > { %v1207_v10 = vld [vmem:[%s6849_s23 + $0xe8] sm:$0xff] }
 0x234   : > { %1301 = vrot.lane.b32.xlu1 %v1029_v9, %s6276_s24  ;;  %v1206_v9 = vld [vmem:[%s6849_s23 + $0xe0] sm:$0xff]  ;;  %1240 = vst.msk [vmem:[#allocation2 + $0x171] sm:$0xff] %vm362_vm1, %v1207_v10 }
 0x235   : > { %v1033_v13 = vpop.f32.mrb[36].mxu0  ;;  %1239 = vst.msk [vmem:[#allocation2 + $0x169] sm:$0xff] %vm362_vm1, %v1206_v9  ;;  %v1408_v10 = vld [vmem:[%s9592_s5 + $0x20] sm:$0xff] }
 0x236   : > { %v1034_v14 = vadd.f32 %v6860_v19, %v1033_v13  ;;  %v1035_v15 = vpop.f32.mrb[37].mxu0 }
 0x237   : > { %v6998_v15 = vpop.permute.xlu1 %4133 }
 0x238   : > { %1303 = vrot.lane.b32.xlu0 %v1034_v14, %s6276_s24  ;;  %v6995_v14 = vpop.permute.xlu0 %4703 }
 0x239   : > { %v1038_v16 = vpop.f32.mrb[38].mxu0  ;;  %9597 = vst [vmem:[#allocation4_spill] sm:$0xff] %v6995_v14 }
 0x23a   : > { %v1039_v17 = vadd.f32 %v6860_v19, %v1038_v16  ;;  %v1040_v18 = vpop.f32.mrb[39].mxu0  ;;  %v1208_v16 = vld [vmem:[%s6849_s23 + $0xf0] sm:$0xff] }
 0x23b   : > { %1241 = vst.msk [vmem:[#allocation2 + $0x181] sm:$0xff] %vm362_vm1, %v1208_v16 }
 0x23c   : > { %1305 = vrot.lane.b32.xlu1 %v1039_v17, %s6276_s24  ;;  %v7004_v21 = vpop.permute.xlu0 %4831 }
 0x23d   : > { %v1043_v22 = vpop.f32.mrb[40].mxu0  ;;  %9598 = vst [vmem:[#allocation5_spill] sm:$0xff] %v7004_v21 }
 0x23e   : > { %v1044_v24 = vadd.f32 %v6860_v19, %v1043_v22  ;;  %v1045_v25 = vpop.f32.mrb[41].mxu0 }
 0x240   : > { %1307 = vrot.lane.b32.xlu0 %v1044_v24, %s6276_s24 }
 0x241   : > { %v1048_v26 = vpop.f32.mrb[42].mxu0 }
 0x242   : > { %v1049_v27 = vadd.f32 %v6860_v19, %v1048_v26  ;;  %v1050_v28 = vpop.f32.mrb[43].mxu0  ;;  %v7007_v26 = vpop.permute.xlu1 %4705 }
 0x243   : > { %9599 = vst [vmem:[#allocation6_spill] sm:$0xff] %v7007_v26 }
 0x244   : > { %1309 = vrot.lane.b32.xlu1 %v1049_v27, %s6276_s24 }
 0x245   : > { %v1053_v33 = vpop.f32.mrb[44].mxu0 }
 0x246   : > { %v1054_v34 = vadd.f32 %v6860_v19, %v1053_v33  ;;  %v1055_v35 = vpop.f32.mrb[45].mxu0  ;;  %v7013_v33 = vpop.permute.xlu1 %4833 }
 0x247   : > { %9600 = vst [vmem:[#allocation7_spill] sm:$0xff] %v7013_v33 }
 0x248   : > { %1311 = vrot.lane.b32.xlu0 %v1054_v34, %s6276_s24  ;;  %v1209_v34 = vld [vmem:[%s6849_s23 + $0xf8] sm:$0xff] }
 0x249   : > { %v1058_v36 = vpop.f32.mrb[46].mxu0  ;;  %1242 = vst.msk [vmem:[#allocation2 + $0x189] sm:$0xff] %vm362_vm1, %v1209_v34 }
 0x24a   : > { %v1059_v38 = vadd.f32 %v6860_v19, %v1058_v36  ;;  %v1060_v39 = vpop.f32.mrb[47].mxu0 }
 0x24c   : > { %1313 = vrot.lane.b32.xlu1 %v1059_v38, %s6276_s24 }
 0x24d   : > { %v1063_v43 = vpop.f32.mrb[48].mxu0 }
 0x24e   : > { %v1064_v44 = vadd.f32 %v6860_v19, %v1063_v43  ;;  %v1065_v45 = vpop.f32.mrb[49].mxu0 }
 0x250   : > { %1315 = vrot.lane.b32.xlu0 %v1064_v44, %s6276_s24 }
 0x251   : > { %v1068_v48 = vpop.f32.mrb[50].mxu0 }
 0x252   : > { %v1069_v49 = vadd.f32 %v6860_v19, %v1068_v48  ;;  %v1070_v50 = vpop.f32.mrb[51].mxu0 }
 0x254   : > { %1317 = vrot.lane.b32.xlu1 %v1069_v49, %s6276_s24 }
 0x255   : > { %v1073_v53 = vpop.f32.mrb[52].mxu0 }
 0x256   : > { %v1074_v55 = vadd.f32 %v6860_v19, %v1073_v53  ;;  %v1075_v56 = vpop.f32.mrb[53].mxu0 }
 0x258   : > { %1319 = vrot.lane.b32.xlu0 %v1074_v55, %s6276_s24 }
 0x259   : > { %v1078_v58 = vpop.f32.mrb[54].mxu0 }
 0x25a   : > { %v1079_v59 = vadd.f32 %v6860_v19, %v1078_v58  ;;  %v1080_v60 = vpop.f32.mrb[55].mxu0 }
 0x25b   : > { %v1404_v60 = vld [vmem:[%s9592_s5] sm:$0xff] }
 0x25c   : > { %1321 = vrot.lane.b32.xlu1 %v1079_v59, %s6276_s24  ;;  %v6209_v0 = vpack.c.bf16 %v1405_v63, %v1404_v60 }
 0x25d   : > { %v1083_v1 = vpop.f32.mrb[56].mxu0 }
 0x25e   : > { %v1084_v2 = vadd.f32 %v6860_v19, %v1083_v1  ;;  %v1085_v3 = vpop.f32.mrb[57].mxu0  ;;  %6210 = vmatprep.subr.bf16.mxu1 %v6209_v0 }
 0x25f   : > { %6212 = vmatpush3.bf16.msra.mxu1 %v6209_v0  ;;  %v1406_v3 = vld [vmem:[%s9592_s5 + $0x10] sm:$0xff] }
 0x260   : > { %1323 = vrot.lane.b32.xlu0 %v1084_v2, %s6276_s24 }
 0x261   : > { %v1088_v4 = vpop.f32.mrb[58].mxu0 }
 0x262   : > { %v1089_v6 = vadd.f32 %v6860_v19, %v1088_v4  ;;  %v1090_v7 = vpop.f32.mrb[59].mxu0  ;;  %v1407_v4 = vld [vmem:[%s9592_s5 + $0x18] sm:$0xff] }
 0x264   : > { %1325 = vrot.lane.b32.xlu1 %v1089_v6, %s6276_s24  ;;  %v6213_v6 = vpack.c.bf16 %v1407_v4, %v1406_v3 }
 0x265   : > { %v1093_v11 = vpop.f32.mrb[60].mxu0 }
 0x266   : > { %v1094_v12 = vadd.f32 %v6860_v19, %v1093_v11  ;;  %v1095_v13 = vpop.f32.mrb[61].mxu0  ;;  %6214 = vmatprep.subr.bf16.mxu1 %v6213_v6  ;;  %v1409_v11 = vld [vmem:[%s9592_s5 + $0x28] sm:$0xff] }
 0x267   : > { %6216 = vmatpush3.bf16.msra.mxu1 %v6213_v6 }
 0x268   : > { %1327 = vrot.lane.b32.xlu0 %v1094_v12, %s6276_s24  ;;  %v6217_v12 = vpack.c.bf16 %v1409_v11, %v1408_v10 }
 0x269   : > { %v1098_v17 = vpop.f32.mrb[62].mxu0 }
 0x26a   : > { %v1099_v18 = vadd.f32 %v6860_v19, %v1098_v17  ;;  %v1100_v20 = vpop.f32.mrb[63].mxu0  ;;  %6218 = vmatprep.subr.bf16.mxu1 %v6217_v12  ;;  %v1410_v17 = vld [vmem:[%s9592_s5 + $0x30] sm:$0xff] }
 0x26b   : > { %6220 = vmatpush3.bf16.msra.mxu1 %v6217_v12 }
 0x26c   : > { %1329 = vrot.lane.b32.xlu1 %v1099_v18, %s6276_s24  ;;  %v1411_v18 = vld [vmem:[%s9592_s5 + $0x38] sm:$0xff] }
 0x26d   : > { %v1103_v22 = vpop.f32.mrb[64].mxu0  ;;  %v6221_v20 = vpack.c.bf16 %v1411_v18, %v1410_v17 }
 0x26e   : > { %v1104_v24 = vadd.f32 %v6860_v19, %v1103_v22  ;;  %v1105_v25 = vpop.f32.mrb[65].mxu0 }
 0x26f   : > { %6222 = vmatprep.subr.bf16.mxu1 %v6221_v20 }
 0x270   : > { %1331 = vrot.lane.b32.xlu0 %v1104_v24, %s6276_s24  ;;  %6224 = vmatpush3.bf16.msra.mxu1 %v6221_v20 }
 0x271   : > { %v1108_v27 = vpop.f32.mrb[66].mxu0 }
 0x272   : > { %v1109_v28 = vadd.f32 %v6860_v19, %v1108_v27  ;;  %v1276_v31 = vpop.permute.xlu0 %1275  ;;  %v1110_v32 = vpop.f32.mrb[67].mxu0  ;;  %v1412_v27 = vld [vmem:[%s9592_s5 + $0x40] sm:$0xff] }
 0x273   : > { %1372 = vst.msk [vmem:[#allocation2 + $0x19] sm:$0xff] %vm1371_vm5, %v1276_v31  ;;  %6053 = vmatprep.subr.mxu1 %v1412_v27 }
 0x274   : > { %1333 = vrot.lane.b32.xlu1 %v1109_v28, %s6276_s24  ;;  %6054 = vmatpush3.msra.mxu1 %v1412_v27 }
 0x275   : > { %v1113_v35 = vpop.f32.mrb[68].mxu0 }
 0x276   : > { %v1114_v36 = vadd.f32 %v6860_v19, %v1113_v35  ;;  %v1278_v38 = vpop.permute.xlu0 %1277  ;;  %v1115_v39 = vpop.f32.mrb[69].mxu0 }
 0x277   : > { %1373 = vst.msk [vmem:[#allocation2 + $0x21] sm:$0xff] %vm1371_vm5, %v1278_v38 }
 0x278   : > { %1335 = vrot.lane.b32.xlu0 %v1114_v36, %s6276_s24 }
 0x279   : > { %v1118_v41 = vpop.f32.mrb[70].mxu0 }
 0x27a   : > { %v1280_v42 = vpop.permute.xlu1 %1279  ;;  %v7020_v43 = vld [vmem:[#allocation2 + $0x18] sm:$0xff]  ;;  %v1120_v45 = vpop.f32.mrb[71].mxu0  ;;  %v1119_v50 = vadd.f32 %v6860_v19, %v1118_v41 }
 0x27b   : > { %v1447_v44 = vld [vmem:[#allocation2 + $0x19] sm:$0xff]  ;;  %1374 = vst.msk [vmem:[#allocation2 + $0x31] sm:$0xff] %vm1371_vm5, %v1280_v42  ;;  %1990 = vrot.lane.b32.xlu1 %v7020_v43, %s6277_s17 }
 0x27c   : > { %1738 = vrot.lane.b32.xlu0 %v1447_v44, %s6271_s16 }
 0x27e   : > { %v1282_v48 = vpop.permute.xlu1 %1281  ;;  %v1479_v49 = vld [vmem:[#allocation2 + $0x1a] sm:$0xff]  ;;  %v1480_v19 = vld [vmem:[#allocation2 + $0x22] sm:$0xff] }
 0x27f   : > { %1375 = vst.msk [vmem:[#allocation2 + $0x39] sm:$0xff] %vm1371_vm5, %v1282_v48  ;;  %2118 = vrot.lane.b32.xlu1 %v1447_v44, %s6279_s29  ;;  %v7031_v52 = vld [vmem:[#allocation2 + $0x20] sm:$0xff] }
 0x280   : > { %1866 = vrot.lane.b32.xlu0 %v1479_v49, %s6272_s21  ;;  %v1448_v55 = vld [vmem:[#allocation2 + $0x21] sm:$0xff] }
 0x282   : > { %v1284_v51 = vpop.permute.xlu0 %1283  ;;  %v1449_v59 = vld [vmem:[#allocation2 + $0x31] sm:$0xff] }
 0x283   : > { %1337 = vrot.lane.b32.xlu1 %v1119_v50, %s6276_s24  ;;  %1376 = vst.msk [vmem:[#allocation2 + $0x49] sm:$0xff] %vm1371_vm5, %v1284_v51  ;;  %v7051_v1 = vld [vmem:[#allocation2 + $0x30] sm:$0xff] }
 0x284   : > { %1992 = vrot.lane.b32.xlu0 %v7031_v52, %s6277_s17 }
 0x286   : > { %v1286_v53 = vpop.permute.xlu1 %1285  ;;  %v1450_v9 = vld [vmem:[#allocation2 + $0x39] sm:$0xff] }
 0x287   : > { %1377 = vst.msk [vmem:[#allocation2 + $0x51] sm:$0xff] %vm1371_vm5, %v1286_v53  ;;  %1740 = vrot.lane.b32.xlu1 %v1448_v55, %s6271_s16  ;;  %v1482_v13 = vld [vmem:[#allocation2 + $0x3a] sm:$0xff]  ;;  %v1481_v25 = vld [vmem:[#allocation2 + $0x32] sm:$0xff] }
 0x288   : > { %2120 = vrot.lane.b32.xlu0 %v1448_v55, %s6279_s29  ;;  %v7082_v24 = vld [vmem:[#allocation2 + $0x38] sm:$0xff] }
 0x28a   : > { %v1288_v56 = vpop.permute.xlu0 %1287  ;;  %v1451_v35 = vld [vmem:[#allocation2 + $0x49] sm:$0xff] }
 0x28b   : > { %1868 = vrot.lane.b32.xlu1 %v1480_v19, %s6272_s21  ;;  %1378 = vst.msk [vmem:[#allocation2 + $0x61] sm:$0xff] %vm1371_vm5, %v1288_v56  ;;  %v7104_v36 = vld [vmem:[#allocation2 + $0x48] sm:$0xff] }
 0x28c   : > { %2248 = vrot.lane.b32.xlu0 %v1480_v19, %s6280_s11 }
 0x28e   : > { %v1290_v58 = vpop.permute.xlu1 %1289  ;;  %v1452_v41 = vld [vmem:[#allocation2 + $0x51] sm:$0xff] }
 0x28f   : > { %1379 = vst.msk [vmem:[#allocation2 + $0x69] sm:$0xff] %vm1371_vm5, %v1290_v58  ;;  %2246 = vrot.lane.b32.xlu1 %v1479_v49, %s6280_s11  ;;  %v1484_v42 = vld [vmem:[#allocation2 + $0x52] sm:$0xff]  ;;  %v1483_v49 = vld [vmem:[#allocation2 + $0x4a] sm:$0xff] }
 0x290   : > { %1742 = vrot.lane.b32.xlu0 %v1449_v59, %s6271_s16  ;;  %v7117_v48 = vld [vmem:[#allocation2 + $0x50] sm:$0xff] }
 0x292   : > { %v1292_v2 = vpop.permute.xlu0 %1291  ;;  %v1453_v19 = vld [vmem:[#allocation2 + $0x61] sm:$0xff] }
 0x293   : > { %2374 = vrot.lane.b32.xlu1 %v7051_v1, %s6273_s26  ;;  %1380 = vst.msk [vmem:[#allocation2 + $0x79] sm:$0xff] %vm1371_vm5, %v1292_v2  ;;  %v7136_v56 = vld [vmem:[#allocation2 + $0x60] sm:$0xff] }
 0x294   : > { %1994 = vrot.lane.b32.xlu0 %v7051_v1, %s6277_s17 }
 0x296   : > { %v1294_v7 = vpop.permute.xlu1 %1293  ;;  %v1454_v60 = vld [vmem:[#allocation2 + $0x69] sm:$0xff] }
 0x297   : > { %1381 = vst.msk [vmem:[#allocation2 + $0x81] sm:$0xff] %vm1371_vm5, %v1294_v7  ;;  %1744 = vrot.lane.b32.xlu1 %v1450_v9, %s6271_s16  ;;  %v1486_v63 = vld [vmem:[#allocation2 + $0x6a] sm:$0xff]  ;;  %v1485_v4 = vld [vmem:[#allocation2 + $0x62] sm:$0xff] }
 0x298   : > { %2502 = vrot.lane.b32.xlu0 %v1449_v59, %s6274_s12  ;;  %v7149_v3 = vld [vmem:[#allocation2 + $0x68] sm:$0xff] }
 0x29a   : > { %v1296_v16 = vpop.permute.xlu0 %1295  ;;  %v1455_v12 = vld [vmem:[#allocation2 + $0x79] sm:$0xff] }
 0x29b   : > { %1872 = vrot.lane.b32.xlu1 %v1482_v13, %s6272_s21  ;;  %1382 = vst.msk [vmem:[#allocation2 + $0x91] sm:$0xff] %vm1371_vm5, %v1296_v16  ;;  %v7171_v17 = vld [vmem:[#allocation2 + $0x78] sm:$0xff] }
 0x29c   : > { %2122 = vrot.lane.b32.xlu0 %v1449_v59, %s6279_s29 }
 0x29e   : > { %v1298_v22 = vpop.permute.xlu1 %1297 }
 0x29f   : > { %1383 = vst.msk [vmem:[#allocation2 + $0x99] sm:$0xff] %vm1371_vm5, %v1298_v22  ;;  %2376 = vrot.lane.b32.xlu1 %v7082_v24, %s6273_s26  ;;  %v1456_v22 = vld [vmem:[#allocation2 + $0x81] sm:$0xff] }
 0x2a0   : > { %1870 = vrot.lane.b32.xlu0 %v1481_v25, %s6272_s21 }
 0x2a2   : > { %v1300_v28 = vpop.permute.xlu0 %1299 }
 0x2a3   : > { %1996 = vrot.lane.b32.xlu1 %v7082_v24, %s6277_s17  ;;  %1384 = vst.msk [vmem:[#allocation2 + $0xa9] sm:$0xff] %vm1371_vm5, %v1300_v28  ;;  %v1488_v28 = vld [vmem:[#allocation2 + $0x82] sm:$0xff] }
 0x2a4   : > { %2630 = vrot.lane.b32.xlu0 %v1481_v25, %s6275_s18 }
 0x2a6   : > { %v1302_v31 = vpop.permute.xlu1 %1301 }
 0x2a7   : > { %1385 = vst.msk [vmem:[#allocation2 + $0xb1] sm:$0xff] %vm1371_vm5, %v1302_v31  ;;  %2504 = vrot.lane.b32.xlu1 %v1450_v9, %s6274_s12 }
 0x2a8   : > { %2250 = vrot.lane.b32.xlu0 %v1481_v25, %s6280_s11 }
 0x2aa   : > { %v1304_v32 = vpop.permute.xlu0 %1303 }
 0x2ab   : > { %2124 = vrot.lane.b32.xlu1 %v1450_v9, %s6279_s29  ;;  %1386 = vst.msk [vmem:[#allocation2 + $0xc1] sm:$0xff] %vm1371_vm5, %v1304_v32 }
 0x2ac   : > { %2252 = vrot.lane.b32.xlu0 %v1482_v13, %s6280_s11 }
 0x2ae   : > { %v1306_v34 = vpop.permute.xlu1 %1305 }
 0x2af   : > { %1387 = vst.msk [vmem:[#allocation2 + $0xc9] sm:$0xff] %vm1371_vm5, %v1306_v34  ;;  %2632 = vrot.lane.b32.xlu1 %v1482_v13, %s6275_s18  ;;  %v7192_v34 = vld [vmem:[#allocation2 + $0x80] sm:$0xff] }
 0x2b0   : > { %1746 = vrot.lane.b32.xlu0 %v1451_v35, %s6271_s16 }
 0x2b2   : > { %v1308_v38 = vpop.permute.xlu0 %1307 }
 0x2b3   : > { %2378 = vrot.lane.b32.xlu1 %v7104_v36, %s6273_s26  ;;  %1388 = vst.msk [vmem:[#allocation2 + $0xd9] sm:$0xff] %vm1371_vm5, %v1308_v38 }
 0x2b4   : > { %1998 = vrot.lane.b32.xlu0 %v7104_v36, %s6277_s17 }
 0x2b6   : > { %v1310_v39 = vpop.permute.xlu1 %1309 }
 0x2b7   : > { %1389 = vst.msk [vmem:[#allocation2 + $0xe1] sm:$0xff] %vm1371_vm5, %v1310_v39  ;;  %1748 = vrot.lane.b32.xlu1 %v1452_v41, %s6271_s16 }
 0x2b8   : > { %2506 = vrot.lane.b32.xlu0 %v1451_v35, %s6274_s12 }
 0x2ba   : > { %v1312_v44 = vpop.permute.xlu0 %1311 }
 0x2bb   : > { %1876 = vrot.lane.b32.xlu1 %v1484_v42, %s6272_s21  ;;  %1390 = vst.msk [vmem:[#allocation2 + $0xf1] sm:$0xff] %vm1371_vm5, %v1312_v44 }
 0x2bc   : > { %2126 = vrot.lane.b32.xlu0 %v1451_v35, %s6279_s29  ;;  %v1487_v35 = vld [vmem:[#allocation2 + $0x7a] sm:$0xff] }
 0x2be   : > { %v1314_v45 = vpop.permute.xlu1 %1313 }
 0x2bf   : > { %1391 = vst.msk [vmem:[#allocation2 + $0xf9] sm:$0xff] %vm1371_vm5, %v1314_v45  ;;  %2380 = vrot.lane.b32.xlu1 %v7117_v48, %s6273_s26 }
 0x2c0   : > { %1874 = vrot.lane.b32.xlu0 %v1483_v49, %s6272_s21 }
 0x2c2   : > { %v1316_v50 = vpop.permute.xlu0 %1315 }
 0x2c3   : > { %2000 = vrot.lane.b32.xlu1 %v7117_v48, %s6277_s17  ;;  %1392 = vst.msk [vmem:[#allocation2 + $0x109] sm:$0xff] %vm1371_vm5, %v1316_v50 }
 0x2c4   : > { %2634 = vrot.lane.b32.xlu0 %v1483_v49, %s6275_s18 }
 0x2c6   : > { %v1318_v51 = vpop.permute.xlu1 %1317 }
 0x2c7   : > { %1393 = vst.msk [vmem:[#allocation2 + $0x111] sm:$0xff] %vm1371_vm5, %v1318_v51  ;;  %2508 = vrot.lane.b32.xlu1 %v1452_v41, %s6274_s12 }
 0x2c8   : > { %2254 = vrot.lane.b32.xlu0 %v1483_v49, %s6280_s11  ;;  %v1413_v49 = vld [vmem:[#allocation2] sm:$0xff] }
 0x2c9   : > { %v2726_v51 = vsel %vm1122_vm2, %v1413_v49, %v6926_v23  ;;  %v7223_v23 = vld [vmem:[#allocation2 + $0x90] sm:$0xff]  ;;  %v7249_v49 = vld [vmem:[#allocation2 + $0x98] sm:$0xff] }
 0x2ca   : > { %v1320_v53 = vpop.permute.xlu0 %1319 }
 0x2cb   : > { %2128 = vrot.lane.b32.xlu1 %v1452_v41, %s6279_s29  ;;  %1394 = vst.msk [vmem:[#allocation2 + $0x121] sm:$0xff] %vm1371_vm5, %v1320_v53 }
 0x2cc   : > { %2256 = vrot.lane.b32.xlu0 %v1484_v42, %s6280_s11 }
 0x2ce   : > { %v1322_v55 = vpop.permute.xlu1 %1321 }
 0x2cf   : > { %1395 = vst.msk [vmem:[#allocation2 + $0x129] sm:$0xff] %vm1371_vm5, %v1322_v55  ;;  %2636 = vrot.lane.b32.xlu1 %v1484_v42, %s6275_s18  ;;  %v1457_v55 = vld [vmem:[#allocation2 + $0x91] sm:$0xff] }
 0x2d0   : > { %1750 = vrot.lane.b32.xlu0 %v1453_v19, %s6271_s16 }
 0x2d2   : > { %v1324_v58 = vpop.permute.xlu0 %1323 }
 0x2d3   : > { %2382 = vrot.lane.b32.xlu1 %v7136_v56, %s6273_s26  ;;  %1396 = vst.msk [vmem:[#allocation2 + $0x139] sm:$0xff] %vm1371_vm5, %v1324_v58 }
 0x2d4   : > { %2002 = vrot.lane.b32.xlu0 %v7136_v56, %s6277_s17 }
 0x2d6   : > { %v1326_v59 = vpop.permute.xlu1 %1325 }
 0x2d7   : > { %1397 = vst.msk [vmem:[#allocation2 + $0x141] sm:$0xff] %vm1371_vm5, %v1326_v59  ;;  %1752 = vrot.lane.b32.xlu1 %v1454_v60, %s6271_s16 }
 0x2d8   : > { %2510 = vrot.lane.b32.xlu0 %v1453_v19, %s6274_s12 }
 0x2da   : > { %v1328_v0 = vpop.permute.xlu0 %1327 }
 0x2db   : > { %1880 = vrot.lane.b32.xlu1 %v1486_v63, %s6272_s21  ;;  %1398 = vst.msk [vmem:[#allocation2 + $0x151] sm:$0xff] %vm1371_vm5, %v1328_v0 }
 0x2dc   : > { %2130 = vrot.lane.b32.xlu0 %v1453_v19, %s6279_s29  ;;  %v2759_v19 = vsel %vm2758_vm6, %v2726_v51, %v6933_v29  ;;  %v1489_v51 = vld [vmem:[#allocation2 + $0x92] sm:$0xff] }
 0x2de   : > { %v1330_v2 = vpop.permute.xlu1 %1329 }
 0x2df   : > { %1399 = vst.msk [vmem:[#allocation2 + $0x159] sm:$0xff] %vm1371_vm5, %v1330_v2  ;;  %2384 = vrot.lane.b32.xlu1 %v7149_v3, %s6273_s26 }
 0x2e0   : > { %1878 = vrot.lane.b32.xlu0 %v1485_v4, %s6272_s21 }
 0x2e2   : > { %v1332_v6 = vpop.permute.xlu0 %1331 }
 0x2e3   : > { %2004 = vrot.lane.b32.xlu1 %v7149_v3, %s6277_s17  ;;  %1400 = vst.msk [vmem:[#allocation2 + $0x169] sm:$0xff] %vm1371_vm5, %v1332_v6 }
 0x2e4   : > { %2638 = vrot.lane.b32.xlu0 %v1485_v4, %s6275_s18 }
 0x2e6   : > { %v1334_v7 = vpop.permute.xlu1 %1333 }
 0x2e7   : > { %1401 = vst.msk [vmem:[#allocation2 + $0x171] sm:$0xff] %vm1371_vm5, %v1334_v7  ;;  %2512 = vrot.lane.b32.xlu1 %v1454_v60, %s6274_s12 }
 0x2e8   : > { %2258 = vrot.lane.b32.xlu0 %v1485_v4, %s6280_s11  ;;  %v1414_v4 = vld [vmem:[#allocation2 + $0x8] sm:$0xff] }
 0x2ea   : > { %v1336_v9 = vpop.permute.xlu0 %1335 }
 0x2eb   : > { %1402 = vst.msk [vmem:[#allocation2 + $0x181] sm:$0xff] %vm1371_vm5, %v1336_v9  ;;  %2132 = vrot.lane.b32.xlu1 %v1454_v60, %s6279_s29  ;;  %v1458_v9 = vld [vmem:[#allocation2 + $0x99] sm:$0xff] }
 0x2ec   : > { %2260 = vrot.lane.b32.xlu0 %v1486_v63, %s6280_s11 }
 0x2ed   : > { %v1991_v10 = vpop.permute.xlu1 %1990 }
 0x2ee   : > { %v7165_v11 = vpop.permute.xlu0 %1738  ;;  %v2792_v59 = vsel %vm2791_vm7, %v2759_v19, %v1991_v10 }
 0x2ef   : > { %2640 = vrot.lane.b32.xlu1 %v1486_v63, %s6275_s18 }
 0x2f0   : > { %1754 = vrot.lane.b32.xlu0 %v1455_v12, %s6271_s16 }
 0x2f1   : > { %v2119_v13 = vpop.permute.xlu1 %2118 }
 0x2f2   : > { %v7169_v16 = vpop.permute.xlu0 %1866  ;;  %v2825_v63 = vsel %vm2824_vm8, %v2792_v59, %v2119_v13 }
 0x2f3   : > { %2386 = vrot.lane.b32.xlu1 %v7171_v17, %s6273_s26 }
 0x2f4   : > { %2006 = vrot.lane.b32.xlu0 %v7171_v17, %s6277_s17 }
 0x2f5   : > { %v1338_v18 = vpop.permute.xlu1 %1337 }
 0x2f6   : > { %1403 = vst.msk [vmem:[#allocation2 + $0x189] sm:$0xff] %vm1371_vm5, %v1338_v18  ;;  %v7178_v20 = vpop.permute.xlu0 %1992 }
 0x2f7   : > { %1756 = vrot.lane.b32.xlu1 %v1456_v22, %s6271_s16 }
 0x2f8   : > { %2514 = vrot.lane.b32.xlu0 %v1455_v12, %s6274_s12 }
 0x2f9   : > { %v7182_v25 = vpop.permute.xlu1 %1740 }
 0x2fa   : > { %v7184_v27 = vpop.permute.xlu0 %2120 }
 0x2fb   : > { %1884 = vrot.lane.b32.xlu1 %v1488_v28, %s6272_s21 }
 0x2fc   : > { %2134 = vrot.lane.b32.xlu0 %v1455_v12, %s6279_s29  ;;  %v2727_v12 = vsel %vm1122_vm2, %v1414_v4, %v6936_v30  ;;  %v1459_v4 = vld [vmem:[#allocation2 + $0xa9] sm:$0xff] }
 0x2fd   : > { %v7188_v31 = vpop.permute.xlu1 %1868 }
 0x2fe   : > { %v7190_v32 = vpop.permute.xlu0 %2248 }
 0x2ff   : > { %2388 = vrot.lane.b32.xlu1 %v7192_v34, %s6273_s26 }
 0x300   : > { %1882 = vrot.lane.b32.xlu0 %v1487_v35, %s6272_s21 }
 0x301   : > { %v2247_v38 = vpop.permute.xlu1 %2246 }
 0x302   : > { %v7197_v39 = vpop.permute.xlu0 %1742  ;;  %v2858_v0 = vsel %vm2857_vm10, %v2825_v63, %v2247_v38 }
 0x303   : > { %2008 = vrot.lane.b32.xlu1 %v7192_v34, %s6277_s17 }
 0x304   : > { %2642 = vrot.lane.b32.xlu0 %v1487_v35, %s6275_s18 }
 0x305   : > { %v2375_v41 = vpop.permute.xlu1 %2374 }
 0x306   : > { %v7202_v42 = vpop.permute.xlu0 %1994  ;;  %v2891_v29 = vsel %vm2890_vm9, %v2858_v0, %v2375_v41 }
 0x307   : > { %2516 = vrot.lane.b32.xlu1 %v1456_v22, %s6274_s12 }
 0x308   : > { %2262 = vrot.lane.b32.xlu0 %v1487_v35, %s6280_s11 }
 0x309   : > { %v7206_v44 = vpop.permute.xlu1 %1744 }
 0x30a   : > { %v2503_v45 = vpop.permute.xlu0 %2502 }
 0x30b   : > { %2136 = vrot.lane.b32.xlu1 %v1456_v22, %s6279_s29  ;;  %v2924_v6 = vsel %vm2923_vm11, %v2891_v29, %v2503_v45  ;;  %v1490_v22 = vld [vmem:[#allocation2 + $0x9a] sm:$0xff] }
 0x30c   : > { %2264 = vrot.lane.b32.xlu0 %v1488_v28, %s6280_s11 }
 0x30d   : > { %v7210_v50 = vpop.permute.xlu1 %1872 }
 0x30e   : > { %v7214_v53 = vpop.permute.xlu0 %2122 }
 0x30f   : > { %2644 = vrot.lane.b32.xlu1 %v1488_v28, %s6275_s18  ;;  %v2760_v28 = vsel %vm2758_vm6, %v2727_v12, %v6947_v40 }
 0x310   : > { %1758 = vrot.lane.b32.xlu0 %v1457_v55, %s6271_s16  ;;  %v2793_v35 = vsel %vm2791_vm7, %v2760_v28, %v7178_v20 }
 0x311   : > { %v2377_v58 = vpop.permute.xlu1 %2376  ;;  %v2826_v41 = vsel %vm2824_vm8, %v2793_v35, %v7184_v27  ;;  %v1460_v35 = vld [vmem:[#allocation2 + $0xb1] sm:$0xff] }
 0x312   : > { %v7221_v60 = vpop.permute.xlu0 %1870  ;;  %v2859_v30 = vsel %vm2857_vm10, %v2826_v41, %v7190_v32 }
 0x313   : > { %2390 = vrot.lane.b32.xlu1 %v7223_v23, %s6273_s26  ;;  %v2892_v40 = vsel %vm2890_vm9, %v2859_v30, %v2377_v58 }
 0x314   : > { %2010 = vrot.lane.b32.xlu0 %v7223_v23, %s6277_s17 }
 0x315   : > { %v7232_v2 = vpop.permute.xlu1 %1996 }
 0x316   : > { %v2631_v7 = vpop.permute.xlu0 %2630 }
 0x317   : > { %v2957_v10 = vsel %vm2956_vm12, %v2924_v6, %v2631_v7  ;;  %1760 = vrot.lane.b32.xlu1 %v1458_v9, %s6271_s16  ;;  %v2728_v6 = vsel %vm1122_vm2, %v7020_v43, %v7165_v11 }
 0x318   : > { %2518 = vrot.lane.b32.xlu0 %v1457_v55, %s6274_s12  ;;  %6055 = vmatprep.mubr.msk.f32.mxu1 %vm2996_vm13, %v2957_v10  ;;  %v2761_v7 = vsel %vm2758_vm6, %v2728_v6, %v7169_v16 }
 0x319   : > { %v2505_v13 = vpop.permute.xlu1 %2504 }
 0x31a   : > { %v2251_v18 = vpop.permute.xlu0 %2250  ;;  %v2925_v20 = vsel %vm2923_vm11, %v2892_v40, %v2505_v13  ;;  %v7288_v13 = vld [vmem:[#allocation2 + $0xa8] sm:$0xff]  ;;  %v1492_v40 = vld [vmem:[#allocation2 + $0xb2] sm:$0xff] }
 0x31b   : > { %1888 = vrot.lane.b32.xlu1 %v1490_v22, %s6272_s21 }
 0x31c   : > { %2138 = vrot.lane.b32.xlu0 %v1457_v55, %s6279_s29 }
 0x31d   : > { %v2125_v38 = vpop.permute.xlu1 %2124 }
 0x31e   : > { %v2253_v45 = vpop.permute.xlu0 %2252 }
 0x31f   : > { %2392 = vrot.lane.b32.xlu1 %v7249_v49, %s6273_s26 }
 0x320   : > { %1886 = vrot.lane.b32.xlu0 %v1489_v51, %s6272_s21 }
 0x321   : > { %v2633_v55 = vpop.permute.xlu1 %2632 }
 0x322   : > { %v2958_v19 = vsel %vm2956_vm12, %v2925_v20, %v2633_v55  ;;  %v7259_v27 = vpop.permute.xlu0 %1746 }
 0x323   : > { %2012 = vrot.lane.b32.xlu1 %v7249_v49, %s6277_s17  ;;  %6056 = vmatmul.mubr.msk.f32.vlgmr.msra.gmra.mrb[24].mxu1 %vm2996_vm13, %v2958_v19 }
 0x324   : > { %2646 = vrot.lane.b32.xlu0 %v1489_v51, %s6275_s18 }
 0x325   : > { %v2379_v32 = vpop.permute.xlu1 %2378 }
 0x326   : > { %v7265_v59 = vpop.permute.xlu0 %1998 }
 0x327   : > { %2520 = vrot.lane.b32.xlu1 %v1458_v9, %s6274_s12 }
 0x328   : > { %2266 = vrot.lane.b32.xlu0 %v1489_v51, %s6280_s11 }
 0x329   : > { %v7269_v58 = vpop.permute.xlu1 %1748 }
 0x32a   : > { %v2507_v63 = vpop.permute.xlu0 %2506 }
 0x32b   : > { %2140 = vrot.lane.b32.xlu1 %v1458_v9, %s6279_s29  ;;  %v2794_v9 = vsel %vm2791_vm7, %v2761_v7, %v7202_v42 }
 0x32c   : > { %2268 = vrot.lane.b32.xlu0 %v1490_v22, %s6280_s11 }
 0x32d   : > { %v7273_v0 = vpop.permute.xlu1 %1876 }
 0x32e   : > { %v7275_v29 = vpop.permute.xlu0 %2126 }
 0x32f   : > { %2648 = vrot.lane.b32.xlu1 %v1490_v22, %s6275_s18  ;;  %v2827_v22 = vsel %vm2824_vm8, %v2794_v9, %v7214_v53  ;;  %v2729_v53 = vsel %vm1122_vm2, %v7031_v52, %v7182_v25  ;;  %v1491_v25 = vld [vmem:[#allocation2 + $0xaa] sm:$0xff] }
 0x330   : > { %1762 = vrot.lane.b32.xlu0 %v1459_v4, %s6271_s16  ;;  %v2860_v43 = vsel %vm2857_vm10, %v2827_v22, %v2251_v18  ;;  %v2762_v30 = vsel %vm2758_vm6, %v2729_v53, %v7188_v31 }
 0x331   : > { %v2381_v10 = vpop.permute.xlu1 %2380  ;;  %v2893_v11 = vsel %vm2890_vm9, %v2860_v43, %v2379_v32  ;;  %v2795_v20 = vsel %vm2791_vm7, %v2762_v30, %v7232_v2 }
 0x332   : > { %v7286_v12 = vpop.permute.xlu0 %1874  ;;  %v2926_v42 = vsel %vm2923_vm11, %v2893_v11, %v2507_v63  ;;  %v2828_v55 = vsel %vm2824_vm8, %v2795_v20, %v2125_v38  ;;  %v7315_v63 = vld [vmem:[#allocation2 + $0xb0] sm:$0xff]  ;;  %v1461_v11 = vld [vmem:[#allocation2 + $0xc1] sm:$0xff] }
 0x333   : > { %2394 = vrot.lane.b32.xlu1 %v7288_v13, %s6273_s26  ;;  %v2861_v52 = vsel %vm2857_vm10, %v2828_v55, %v2253_v45  ;;  %v1462_v20 = vld [vmem:[#allocation2 + $0xc9] sm:$0xff] }
 0x334   : > { %2014 = vrot.lane.b32.xlu0 %v7288_v13, %s6277_s17  ;;  %v2894_v31 = vsel %vm2890_vm9, %v2861_v52, %v2381_v10 }
 0x335   : > { %v7298_v16 = vpop.permute.xlu1 %2000 }
 0x336   : > { %v2635_v28 = vpop.permute.xlu0 %2634 }
 0x337   : > { %v2959_v41 = vsel %vm2956_vm12, %v2926_v42, %v2635_v28  ;;  %1764 = vrot.lane.b32.xlu1 %v1460_v35, %s6271_s16  ;;  %v2730_v42 = vsel %vm1122_vm2, %v7051_v1, %v7197_v39 }
 0x338   : > { %2522 = vrot.lane.b32.xlu0 %v1459_v4, %s6274_s12  ;;  %6058 = vmatprep.mubr.msk.f32.mxu1 %vm2996_vm13, %v2959_v41  ;;  %v2763_v28 = vsel %vm2758_vm6, %v2730_v42, %v7221_v60 }
 0x339   : > { %v2509_v18 = vpop.permute.xlu1 %2508 }
 0x33a   : > { %v2255_v51 = vpop.permute.xlu0 %2254  ;;  %v2927_v2 = vsel %vm2923_vm11, %v2894_v31, %v2509_v18  ;;  %v7353_v18 = vld [vmem:[#allocation2 + $0xc0] sm:$0xff]  ;;  %v1494_v31 = vld [vmem:[#allocation2 + $0xca] sm:$0xff] }
 0x33b   : > { %1892 = vrot.lane.b32.xlu1 %v1492_v40, %s6272_s21 }
 0x33c   : > { %2142 = vrot.lane.b32.xlu0 %v1459_v4, %s6279_s29 }
 0x33d   : > { %v2129_v19 = vpop.permute.xlu1 %2128 }
 0x33e   : > { %v2257_v32 = vpop.permute.xlu0 %2256 }
 0x33f   : > { %2396 = vrot.lane.b32.xlu1 %v7315_v63, %s6273_s26 }
 0x340   : > { %1890 = vrot.lane.b32.xlu0 %v1491_v25, %s6272_s21 }
 0x341   : > { %v2637_v6 = vpop.permute.xlu1 %2636 }
 0x342   : > { %v2960_v38 = vsel %vm2956_vm12, %v2927_v2, %v2637_v6  ;;  %v7324_v4 = vpop.permute.xlu0 %1750 }
 0x343   : > { %2016 = vrot.lane.b32.xlu1 %v7315_v63, %s6277_s17  ;;  %6059 = vmatmul.mubr.msk.f32.gmra.mrb[26].mxu1 %vm2996_vm13, %v2960_v38 }
 0x344   : > { %2650 = vrot.lane.b32.xlu0 %v1491_v25, %s6275_s18 }
 0x345   : > { %v2383_v45 = vpop.permute.xlu1 %2382 }
 0x346   : > { %v7330_v7 = vpop.permute.xlu0 %2002 }
 0x347   : > { %2524 = vrot.lane.b32.xlu1 %v1460_v35, %s6274_s12 }
 0x348   : > { %2270 = vrot.lane.b32.xlu0 %v1491_v25, %s6280_s11 }
 0x349   : > { %v7334_v10 = vpop.permute.xlu1 %1752 }
 0x34a   : > { %v2511_v9 = vpop.permute.xlu0 %2510 }
 0x34b   : > { %2144 = vrot.lane.b32.xlu1 %v1460_v35, %s6279_s29  ;;  %v2796_v35 = vsel %vm2791_vm7, %v2763_v28, %v7265_v59 }
 0x34c   : > { %2272 = vrot.lane.b32.xlu0 %v1492_v40, %s6280_s11  ;;  %v2829_v30 = vsel %vm2824_vm8, %v2796_v35, %v7275_v29  ;;  %v2731_v29 = vsel %vm1122_vm2, %v7082_v24, %v7206_v44  ;;  %v1493_v44 = vld [vmem:[#allocation2 + $0xc2] sm:$0xff] }
 0x34d   : > { %v7338_v22 = vpop.permute.xlu1 %1880  ;;  %v2862_v1 = vsel %vm2857_vm10, %v2829_v30, %v2255_v51  ;;  %v2764_v52 = vsel %vm2758_vm6, %v2731_v29, %v7210_v50 }
 0x34e   : > { %v7340_v43 = vpop.permute.xlu0 %2130  ;;  %v2895_v39 = vsel %vm2890_vm9, %v2862_v1, %v2383_v45  ;;  %v2797_v2 = vsel %vm2791_vm7, %v2764_v52, %v7298_v16 }
 0x34f   : > { %2652 = vrot.lane.b32.xlu1 %v1492_v40, %s6275_s18  ;;  %v2928_v59 = vsel %vm2923_vm11, %v2895_v39, %v2511_v9  ;;  %v2830_v6 = vsel %vm2824_vm8, %v2797_v2, %v2129_v19  ;;  %v7380_v9 = vld [vmem:[#allocation2 + $0xc8] sm:$0xff]  ;;  %v1463_v39 = vld [vmem:[#allocation2 + $0xd9] sm:$0xff] }
 0x350   : > { %1766 = vrot.lane.b32.xlu0 %v1461_v11, %s6271_s16  ;;  %v2863_v24 = vsel %vm2857_vm10, %v2830_v6, %v2257_v32  ;;  %v1464_v2 = vld [vmem:[#allocation2 + $0xe1] sm:$0xff] }
 0x351   : > { %v2385_v41 = vpop.permute.xlu1 %2384 }
 0x352   : > { %v7351_v53 = vpop.permute.xlu0 %1878  ;;  %v2896_v50 = vsel %vm2890_vm9, %v2863_v24, %v2385_v41 }
 0x353   : > { %2398 = vrot.lane.b32.xlu1 %v7353_v18, %s6273_s26 }
 0x354   : > { %2018 = vrot.lane.b32.xlu0 %v7353_v18, %s6277_s17 }
 0x355   : > { %v7363_v60 = vpop.permute.xlu1 %2004 }
 0x356   : > { %v2639_v40 = vpop.permute.xlu0 %2638 }
 0x357   : > { %v2961_v55 = vsel %vm2956_vm12, %v2928_v59, %v2639_v40  ;;  %1768 = vrot.lane.b32.xlu1 %v1462_v20, %s6271_s16  ;;  %v2732_v59 = vsel %vm1122_vm2, %v7104_v36, %v7259_v27 }
 0x358   : > { %2526 = vrot.lane.b32.xlu0 %v1461_v11, %s6274_s12  ;;  %6061 = vmatprep.mubr.msk.f32.mxu1 %vm2996_vm13, %v2961_v55  ;;  %v2765_v40 = vsel %vm2758_vm6, %v2732_v59, %v7286_v12 }
 0x359   : > { %v2513_v51 = vpop.permute.xlu1 %2512 }
 0x35a   : > { %v2259_v25 = vpop.permute.xlu0 %2258  ;;  %v2929_v16 = vsel %vm2923_vm11, %v2896_v50, %v2513_v51  ;;  %v7418_v51 = vld [vmem:[#allocation2 + $0xd8] sm:$0xff]  ;;  %v1496_v50 = vld [vmem:[#allocation2 + $0xe2] sm:$0xff] }
 0x35b   : > { %1896 = vrot.lane.b32.xlu1 %v1494_v31, %s6272_s21 }
 0x35c   : > { %2146 = vrot.lane.b32.xlu0 %v1461_v11, %s6279_s29 }
 0x35d   : > { %v2133_v38 = vpop.permute.xlu1 %2132 }
 0x35e   : > { %v2261_v45 = vpop.permute.xlu0 %2260 }
 0x35f   : > { %2400 = vrot.lane.b32.xlu1 %v7380_v9, %s6273_s26 }
 0x360   : > { %1894 = vrot.lane.b32.xlu0 %v1493_v44, %s6272_s21 }
 0x361   : > { %v2641_v42 = vpop.permute.xlu1 %2640 }
 0x362   : > { %v2962_v19 = vsel %vm2956_vm12, %v2929_v16, %v2641_v42  ;;  %v7389_v11 = vpop.permute.xlu0 %1754 }
 0x363   : > { %2020 = vrot.lane.b32.xlu1 %v7380_v9, %s6277_s17  ;;  %6062 = vmatmul.mubr.msk.f32.gmra.mrb[28].mxu1 %vm2996_vm13, %v2962_v19 }
 0x364   : > { %2654 = vrot.lane.b32.xlu0 %v1493_v44, %s6275_s18 }
 0x365   : > { %v2387_v32 = vpop.permute.xlu1 %2386 }
 0x366   : > { %v7395_v28 = vpop.permute.xlu0 %2006 }
 0x367   : > { %2528 = vrot.lane.b32.xlu1 %v1462_v20, %s6274_s12 }
 0x368   : > { %2274 = vrot.lane.b32.xlu0 %v1493_v44, %s6280_s11 }
 0x369   : > { %v7399_v41 = vpop.permute.xlu1 %1756 }
 0x36a   : > { %v2515_v35 = vpop.permute.xlu0 %2514 }
 0x36b   : > { %2148 = vrot.lane.b32.xlu1 %v1462_v20, %s6279_s29  ;;  %v2798_v20 = vsel %vm2791_vm7, %v2765_v40, %v7330_v7 }
 0x36c   : > { %2276 = vrot.lane.b32.xlu0 %v1494_v31, %s6280_s11  ;;  %v2831_v52 = vsel %vm2824_vm8, %v2798_v20, %v7340_v43  ;;  %v2733_v43 = vsel %vm1122_vm2, %v7117_v48, %v7269_v58  ;;  %v1495_v58 = vld [vmem:[#allocation2 + $0xda] sm:$0xff] }
 0x36d   : > { %v7403_v30 = vpop.permute.xlu1 %1884  ;;  %v2864_v36 = vsel %vm2857_vm10, %v2831_v52, %v2259_v25  ;;  %v2766_v24 = vsel %vm2758_vm6, %v2733_v43, %v7273_v0 }
 0x36e   : > { %v7405_v1 = vpop.permute.xlu0 %2134  ;;  %v2897_v27 = vsel %vm2890_vm9, %v2864_v36, %v2387_v32  ;;  %v2799_v16 = vsel %vm2791_vm7, %v2766_v24, %v7363_v60 }
 0x36f   : > { %2656 = vrot.lane.b32.xlu1 %v1494_v31, %s6275_s18  ;;  %v2930_v7 = vsel %vm2923_vm11, %v2897_v27, %v2515_v35  ;;  %v2832_v42 = vsel %vm2824_vm8, %v2799_v16, %v2133_v38  ;;  %v7445_v35 = vld [vmem:[#allocation2 + $0xe0] sm:$0xff]  ;;  %v1465_v27 = vld [vmem:[#allocation2 + $0xf1] sm:$0xff] }
 0x370   : > { %1770 = vrot.lane.b32.xlu0 %v1463_v39, %s6271_s16  ;;  %v2865_v48 = vsel %vm2857_vm10, %v2832_v42, %v2261_v45  ;;  %v1466_v16 = vld [vmem:[#allocation2 + $0xf9] sm:$0xff] }
 0x371   : > { %v2389_v55 = vpop.permute.xlu1 %2388 }
 0x372   : > { %v7416_v29 = vpop.permute.xlu0 %1882  ;;  %v2898_v0 = vsel %vm2890_vm9, %v2865_v48, %v2389_v55 }
 0x373   : > { %2402 = vrot.lane.b32.xlu1 %v7418_v51, %s6273_s26 }
 0x374   : > { %2022 = vrot.lane.b32.xlu0 %v7418_v51, %s6277_s17 }
 0x375   : > { %v7428_v12 = vpop.permute.xlu1 %2008 }
 0x376   : > { %v2643_v31 = vpop.permute.xlu0 %2642 }
 0x377   : > { %v2963_v6 = vsel %vm2956_vm12, %v2930_v7, %v2643_v31  ;;  %1772 = vrot.lane.b32.xlu1 %v1464_v2, %s6271_s16  ;;  %v2734_v7 = vsel %vm1122_vm2, %v7136_v56, %v7324_v4 }
 0x378   : > { %2530 = vrot.lane.b32.xlu0 %v1463_v39, %s6274_s12  ;;  %6064 = vmatprep.mubr.msk.f32.mxu1 %vm2996_vm13, %v2963_v6  ;;  %v2767_v31 = vsel %vm2758_vm6, %v2734_v7, %v7351_v53 }
 0x379   : > { %v2517_v25 = vpop.permute.xlu1 %2516 }
 0x37a   : > { %v2263_v44 = vpop.permute.xlu0 %2262  ;;  %v2931_v60 = vsel %vm2923_vm11, %v2898_v0, %v2517_v25  ;;  %v7483_v25 = vld [vmem:[#allocation2 + $0xf0] sm:$0xff]  ;;  %v1498_v0 = vld [vmem:[#allocation2 + $0xfa] sm:$0xff] }
 0x37b   : > { %1900 = vrot.lane.b32.xlu1 %v1496_v50, %s6272_s21 }
 0x37c   : > { %2150 = vrot.lane.b32.xlu0 %v1463_v39, %s6279_s29 }
 0x37d   : > { %v2137_v19 = vpop.permute.xlu1 %2136 }
 0x37e   : > { %v2265_v32 = vpop.permute.xlu0 %2264 }
 0x37f   : > { %2404 = vrot.lane.b32.xlu1 %v7445_v35, %s6273_s26 }
 0x380   : > { %1898 = vrot.lane.b32.xlu0 %v1495_v58, %s6272_s21 }
 0x381   : > { %v2645_v59 = vpop.permute.xlu1 %2644 }
 0x382   : > { %v2964_v38 = vsel %vm2956_vm12, %v2931_v60, %v2645_v59  ;;  %v7454_v39 = vpop.permute.xlu0 %1758 }
 0x383   : > { %2024 = vrot.lane.b32.xlu1 %v7445_v35, %s6277_s17  ;;  %6065 = vmatmul.mubr.msk.f32.gmra.mrb[30].mxu1 %vm2996_vm13, %v2964_v38 }
 0x384   : > { %2658 = vrot.lane.b32.xlu0 %v1495_v58, %s6275_s18 }
 0x385   : > { %v2391_v45 = vpop.permute.xlu1 %2390 }
 0x386   : > { %v7460_v40 = vpop.permute.xlu0 %2010 }
 0x387   : > { %2532 = vrot.lane.b32.xlu1 %v1464_v2, %s6274_s12 }
 0x388   : > { %2278 = vrot.lane.b32.xlu0 %v1495_v58, %s6280_s11 }
 0x389   : > { %v7464_v55 = vpop.permute.xlu1 %1760 }
 0x38a   : > { %v2519_v20 = vpop.permute.xlu0 %2518 }
 0x38b   : > { %2152 = vrot.lane.b32.xlu1 %v1464_v2, %s6279_s29  ;;  %v2800_v2 = vsel %vm2791_vm7, %v2767_v31, %v7395_v28 }
 0x38c   : > { %2280 = vrot.lane.b32.xlu0 %v1496_v50, %s6280_s11  ;;  %v2833_v24 = vsel %vm2824_vm8, %v2800_v2, %v7405_v1  ;;  %v2735_v1 = vsel %vm1122_vm2, %v7149_v3, %v7334_v10  ;;  %v1497_v10 = vld [vmem:[#allocation2 + $0xf2] sm:$0xff] }
 0x38d   : > { %v7468_v52 = vpop.permute.xlu1 %1888  ;;  %v2866_v56 = vsel %vm2857_vm10, %v2833_v24, %v2263_v44  ;;  %v2768_v48 = vsel %vm2758_vm6, %v2735_v1, %v7338_v22 }
 0x38e   : > { %v7470_v36 = vpop.permute.xlu0 %2138  ;;  %v2899_v4 = vsel %vm2890_vm9, %v2866_v56, %v2391_v45  ;;  %v2801_v60 = vsel %vm2791_vm7, %v2768_v48, %v7428_v12 }
 0x38f   : > { %2660 = vrot.lane.b32.xlu1 %v1496_v50, %s6275_s18  ;;  %v2932_v28 = vsel %vm2923_vm11, %v2899_v4, %v2519_v20  ;;  %v2834_v59 = vsel %vm2824_vm8, %v2801_v60, %v2137_v19  ;;  %v7510_v20 = vld [vmem:[#allocation2 + $0xf8] sm:$0xff]  ;;  %v1467_v4 = vld [vmem:[#allocation2 + $0x109] sm:$0xff] }
 0x390   : > { %1774 = vrot.lane.b32.xlu0 %v1465_v27, %s6271_s16  ;;  %v2867_v3 = vsel %vm2857_vm10, %v2834_v59, %v2265_v32  ;;  %v1468_v60 = vld [vmem:[#allocation2 + $0x111] sm:$0xff] }
 0x391   : > { %v2393_v6 = vpop.permute.xlu1 %2392 }
 0x392   : > { %v7481_v43 = vpop.permute.xlu0 %1886  ;;  %v2900_v22 = vsel %vm2890_vm9, %v2867_v3, %v2393_v6 }
 0x393   : > { %2406 = vrot.lane.b32.xlu1 %v7483_v25, %s6273_s26 }
 0x394   : > { %2026 = vrot.lane.b32.xlu0 %v7483_v25, %s6277_s17 }
 0x395   : > { %v7493_v53 = vpop.permute.xlu1 %2012 }
 0x396   : > { %v2647_v50 = vpop.permute.xlu0 %2646 }
 0x397   : > { %v2965_v42 = vsel %vm2956_vm12, %v2932_v28, %v2647_v50  ;;  %1776 = vrot.lane.b32.xlu1 %v1466_v16, %s6271_s16  ;;  %v2736_v28 = vsel %vm1122_vm2, %v7171_v17, %v7389_v11 }
 0x398   : > { %2534 = vrot.lane.b32.xlu0 %v1465_v27, %s6274_s12  ;;  %6067 = vmatprep.mubr.msk.f32.mxu1 %vm2996_vm13, %v2965_v42  ;;  %v2769_v50 = vsel %vm2758_vm6, %v2736_v28, %v7416_v29 }
 0x399   : > { %v2521_v44 = vpop.permute.xlu1 %2520 }
 0x39a   : > { %v2267_v58 = vpop.permute.xlu0 %2266  ;;  %v2933_v12 = vsel %vm2923_vm11, %v2900_v22, %v2521_v44  ;;  %v7548_v44 = vld [vmem:[#allocation2 + $0x108] sm:$0xff]  ;;  %v1500_v22 = vld [vmem:[#allocation2 + $0x112] sm:$0xff] }
 0x39b   : > { %1904 = vrot.lane.b32.xlu1 %v1498_v0, %s6272_s21 }
 0x39c   : > { %2154 = vrot.lane.b32.xlu0 %v1465_v27, %s6279_s29 }
 0x39d   : > { %v2141_v38 = vpop.permute.xlu1 %2140 }
 0x39e   : > { %v2269_v45 = vpop.permute.xlu0 %2268 }
 0x39f   : > { %2408 = vrot.lane.b32.xlu1 %v7510_v20, %s6273_s26 }
 0x3a0   : > { %1902 = vrot.lane.b32.xlu0 %v1497_v10, %s6272_s21 }
 0x3a1   : > { %v2649_v7 = vpop.permute.xlu1 %2648 }
 0x3a2   : > { %v2966_v19 = vsel %vm2956_vm12, %v2933_v12, %v2649_v7  ;;  %v7519_v27 = vpop.permute.xlu0 %1762 }
 0x3a3   : > { %2028 = vrot.lane.b32.xlu1 %v7510_v20, %s6277_s17  ;;  %6068 = vmatmul.mubr.msk.f32.gmra.mrb[32].mxu1 %vm2996_vm13, %v2966_v19 }
 0x3a4   : > { %2662 = vrot.lane.b32.xlu0 %v1497_v10, %s6275_s18 }
 0x3a5   : > { %v2395_v32 = vpop.permute.xlu1 %2394 }
 0x3a6   : > { %v7525_v31 = vpop.permute.xlu0 %2014 }
 0x3a7   : > { %2536 = vrot.lane.b32.xlu1 %v1466_v16, %s6274_s12 }
 0x3a8   : > { %2282 = vrot.lane.b32.xlu0 %v1497_v10, %s6280_s11 }
 0x3a9   : > { %v7529_v6 = vpop.permute.xlu1 %1764 }
 0x3aa   : > { %v2523_v2 = vpop.permute.xlu0 %2522 }
 0x3ab   : > { %2156 = vrot.lane.b32.xlu1 %v1466_v16, %s6279_s29  ;;  %v2802_v16 = vsel %vm2791_vm7, %v2769_v50, %v7460_v40 }
 0x3ac   : > { %2284 = vrot.lane.b32.xlu0 %v1498_v0, %s6280_s11  ;;  %v2835_v48 = vsel %vm2824_vm8, %v2802_v16, %v7470_v36  ;;  %v2737_v36 = vsel %vm1122_vm2, %v7192_v34, %v7399_v41  ;;  %v1499_v41 = vld [vmem:[#allocation2 + $0x10a] sm:$0xff] }
 0x3ad   : > { %v7533_v24 = vpop.permute.xlu1 %1892  ;;  %v2868_v17 = vsel %vm2857_vm10, %v2835_v48, %v2267_v58  ;;  %v2770_v3 = vsel %vm2758_vm6, %v2737_v36, %v7403_v30 }
 0x3ae   : > { %v7535_v56 = vpop.permute.xlu0 %2142  ;;  %v2901_v11 = vsel %vm2890_vm9, %v2868_v17, %v2395_v32  ;;  %v2803_v12 = vsel %vm2791_vm7, %v2770_v3, %v7493_v53 }
 0x3af   : > { %2664 = vrot.lane.b32.xlu1 %v1498_v0, %s6275_s18  ;;  %v2934_v40 = vsel %vm2923_vm11, %v2901_v11, %v2523_v2  ;;  %v2836_v7 = vsel %vm2824_vm8, %v2803_v12, %v2141_v38  ;;  %v7575_v2 = vld [vmem:[#allocation2 + $0x110] sm:$0xff]  ;;  %v1469_v11 = vld [vmem:[#allocation2 + $0x121] sm:$0xff] }
 0x3b0   : > { %1778 = vrot.lane.b32.xlu0 %v1467_v4, %s6271_s16  ;;  %v2869_v34 = vsel %vm2857_vm10, %v2836_v7, %v2269_v45  ;;  %v1470_v12 = vld [vmem:[#allocation2 + $0x129] sm:$0xff] }
 0x3b1   : > { %v2397_v42 = vpop.permute.xlu1 %2396 }
 0x3b2   : > { %v7546_v1 = vpop.permute.xlu0 %1890  ;;  %v2902_v30 = vsel %vm2890_vm9, %v2869_v34, %v2397_v42 }
 0x3b3   : > { %2410 = vrot.lane.b32.xlu1 %v7548_v44, %s6273_s26 }
 0x3b4   : > { %2030 = vrot.lane.b32.xlu0 %v7548_v44, %s6277_s17 }
 0x3b5   : > { %v7558_v29 = vpop.permute.xlu1 %2016 }
 0x3b6   : > { %v2651_v0 = vpop.permute.xlu0 %2650 }
 0x3b7   : > { %v2967_v59 = vsel %vm2956_vm12, %v2934_v40, %v2651_v0  ;;  %1780 = vrot.lane.b32.xlu1 %v1468_v60, %s6271_s16  ;;  %v2738_v40 = vsel %vm1122_vm2, %v7223_v23, %v7454_v39 }
 0x3b8   : > { %2538 = vrot.lane.b32.xlu0 %v1467_v4, %s6274_s12  ;;  %6070 = vmatprep.mubr.msk.f32.mxu1 %vm2996_vm13, %v2967_v59  ;;  %v2771_v0 = vsel %vm2758_vm6, %v2738_v40, %v7481_v43 }
 0x3b9   : > { %v2525_v58 = vpop.permute.xlu1 %2524 }
 0x3ba   : > { %v2271_v10 = vpop.permute.xlu0 %2270  ;;  %v2935_v53 = vsel %vm2923_vm11, %v2902_v30, %v2525_v58  ;;  %v7613_v58 = vld [vmem:[#allocation2 + $0x120] sm:$0xff]  ;;  %v1502_v30 = vld [vmem:[#allocation2 + $0x12a] sm:$0xff] }
 0x3bb   : > { %1908 = vrot.lane.b32.xlu1 %v1500_v22, %s6272_s21 }
 0x3bc   : > { %2158 = vrot.lane.b32.xlu0 %v1467_v4, %s6279_s29 }
 0x3bd   : > { %v2145_v19 = vpop.permute.xlu1 %2144 }
 0x3be   : > { %v2273_v32 = vpop.permute.xlu0 %2272 }
 0x3bf   : > { %2412 = vrot.lane.b32.xlu1 %v7575_v2, %s6273_s26 }
 0x3c0   : > { %1906 = vrot.lane.b32.xlu0 %v1499_v41, %s6272_s21 }
 0x3c1   : > { %v2653_v28 = vpop.permute.xlu1 %2652 }
 0x3c2   : > { %v2968_v38 = vsel %vm2956_vm12, %v2935_v53, %v2653_v28  ;;  %v7584_v4 = vpop.permute.xlu0 %1766 }
 0x3c3   : > { %2032 = vrot.lane.b32.xlu1 %v7575_v2, %s6277_s17  ;;  %6071 = vmatmul.mubr.msk.f32.gmra.mrb[34].mxu1 %vm2996_vm13, %v2968_v38 }
 0x3c4   : > { %2666 = vrot.lane.b32.xlu0 %v1499_v41, %s6275_s18 }
 0x3c5   : > { %v2399_v45 = vpop.permute.xlu1 %2398 }
 0x3c6   : > { %v7590_v50 = vpop.permute.xlu0 %2018 }
 0x3c7   : > { %2540 = vrot.lane.b32.xlu1 %v1468_v60, %s6274_s12 }
 0x3c8   : > { %2286 = vrot.lane.b32.xlu0 %v1499_v41, %s6280_s11 }
 0x3c9   : > { %v7594_v42 = vpop.permute.xlu1 %1768 }
 0x3ca   : > { %v2527_v16 = vpop.permute.xlu0 %2526 }
 0x3cb   : > { %2160 = vrot.lane.b32.xlu1 %v1468_v60, %s6279_s29  ;;  %v2804_v60 = vsel %vm2791_vm7, %v2771_v0, %v7525_v31 }
 0x3cc   : > { %2288 = vrot.lane.b32.xlu0 %v1500_v22, %s6280_s11  ;;  %v2837_v3 = vsel %vm2824_vm8, %v2804_v60, %v7535_v56  ;;  %v2739_v56 = vsel %vm1122_vm2, %v7249_v49, %v7464_v55  ;;  %v1501_v55 = vld [vmem:[#allocation2 + $0x122] sm:$0xff] }
 0x3cd   : > { %v7598_v48 = vpop.permute.xlu1 %1896  ;;  %v2870_v23 = vsel %vm2857_vm10, %v2837_v3, %v2271_v10  ;;  %v2772_v34 = vsel %vm2758_vm6, %v2739_v56, %v7468_v52 }
 0x3ce   : > { %v7600_v17 = vpop.permute.xlu0 %2146  ;;  %v2903_v39 = vsel %vm2890_vm9, %v2870_v23, %v2399_v45  ;;  %v2805_v53 = vsel %vm2791_vm7, %v2772_v34, %v7558_v29 }
 0x3cf   : > { %2668 = vrot.lane.b32.xlu1 %v1500_v22, %s6275_s18  ;;  %v2936_v31 = vsel %vm2923_vm11, %v2903_v39, %v2527_v16  ;;  %v2838_v28 = vsel %vm2824_vm8, %v2805_v53, %v2145_v19  ;;  %v7640_v16 = vld [vmem:[#allocation2 + $0x128] sm:$0xff]  ;;  %v1471_v39 = vld [vmem:[#allocation2 + $0x139] sm:$0xff] }
 0x3d0   : > { %1782 = vrot.lane.b32.xlu0 %v1469_v11, %s6271_s16  ;;  %v2871_v49 = vsel %vm2857_vm10, %v2838_v28, %v2273_v32  ;;  %v1472_v28 = vld [vmem:[#allocation2 + $0x141] sm:$0xff] }
 0x3d1   : > { %v2401_v59 = vpop.permute.xlu1 %2400 }
 0x3d2   : > { %v7611_v36 = vpop.permute.xlu0 %1894  ;;  %v2904_v52 = vsel %vm2890_vm9, %v2871_v49, %v2401_v59 }
 0x3d3   : > { %2414 = vrot.lane.b32.xlu1 %v7613_v58, %s6273_s26 }
 0x3d4   : > { %2034 = vrot.lane.b32.xlu0 %v7613_v58, %s6277_s17 }
 0x3d5   : > { %v7623_v43 = vpop.permute.xlu1 %2020 }
 0x3d6   : > { %v2655_v22 = vpop.permute.xlu0 %2654 }
 0x3d7   : > { %v2969_v7 = vsel %vm2956_vm12, %v2936_v31, %v2655_v22  ;;  %1784 = vrot.lane.b32.xlu1 %v1470_v12, %s6271_s16  ;;  %v2740_v31 = vsel %vm1122_vm2, %v7288_v13, %v7519_v27 }
 0x3d8   : > { %2542 = vrot.lane.b32.xlu0 %v1469_v11, %s6274_s12  ;;  %6073 = vmatprep.mubr.msk.f32.mxu1 %vm2996_vm13, %v2969_v7  ;;  %v2773_v22 = vsel %vm2758_vm6, %v2740_v31, %v7546_v1 }
 0x3d9   : > { %v2529_v10 = vpop.permute.xlu1 %2528 }
 0x3da   : > { %v2275_v41 = vpop.permute.xlu0 %2274  ;;  %v2937_v29 = vsel %vm2923_vm11, %v2904_v52, %v2529_v10  ;;  %v7678_v10 = vld [vmem:[#allocation2 + $0x138] sm:$0xff] }
 0x3db   : > { %1912 = vrot.lane.b32.xlu1 %v1502_v30, %s6272_s21 }
 0x3dc   : > { %2162 = vrot.lane.b32.xlu0 %v1469_v11, %s6279_s29 }
 0x3dd   : > { %v2149_v38 = vpop.permute.xlu1 %2148 }
 0x3de   : > { %v2277_v45 = vpop.permute.xlu0 %2276 }
 0x3df   : > { %2416 = vrot.lane.b32.xlu1 %v7640_v16, %s6273_s26 }
 0x3e0   : > { %1910 = vrot.lane.b32.xlu0 %v1501_v55, %s6272_s21 }
 0x3e1   : > { %v2657_v40 = vpop.permute.xlu1 %2656 }
 0x3e2   : > { %v2970_v19 = vsel %vm2956_vm12, %v2937_v29, %v2657_v40  ;;  %v7649_v11 = vpop.permute.xlu0 %1770  ;;  %v1504_v40 = vld [vmem:[#allocation2 + $0x142] sm:$0xff] }
 0x3e3   : > { %2036 = vrot.lane.b32.xlu1 %v7640_v16, %s6277_s17  ;;  %6074 = vmatmul.mubr.msk.f32.gmra.mrb[36].mxu1 %vm2996_vm13, %v2970_v19 }
 0x3e4   : > { %2670 = vrot.lane.b32.xlu0 %v1501_v55, %s6275_s18 }
 0x3e5   : > { %v2403_v32 = vpop.permute.xlu1 %2402 }
 0x3e6   : > { %v7655_v0 = vpop.permute.xlu0 %2022 }
 0x3e7   : > { %2544 = vrot.lane.b32.xlu1 %v1470_v12, %s6274_s12 }
 0x3e8   : > { %2290 = vrot.lane.b32.xlu0 %v1501_v55, %s6280_s11 }
 0x3e9   : > { %v7659_v59 = vpop.permute.xlu1 %1772 }
 0x3ea   : > { %v2531_v60 = vpop.permute.xlu0 %2530 }
 0x3eb   : > { %2164 = vrot.lane.b32.xlu1 %v1470_v12, %s6279_s29  ;;  %v2806_v12 = vsel %vm2791_vm7, %v2773_v22, %v7590_v50  ;;  %v7709_v22 = vld [vmem:[#allocation2 + $0x140] sm:$0xff] }
 0x3ec   : > { %2292 = vrot.lane.b32.xlu0 %v1502_v30, %s6280_s11  ;;  %v2839_v34 = vsel %vm2824_vm8, %v2806_v12, %v7600_v17 }
 0x3ed   : > { %v7663_v3 = vpop.permute.xlu1 %1900  ;;  %v2872_v13 = vsel %vm2857_vm10, %v2839_v34, %v2275_v41  ;;  %v2741_v41 = vsel %vm1122_vm2, %v7315_v63, %v7529_v6  ;;  %v1503_v6 = vld [vmem:[#allocation2 + $0x13a] sm:$0xff] }
 0x3ee   : > { %v7665_v23 = vpop.permute.xlu0 %2150  ;;  %v2905_v27 = vsel %vm2890_vm9, %v2872_v13, %v2403_v32  ;;  %v2774_v52 = vsel %vm2758_vm6, %v2741_v41, %v7533_v24 }
 0x3ef   : > { %2672 = vrot.lane.b32.xlu1 %v1502_v30, %s6275_s18  ;;  %v2938_v50 = vsel %vm2923_vm11, %v2905_v27, %v2531_v60  ;;  %v2807_v19 = vsel %vm2791_vm7, %v2774_v52, %v7623_v43 }
 0x3f0   : > { %1786 = vrot.lane.b32.xlu0 %v1471_v39, %s6271_s16  ;;  %v2840_v32 = vsel %vm2824_vm8, %v2807_v19, %v2149_v38  ;;  %v7747_v19 = vld [vmem:[#allocation2 + $0x150] sm:$0xff] }
 0x3f1   : > { %v2405_v7 = vpop.permute.xlu1 %2404  ;;  %v2873_v63 = vsel %vm2857_vm10, %v2840_v32, %v2277_v45 }
 0x3f2   : > { %v7676_v56 = vpop.permute.xlu0 %1898  ;;  %v2906_v24 = vsel %vm2890_vm9, %v2873_v63, %v2405_v7 }
 0x3f3   : > { %2418 = vrot.lane.b32.xlu1 %v7678_v10, %s6273_s26 }
 0x3f4   : > { %2038 = vrot.lane.b32.xlu0 %v7678_v10, %s6277_s17 }
 0x3f5   : > { %v7688_v1 = vpop.permute.xlu1 %2024 }
 0x3f6   : > { %v7691_v30 = vpop.f32.mrb[24].mxu1  ;;  %v2659_v53 = vpop.permute.xlu0 %2658 }
 0x3f7   : > { %v2971_v17 = vsel %vm2956_vm12, %v2938_v50, %v2659_v53  ;;  %1788 = vrot.lane.b32.xlu1 %v1472_v28, %s6271_s16  ;;  %v7695_v49 = vpop.f32.mrb[25].mxu1  ;;  %v1473_v53 = vld [vmem:[#allocation2 + $0x151] sm:$0xff] }
 0x3f8   : > { %2546 = vrot.lane.b32.xlu0 %v1471_v39, %s6274_s12  ;;  %6076 = vmatprep.mubr.msk.f32.mxu1 %vm2996_vm13, %v2971_v17  ;;  %v2742_v17 = vsel %vm1122_vm2, %v7353_v18, %v7584_v4 }
 0x3f9   : > { %v2533_v55 = vpop.permute.xlu1 %2532  ;;  %v2775_v41 = vsel %vm2758_vm6, %v2742_v17, %v7611_v36 }
 0x3fa   : > { %v2279_v29 = vpop.permute.xlu0 %2278  ;;  %v2939_v43 = vsel %vm2923_vm11, %v2906_v24, %v2533_v55 }
 0x3fb   : > { %1916 = vrot.lane.b32.xlu1 %v1504_v40, %s6272_s21 }
 0x3fc   : > { %2166 = vrot.lane.b32.xlu0 %v1471_v39, %s6279_s29 }
 0x3fd   : > { %v2153_v60 = vpop.permute.xlu1 %2152 }
 0x3fe   : > { %v2281_v31 = vpop.permute.xlu0 %2280 }
 0x3ff   : > { %2420 = vrot.lane.b32.xlu1 %v7709_v22, %s6273_s26 }
 0x400   : > { %1914 = vrot.lane.b32.xlu0 %v1503_v6, %s6272_s21 }
 0x401   : > { %v2661_v12 = vpop.permute.xlu1 %2660 }
 0x402   : > { %v2972_v38 = vsel %vm2956_vm12, %v2939_v43, %v2661_v12  ;;  %v7718_v39 = vpop.permute.xlu0 %1774 }
 0x403   : > { %2040 = vrot.lane.b32.xlu1 %v7709_v22, %s6277_s17  ;;  %6077 = vmatmul.mubr.msk.f32.gmra.mrb[38].mxu1 %vm2996_vm13, %v2972_v38 }
 0x404   : > { %2674 = vrot.lane.b32.xlu0 %v1503_v6, %s6275_s18 }
 0x405   : > { %v2407_v45 = vpop.permute.xlu1 %2406 }
 0x406   : > { %v7724_v34 = vpop.permute.xlu0 %2026 }
 0x407   : > { %2548 = vrot.lane.b32.xlu1 %v1472_v28, %s6274_s12 }
 0x408   : > { %2294 = vrot.lane.b32.xlu0 %v1503_v6, %s6280_s11  ;;  %v1474_v6 = vld [vmem:[#allocation2 + $0x159] sm:$0xff] }
 0x409   : > { %v7728_v7 = vpop.permute.xlu1 %1776 }
 0x40a   : > { %v2535_v13 = vpop.permute.xlu0 %2534 }
 0x40b   : > { %2168 = vrot.lane.b32.xlu1 %v1472_v28, %s6279_s29  ;;  %v2808_v28 = vsel %vm2791_vm7, %v2775_v41, %v7655_v0 }
 0x40c   : > { %2296 = vrot.lane.b32.xlu0 %v1504_v40, %s6280_s11 }
 0x40d   : > { %v7732_v27 = vpop.permute.xlu1 %1904 }
 0x40e   : > { %v7734_v50 = vpop.permute.xlu0 %2154 }
 0x40f   : > { %2676 = vrot.lane.b32.xlu1 %v1504_v40, %s6275_s18  ;;  %v2841_v40 = vsel %vm2824_vm8, %v2808_v28, %v7665_v23 }
 0x410   : > { %1790 = vrot.lane.b32.xlu0 %v1473_v53, %s6271_s16  ;;  %v2874_v18 = vsel %vm2857_vm10, %v2841_v40, %v2279_v29  ;;  %v2743_v29 = vsel %vm1122_vm2, %v7380_v9, %v7594_v42  ;;  %v1505_v42 = vld [vmem:[#allocation2 + $0x152] sm:$0xff] }
 0x411   : > { %v2409_v55 = vpop.permute.xlu1 %2408  ;;  %v2907_v4 = vsel %vm2890_vm9, %v2874_v18, %v2407_v45  ;;  %v2776_v12 = vsel %vm2758_vm6, %v2743_v29, %v7598_v48  ;;  %v7773_v45 = vld [vmem:[#allocation2 + $0x158] sm:$0xff]  ;;  %v7805_v29 = vld [vmem:[#allocation2 + $0x168] sm:$0xff] }
 0x412   : > { %v7745_v52 = vpop.permute.xlu0 %1902  ;;  %v2940_v0 = vsel %vm2923_vm11, %v2907_v4, %v2535_v13  ;;  %v2809_v13 = vsel %vm2791_vm7, %v2776_v12, %v7688_v1 }
 0x413   : > { %2422 = vrot.lane.b32.xlu1 %v7747_v19, %s6273_s26  ;;  %v2842_v17 = vsel %vm2824_vm8, %v2809_v13, %v2153_v60 }
 0x414   : > { %2042 = vrot.lane.b32.xlu0 %v7747_v19, %s6277_s17  ;;  %v2875_v9 = vsel %vm2857_vm10, %v2842_v17, %v2281_v31 }
 0x415   : > { %v7757_v36 = vpop.permute.xlu1 %2028  ;;  %v2908_v48 = vsel %vm2890_vm9, %v2875_v9, %v2409_v55 }
 0x416   : > { %v7760_v32 = vpop.f32.mrb[26].mxu1  ;;  %v2663_v63 = vpop.permute.xlu0 %2662 }
 0x417   : > { %v2973_v23 = vsel %vm2956_vm12, %v2940_v0, %v2663_v63  ;;  %1792 = vrot.lane.b32.xlu1 %v1474_v6, %s6271_s16  ;;  %v7764_v24 = vpop.f32.mrb[27].mxu1  ;;  %v1695_v0 = vld [vmem:[#allocation2 + $0x15a] sm:$0xff] }
 0x418   : > { %2550 = vrot.lane.b32.xlu0 %v1473_v53, %s6274_s12  ;;  %6079 = vmatprep.mubr.msk.f32.mxu1 %vm2996_vm13, %v2973_v23 }
 0x419   : > { %v2537_v43 = vpop.permute.xlu1 %2536 }
 0x41a   : > { %v2283_v38 = vpop.permute.xlu0 %2282  ;;  %v2941_v1 = vsel %vm2923_vm11, %v2908_v48, %v2537_v43 }
 0x41b   : > { %2424 = vrot.lane.b32.xlu1 %v7773_v45, %s6273_s26 }
 0x41c   : > { %2170 = vrot.lane.b32.xlu0 %v1473_v53, %s6279_s29 }
 0x41d   : > { %v2157_v41 = vpop.permute.xlu1 %2156 }
 0x41e   : > { %v2285_v28 = vpop.permute.xlu0 %2284 }
 0x41f   : > { %2044 = vrot.lane.b32.xlu1 %v7773_v45, %s6277_s17 }
 0x420   : > { %1918 = vrot.lane.b32.xlu0 %v1505_v42, %s6272_s21 }
 0x421   : > { %v2665_v40 = vpop.permute.xlu1 %2664 }
 0x422   : > { %v2974_v18 = vsel %vm2956_vm12, %v2941_v1, %v2665_v40  ;;  %v7788_v60 = vpop.permute.xlu0 %1778 }
 0x423   : > { %2552 = vrot.lane.b32.xlu1 %v1474_v6, %s6274_s12  ;;  %6080 = vmatmul.mubr.msk.f32.gmra.mrb[40].mxu1 %vm2996_vm13, %v2974_v18  ;;  %v7835_v18 = vld [vmem:[#allocation2 + $0x170] sm:$0xff] }
 0x424   : > { %2678 = vrot.lane.b32.xlu0 %v1505_v42, %s6275_s18 }
 0x425   : > { %v2411_v31 = vpop.permute.xlu1 %2410 }
 0x426   : > { %v7793_v53 = vpop.permute.xlu0 %2030 }
 0x427   : > { %2172 = vrot.lane.b32.xlu1 %v1474_v6, %s6279_s29  ;;  %v2744_v6 = vsel %vm1122_vm2, %v7418_v51, %v7649_v11 }
 0x428   : > { %2298 = vrot.lane.b32.xlu0 %v1505_v42, %s6280_s11  ;;  %v2777_v43 = vsel %vm2758_vm6, %v2744_v6, %v7676_v56  ;;  %v1475_v42 = vld [vmem:[#allocation2 + $0x169] sm:$0xff] }
 0x429   : > { %v7797_v55 = vpop.permute.xlu1 %1780  ;;  %v2810_v13 = vsel %vm2791_vm7, %v2777_v43, %v7724_v34 }
 0x42a   : > { %v2539_v4 = vpop.permute.xlu0 %2538  ;;  %v2843_v9 = vsel %vm2824_vm8, %v2810_v13, %v7734_v50 }
 0x42b   : > { %2680 = vrot.lane.b32.xlu1 %v1695_v0, %s6275_s18  ;;  %v2876_v51 = vsel %vm2857_vm10, %v2843_v9, %v2283_v38  ;;  %v2745_v38 = vsel %vm1122_vm2, %v7445_v35, %v7659_v59 }
 0x42c   : > { %2300 = vrot.lane.b32.xlu0 %v1695_v0, %s6280_s11  ;;  %v2909_v11 = vsel %vm2890_vm9, %v2876_v51, %v2411_v31  ;;  %v1476_v51 = vld [vmem:[#allocation2 + $0x171] sm:$0xff] }
 0x42d   : > { %v7801_v63 = vpop.permute.xlu1 %1908  ;;  %v2942_v48 = vsel %vm2923_vm11, %v2909_v11, %v2539_v4  ;;  %v2778_v4 = vsel %vm2758_vm6, %v2745_v38, %v7663_v3  ;;  %v1696_v11 = vld [vmem:[#allocation2 + $0x16a] sm:$0xff] }
 0x42e   : > { %v7803_v23 = vpop.permute.xlu0 %2158  ;;  %v2811_v6 = vsel %vm2791_vm7, %v2778_v4, %v7757_v36  ;;  %v1634_v4 = vld [vmem:[#allocation2 + $0x180] sm:$0xff] }
 0x42f   : > { %2426 = vrot.lane.b32.xlu1 %v7805_v29, %s6273_s26  ;;  %v2844_v43 = vsel %vm2824_vm8, %v2811_v6, %v2157_v41  ;;  %v2746_v6 = vsel %vm1122_vm2, %v7483_v25, %v7718_v39 }
 0x430   : > { %1920 = vrot.lane.b32.xlu0 %v1695_v0, %s6272_s21  ;;  %v2877_v35 = vsel %vm2857_vm10, %v2844_v43, %v2285_v28  ;;  %v2779_v43 = vsel %vm2758_vm6, %v2746_v6, %v7745_v52 }
 0x431   : > { %v2413_v12 = vpop.permute.xlu1 %2412 }
 0x432   : > { %v7817_v17 = vpop.permute.xlu0 %1906  ;;  %v2910_v59 = vsel %vm2890_vm9, %v2877_v35, %v2413_v12  ;;  %v1697_v12 = vld [vmem:[#allocation2 + $0x172] sm:$0xff]  ;;  %v2812_v35 = vsel %vm2791_vm7, %v2779_v43, %v7793_v53 }
 0x433   : > { %2046 = vrot.lane.b32.xlu1 %v7805_v29, %s6277_s17 }
 0x434   : > { %1794 = vrot.lane.b32.xlu0 %v1475_v42, %s6271_s16 }
 0x435   : > { %v7826_v56 = vpop.permute.xlu1 %2032 }
 0x436   : > { %v7829_v34 = vpop.f32.mrb[28].mxu1  ;;  %v2667_v1 = vpop.permute.xlu0 %2666 }
 0x437   : > { %v2975_v40 = vsel %vm2956_vm12, %v2942_v48, %v2667_v1  ;;  %2554 = vrot.lane.b32.xlu1 %v1475_v42, %s6274_s12  ;;  %v7833_v50 = vpop.f32.mrb[29].mxu1 }
 0x438   : > { %2428 = vrot.lane.b32.xlu0 %v7835_v18, %s6273_s26  ;;  %6082 = vmatprep.mubr.msk.f32.mxu1 %vm2996_vm13, %v2975_v40 }
 0x439   : > { %v2541_v31 = vpop.permute.xlu1 %2540 }
 0x43a   : > { %v2287_v0 = vpop.permute.xlu0 %2286  ;;  %v2943_v3 = vsel %vm2923_vm11, %v2910_v59, %v2541_v31 }
 0x43b   : > { %2174 = vrot.lane.b32.xlu1 %v1475_v42, %s6279_s29 }
 0x43c   : > { %2048 = vrot.lane.b32.xlu0 %v7835_v18, %s6277_s17 }
 0x43d   : > { %v2161_v13 = vpop.permute.xlu1 %2160 }
 0x43e   : > { %v2289_v9 = vpop.permute.xlu0 %2288 }
 0x43f   : > { %1796 = vrot.lane.b32.xlu1 %v1476_v51, %s6271_s16 }
 0x440   : > { %2556 = vrot.lane.b32.xlu0 %v1476_v51, %s6274_s12 }
 0x441   : > { %v2669_v36 = vpop.permute.xlu1 %2668 }
 0x442   : > { %v2976_v42 = vsel %vm2956_vm12, %v2943_v3, %v2669_v36  ;;  %v7857_v41 = vpop.permute.xlu0 %1782  ;;  %v2845_v3 = vsel %vm2824_vm8, %v2812_v35, %v7803_v23  ;;  %v1635_v36 = vld [vmem:[#allocation2 + $0x188] sm:$0xff] }
 0x443   : > { %2682 = vrot.lane.b32.xlu1 %v1696_v11, %s6275_s18  ;;  %6083 = vmatmul.mubr.msk.f32.gmra.mrb[42].mxu1 %vm2996_vm13, %v2976_v42  ;;  %v2878_v42 = vsel %vm2857_vm10, %v2845_v3, %v2287_v0  ;;  %v2747_v0 = vsel %vm1122_vm2, %v7510_v20, %v7728_v7  ;;  %v1667_v35 = vld [vmem:[#allocation2 + $0x189] sm:$0xff] }
 0x444   : > { %2176 = vrot.lane.b32.xlu0 %v1476_v51, %s6279_s29 }
 0x445   : > { %v2415_v28 = vpop.permute.xlu1 %2414 }
 0x446   : > { %v7862_v48 = vpop.permute.xlu0 %2034  ;;  %v2911_v25 = vsel %vm2890_vm9, %v2878_v42, %v2415_v28 }
 0x447   : > { %2302 = vrot.lane.b32.xlu1 %v1696_v11, %s6280_s11 }
 0x448   : > { %2684 = vrot.lane.b32.xlu0 %v1697_v12, %s6275_s18 }
 0x449   : > { %v7866_v1 = vpop.permute.xlu1 %1784 }
 0x44a   : > { %v2543_v40 = vpop.permute.xlu0 %2542 }
 0x44b   : > { %1922 = vrot.lane.b32.xlu1 %v1696_v11, %s6272_s21  ;;  %v2944_v52 = vsel %vm2923_vm11, %v2911_v25, %v2543_v40  ;;  %v2780_v40 = vsel %vm2758_vm6, %v2747_v0, %v7732_v27  ;;  %v1698_v25 = vld [vmem:[#allocation2 + $0x182] sm:$0xff] }
 0x44c   : > { %2304 = vrot.lane.b32.xlu0 %v1697_v12, %s6280_s11  ;;  %v2813_v43 = vsel %vm2791_vm7, %v2780_v40, %v7826_v56  ;;  %v2748_v40 = vsel %vm1122_vm2, %v7548_v44, %v7788_v60 }
 0x44d   : > { %v7870_v38 = vpop.permute.xlu1 %1912  ;;  %v2846_v3 = vsel %vm2824_vm8, %v2813_v43, %v2161_v13  ;;  %v1699_v13 = vld [vmem:[#allocation2 + $0x18a] sm:$0xff]  ;;  %v2781_v43 = vsel %vm2758_vm6, %v2748_v40, %v7817_v17 }
 0x44e   : > { %v2163_v31 = vpop.permute.xlu0 %2162  ;;  %v2879_v20 = vsel %vm2857_vm10, %v2846_v3, %v2289_v9  ;;  %v2814_v3 = vsel %vm2791_vm7, %v2781_v43, %v7862_v48  ;;  %v2749_v48 = vsel %vm1122_vm2, %v7575_v2, %v7797_v55 }
 0x44f   : > { %2430 = vrot.lane.b32.xlu1 %v1634_v4, %s6273_s26 }
 0x450   : > { %1924 = vrot.lane.b32.xlu0 %v1697_v12, %s6272_s21  ;;  %v1666_v12 = vld [vmem:[#allocation2 + $0x181] sm:$0xff] }
 0x451   : > { %v2417_v51 = vpop.permute.xlu1 %2416 }
 0x452   : > { %v7881_v59 = vpop.permute.xlu0 %1910  ;;  %v2912_v7 = vsel %vm2890_vm9, %v2879_v20, %v2417_v51  ;;  %v2847_v20 = vsel %vm2824_vm8, %v2814_v3, %v2163_v31 }
 0x453   : > { %2050 = vrot.lane.b32.xlu1 %v1634_v4, %s6277_s17 }
 0x454   : > { %2432 = vrot.lane.b32.xlu0 %v1635_v36, %s6273_s26 }
 0x455   : > { %v2037_v39 = vpop.permute.xlu1 %2036 }
 0x456   : > { %v7890_v11 = vpop.f32.mrb[30].mxu1  ;;  %v2671_v53 = vpop.permute.xlu0 %2670 }
 0x457   : > { %v2977_v6 = vsel %vm2956_vm12, %v2944_v52, %v2671_v53  ;;  %2558 = vrot.lane.b32.xlu1 %v1666_v12, %s6274_s12  ;;  %v7894_v23 = vpop.f32.mrb[31].mxu1 }
 0x458   : > { %2052 = vrot.lane.b32.xlu0 %v1635_v36, %s6277_s17  ;;  %6085 = vmatprep.mubr.msk.f32.mxu1 %vm2996_vm13, %v2977_v6 }
 0x459   : > { %v2545_v28 = vpop.permute.xlu1 %2544 }
 0x45a   : > { %v2291_v4 = vpop.permute.xlu0 %2290  ;;  %v2945_v27 = vsel %vm2923_vm11, %v2912_v7, %v2545_v28 }
 0x45b   : > { %2178 = vrot.lane.b32.xlu1 %v1666_v12, %s6279_s29  ;;  %v2880_v7 = vsel %vm2857_vm10, %v2847_v20, %v2291_v4  ;;  %v2782_v4 = vsel %vm2758_vm6, %v2749_v48, %v7801_v63 }
 0x45c   : > { %2560 = vrot.lane.b32.xlu0 %v1667_v35, %s6274_s12 }
 0x45d   : > { %v2165_v36 = vpop.permute.xlu1 %2164 }
 0x45e   : > { %v2293_v42 = vpop.permute.xlu0 %2292 }
 0x45f   : > { %2686 = vrot.lane.b32.xlu1 %v1698_v25, %s6275_s18 }
 0x460   : > { %2180 = vrot.lane.b32.xlu0 %v1667_v35, %s6279_s29 }
 0x461   : > { %v2673_v56 = vpop.permute.xlu1 %2672 }
 0x462   : > { %v2978_v52 = vsel %vm2956_vm12, %v2945_v27, %v2673_v56  ;;  %v7914_v53 = vpop.permute.xlu0 %1786 }
 0x463   : > { %2306 = vrot.lane.b32.xlu1 %v1698_v25, %s6280_s11  ;;  %6086 = vmatmul.mubr.msk.f32.gmra.mrb[44].mxu1 %vm2996_vm13, %v2978_v52 }
 0x464   : > { %2688 = vrot.lane.b32.xlu0 %v1699_v13, %s6275_s18  ;;  %s6281_s18 = smov 12  }
 0x465   : > { %v2419_v9 = vpop.permute.xlu1 %2418 }
 0x466   : > { %v2039_v12 = vpop.permute.xlu0 %2038  ;;  %v2913_v27 = vsel %vm2890_vm9, %v2880_v7, %v2419_v9 }
 0x467   : > { %2308 = vrot.lane.b32.xlu1 %v1699_v13, %s6280_s11 }
 0x469   : > { %v7920_v51 = vpop.permute.xlu1 %1788 }
 0x46a   : > { %v2547_v6 = vpop.permute.xlu0 %2546 }
 0x46b   : > { %v2946_v52 = vsel %vm2923_vm11, %v2913_v27, %v2547_v6  ;;  %v2815_v6 = vsel %vm2791_vm7, %v2782_v4, %v2037_v39 }
 0x46c   : > { %v2848_v40 = vsel %vm2824_vm8, %v2815_v6, %v2165_v36 }
 0x46d   : > { %v7922_v0 = vpop.permute.xlu1 %1916  ;;  %v2881_v20 = vsel %vm2857_vm10, %v2848_v40, %v2293_v42  ;;  %v2750_v42 = vsel %vm1122_vm2, %v7613_v58, %v7857_v41 }
 0x46e   : > { %v2167_v28 = vpop.permute.xlu0 %2166 }
 0x471   : > { %v2421_v35 = vpop.permute.xlu1 %2420 }
 0x472   : > { %v7931_v25 = vpop.permute.xlu0 %1914  ;;  %v2914_v7 = vsel %vm2890_vm9, %v2881_v20, %v2421_v35  ;;  %v2783_v35 = vsel %vm2758_vm6, %v2750_v42, %v7881_v59 }
 0x473   : > { %v2816_v4 = vsel %vm2791_vm7, %v2783_v35, %v2039_v12 }
 0x474   : > { %v2849_v40 = vsel %vm2824_vm8, %v2816_v4, %v2167_v28 }
 0x475   : > { %v2041_v56 = vpop.permute.xlu1 %2040 }
 0x476   : > { %v7937_v13 = vpop.f32.mrb[32].mxu1  ;;  %v2675_v44 = vpop.permute.xlu0 %2674 }
 0x477   : > { %v2979_v60 = vsel %vm2956_vm12, %v2946_v52, %v2675_v44  ;;  %v7940_v17 = vpop.f32.mrb[33].mxu1 }
 0x478   : > { %6088 = vmatprep.mubr.msk.f32.mxu1 %vm2996_vm13, %v2979_v60 }
 0x479   : > { %v2549_v31 = vpop.permute.xlu1 %2548 }
 0x47a   : > { %v2295_v9 = vpop.permute.xlu0 %2294  ;;  %v2947_v27 = vsel %vm2923_vm11, %v2914_v7, %v2549_v31  ;;  %v2751_v7 = vsel %vm1122_vm2, %v7640_v16, %v7866_v1 }
 0x47b   : > { %v2882_v20 = vsel %vm2857_vm10, %v2849_v40, %v2295_v9  ;;  %v2784_v58 = vsel %vm2758_vm6, %v2751_v7, %v7870_v38 }
 0x47d   : > { %v2169_v43 = vpop.permute.xlu1 %2168 }
 0x47e   : > { %v2297_v3 = vpop.permute.xlu0 %2296 }
 0x481   : > { %v2677_v52 = vpop.permute.xlu1 %2676 }
 0x482   : > { %v2980_v2 = vsel %vm2956_vm12, %v2947_v27, %v2677_v52  ;;  %v7954_v55 = vpop.permute.xlu0 %1790 }
 0x483   : > { %6089 = vmatmul.mubr.msk.f32.gmra.mrb[46].mxu1 %vm2996_vm13, %v2980_v2  ;;  %v2817_v2 = vsel %vm2791_vm7, %v2784_v58, %v2041_v56 }
 0x484   : > { %v2850_v42 = vsel %vm2824_vm8, %v2817_v2, %v2169_v43 }
 0x485   : > { %v2423_v63 = vpop.permute.xlu1 %2422 }
 0x486   : > { %v2043_v44 = vpop.permute.xlu0 %2042  ;;  %v2915_v27 = vsel %vm2890_vm9, %v2882_v20, %v2423_v63  ;;  %v2883_v63 = vsel %vm2857_vm10, %v2850_v42, %v2297_v3  ;;  %v2752_v3 = vsel %vm1122_vm2, %v7678_v10, %v7914_v53 }
 0x489   : > { %v7957_v39 = vpop.permute.xlu1 %1792 }
 0x48a   : > { %v2551_v36 = vpop.permute.xlu0 %2550 }
 0x48b   : > { %v2948_v41 = vsel %vm2923_vm11, %v2915_v27, %v2551_v36 }
 0x48d   : > { %v2425_v60 = vpop.permute.xlu1 %2424 }
 0x48e   : > { %v2171_v48 = vpop.permute.xlu0 %2170  ;;  %v2916_v38 = vsel %vm2890_vm9, %v2883_v63, %v2425_v60  ;;  %v2785_v60 = vsel %vm2758_vm6, %v2752_v3, %v7931_v25 }
 0x491   : > { %v2045_v31 = vpop.permute.xlu1 %2044 }
 0x492   : > { %v7965_v6 = vpop.permute.xlu0 %1918 }
 0x495   : > { %v2553_v52 = vpop.permute.xlu1 %2552 }
 0x496   : > { %v7976_v59 = vpop.f32.mrb[34].mxu1  ;;  %v2679_v12 = vpop.permute.xlu0 %2678  ;;  %v2949_v36 = vsel %vm2923_vm11, %v2916_v38, %v2553_v52  ;;  %v2818_v52 = vsel %vm2791_vm7, %v2785_v60, %v2043_v44  ;;  %v2753_v38 = vsel %vm1122_vm2, %v7709_v22, %v7920_v51 }
 0x497   : > { %v2981_v28 = vsel %vm2956_vm12, %v2948_v41, %v2679_v12  ;;  %v7980_v9 = vpop.f32.mrb[35].mxu1  ;;  %v2786_v10 = vsel %vm2758_vm6, %v2753_v38, %v7922_v0 }
 0x498   : > { %6091 = vmatprep.mubr.msk.f32.mxu1 %vm2996_vm13, %v2981_v28  ;;  %v2851_v28 = vsel %vm2824_vm8, %v2818_v52, %v2171_v48  ;;  %v2819_v44 = vsel %vm2791_vm7, %v2786_v10, %v2045_v31 }
 0x499   : > { %v2173_v16 = vpop.permute.xlu1 %2172 }
 0x49a   : > { %v2299_v1 = vpop.permute.xlu0 %2298 }
 0x49b   : > { %v2884_v63 = vsel %vm2857_vm10, %v2851_v28, %v2299_v1  ;;  %v2852_v1 = vsel %vm2824_vm8, %v2819_v44, %v2173_v16 }
 0x49d   : > { %v2681_v35 = vpop.permute.xlu1 %2680 }
 0x49e   : > { %v2982_v4 = vsel %vm2956_vm12, %v2949_v36, %v2681_v35  ;;  %v2301_v56 = vpop.permute.xlu0 %2300 }
 0x49f   : > { %6092 = vmatmul.mubr.msk.f32.gmra.mrb[48].mxu1 %vm2996_vm13, %v2982_v4  ;;  %v2885_v22 = vsel %vm2857_vm10, %v2852_v1, %v2301_v56  ;;  %v2754_v56 = vsel %vm1122_vm2, %v7747_v19, %v7954_v55  ;;  %v2755_v1 = vsel %vm1122_vm2, %v7773_v45, %v7957_v39 }
 0x4a1   : > { %v2427_v40 = vpop.permute.xlu1 %2426 }
 0x4a2   : > { %v1921_v20 = vpop.permute.xlu0 %1920  ;;  %v2917_v36 = vsel %vm2890_vm9, %v2884_v63, %v2427_v40 }
 0x4a5   : > { %v2047_v7 = vpop.permute.xlu1 %2046 }
 0x4a6   : > { %v1795_v43 = vpop.permute.xlu0 %1794 }
 0x4a9   : > { %v2555_v27 = vpop.permute.xlu1 %2554 }
 0x4aa   : > { %v2429_v58 = vpop.permute.xlu0 %2428  ;;  %v2950_v53 = vsel %vm2923_vm11, %v2917_v36, %v2555_v27 }
 0x4ab   : > { %v2918_v51 = vsel %vm2890_vm9, %v2885_v22, %v2429_v58  ;;  %v2787_v58 = vsel %vm2758_vm6, %v2754_v56, %v7965_v6  ;;  %v2756_v6 = vsel %vm1122_vm2, %v7805_v29, %v1795_v43 }
 0x4ad   : > { %v2175_v41 = vpop.permute.xlu1 %2174 }
 0x4ae   : > { %v2049_v12 = vpop.permute.xlu0 %2048 }
 0x4b1   : > { %v1797_v2 = vpop.permute.xlu1 %1796 }
 0x4b2   : > { %v2557_v42 = vpop.permute.xlu0 %2556  ;;  %v2757_v43 = vsel %vm1122_vm2, %v7835_v18, %v1797_v2 }
 0x4b3   : > { %v2951_v40 = vsel %vm2923_vm11, %v2918_v51, %v2557_v42  ;;  %v2820_v42 = vsel %vm2791_vm7, %v2787_v58, %v2047_v7  ;;  %v2788_v51 = vsel %vm2758_vm6, %v2755_v1, %v1921_v20 }
 0x4b4   : > { %v2821_v7 = vsel %vm2791_vm7, %v2788_v51, %v2049_v12 }
 0x4b5   : > { %v2683_v25 = vpop.permute.xlu1 %2682 }
 0x4b6   : > { %v2983_v35 = vsel %vm2956_vm12, %v2950_v53, %v2683_v25  ;;  %v8006_v48 = vpop.f32.mrb[36].mxu1  ;;  %v2177_v4 = vpop.permute.xlu0 %2176  ;;  %v2853_v25 = vsel %vm2824_vm8, %v2820_v42, %v2175_v41 }
 0x4b7   : > { %v8009_v3 = vpop.f32.mrb[37].mxu1  ;;  %6094 = vmatprep.mubr.msk.f32.mxu1 %vm2996_vm13, %v2983_v35 }
 0x4b9   : > { %v2303_v0 = vpop.permute.xlu1 %2302 }
 0x4ba   : > { %v2685_v27 = vpop.permute.xlu0 %2684  ;;  %v2886_v35 = vsel %vm2857_vm10, %v2853_v25, %v2303_v0  ;;  %v2854_v0 = vsel %vm2824_vm8, %v2821_v7, %v2177_v4 }
 0x4bb   : > { %v2984_v31 = vsel %vm2956_vm12, %v2951_v40, %v2685_v27 }
 0x4bc   : > { %6095 = vmatmul.mubr.msk.f32.gmra.mrb[50].mxu1 %vm2996_vm13, %v2984_v31 }
 0x4bd   : > { %v1923_v60 = vpop.permute.xlu1 %1922 }
 0x4be   : > { %v2305_v52 = vpop.permute.xlu0 %2304  ;;  %v2789_v27 = vsel %vm2758_vm6, %v2756_v6, %v1923_v60 }
 0x4bf   : > { %v2887_v45 = vsel %vm2857_vm10, %v2854_v0, %v2305_v52 }
 0x4c1   : > { %v2431_v28 = vpop.permute.xlu1 %2430 }
 0x4c2   : > { %v1925_v16 = vpop.permute.xlu0 %1924  ;;  %v2919_v22 = vsel %vm2890_vm9, %v2886_v35, %v2431_v28 }
 0x4c5   : > { %v2051_v63 = vpop.permute.xlu1 %2050 }
 0x4c6   : > { %v2433_v38 = vpop.permute.xlu0 %2432  ;;  %v2822_v39 = vsel %vm2791_vm7, %v2789_v27, %v2051_v63 }
 0x4c7   : > { %v2920_v20 = vsel %vm2890_vm9, %v2887_v45, %v2433_v38 }
 0x4c9   : > { %v2559_v36 = vpop.permute.xlu1 %2558 }
 0x4ca   : > { %v2053_v10 = vpop.permute.xlu0 %2052  ;;  %v2952_v19 = vsel %vm2923_vm11, %v2919_v22, %v2559_v36  ;;  %v2790_v36 = vsel %vm2758_vm6, %v2757_v43, %v1925_v16 }
 0x4cb   : > { %v2823_v56 = vsel %vm2791_vm7, %v2790_v36, %v2053_v10 }
 0x4cd   : > { %v2179_v53 = vpop.permute.xlu1 %2178 }
 0x4ce   : > { %v2561_v44 = vpop.permute.xlu0 %2560  ;;  %v2855_v31 = vsel %vm2824_vm8, %v2822_v39, %v2179_v53 }
 0x4cf   : > { %v2953_v12 = vsel %vm2923_vm11, %v2920_v20, %v2561_v44 }
 0x4d1   : > { %v2687_v55 = vpop.permute.xlu1 %2686 }
 0x4d2   : > { %v2985_v41 = vsel %vm2956_vm12, %v2952_v19, %v2687_v55  ;;  %v2181_v40 = vpop.permute.xlu0 %2180 }
 0x4d3   : > { %6097 = vmatprep.mubr.msk.f32.mxu1 %vm2996_vm13, %v2985_v41  ;;  %v2856_v2 = vsel %vm2824_vm8, %v2823_v56, %v2181_v40 }
 0x4d5   : > { %v2307_v29 = vpop.permute.xlu1 %2306 }
 0x4d6   : > { %v2888_v4 = vsel %vm2857_vm10, %v2855_v31, %v2307_v29  ;;  %v8046_v28 = vpop.f32.mrb[38].mxu1  ;;  %v2689_v60 = vpop.permute.xlu0 %2688 }
 0x4d7   : > { %v2921_v52 = vsel %vm2890_vm9, %v2888_v4, %v6944_v37  ;;  %v2986_v63 = vsel %vm2956_vm12, %v2953_v12, %v2689_v60  ;;  %v3229_v38 = vpop.f32.mrb[39].mxu1 }
 0x4d8   : > { %6098 = vmatmul.mubr.msk.f32.gmra.mrb[52].mxu1 %vm2996_vm13, %v2986_v63  ;;  %v2954_v18 = vsel %vm2923_vm11, %v2921_v52, %v6955_v46 }
 0x4d9   : > { %v2309_v58 = vpop.permute.xlu1 %2308  ;;  %v2987_v42 = vsel %vm2956_vm12, %v2954_v18, %v6964_v54 }
 0x4da   : > { %v2889_v16 = vsel %vm2857_vm10, %v2856_v2, %v2309_v58  ;;  %6100 = vmatprep.mubr.msk.f32.mxu1 %vm2996_vm13, %v2987_v42 }
 0x4db   : > { %v2922_v37 = vsel %vm2890_vm9, %v2889_v16, %v6958_v47  ;;  %v8075_v47 = vld [vmem:[%s9593_s6] ss:$0 sm:$0xff] }
 0x4dc   : > { %v2955_v10 = vsel %vm2923_vm11, %v2922_v37, %v6969_v57  ;;  %v8079_v57 = vadd.f32 %v7691_v30, %v8075_v47  ;;  %v8087_v22 = vadd.f32 %v8075_v47, %v7764_v24  ;;  %v8097_v30 = vadd.f32 %v7760_v32, %v8075_v47 }
 0x4dd   : > { %v2988_v53 = vsel %vm2956_vm12, %v2955_v10, %v6976_v62  ;;  %v8083_v62 = vadd.f32 %v8075_v47, %v7695_v49  ;;  %v8101_v49 = vadd.f32 %v8075_v47, %v7833_v50  ;;  %v8109_v0 = vadd.f32 %v7829_v34, %v8075_v47 }
 0x4de   : > { %6101 = vmatmul.mubr.msk.f32.gmra.mrb[54].mxu1 %vm2996_vm13, %v2988_v53  ;;  %v3319_v51 = vsel %vm362_vm1, %v8079_v57, 0.0  ;;  %v3321_v55 = vsel %vm362_vm1, %v8087_v22, 0.0  ;;  %v3323_v7 = vsel %vm362_vm1, %v8097_v30, 0.0  ;;  %v8113_v32 = vadd.f32 %v8075_v47, %v7894_v23 }
 0x4df   : > { %v3318_v19 = vsel %vm362_vm1, %v8083_v62, 0.0  ;;  %v3325_v41 = vsel %vm362_vm1, %v8101_v49, 0.0  ;;  %v3327_v50 = vsel %vm362_vm1, %v8109_v0, 0.0  ;;  %v8121_v31 = vadd.f32 %v7890_v11, %v8075_v47 }
 0x4e0   : > { %v3320_v6 = vadd.f32 %v3319_v51, %v3318_v19  ;;  %v3329_v45 = vsel %vm362_vm1, %v8113_v32, 0.0  ;;  %v8125_v34 = vadd.f32 %v8075_v47, %v7940_v17  ;;  %v8133_v60 = vadd.f32 %v7937_v13, %v8075_v47 }
 0x4e1   : > { %v3331_v43 = vsel %vm362_vm1, %v8121_v31, 0.0  ;;  %v8137_v11 = vadd.f32 %v8075_v47, %v7980_v9  ;;  %v8145_v56 = vadd.f32 %v7976_v59, %v8075_v47  ;;  %v8149_v13 = vadd.f32 %v8075_v47, %v8009_v3 }
 0x4e2   : > { %v3322_v24 = vadd.f32 %v3321_v55, %v3320_v6  ;;  %v3333_v12 = vsel %vm362_vm1, %v8125_v34, 0.0  ;;  %v3335_v17 = vsel %vm362_vm1, %v8133_v60, 0.0  ;;  %v8157_v42 = vadd.f32 %v8006_v48, %v8075_v47 }
 0x4e3   : > { %v3337_v52 = vsel %vm362_vm1, %v8137_v11, 0.0  ;;  %v3339_v9 = vsel %vm362_vm1, %v8145_v56, 0.0  ;;  %v3341_v2 = vsel %vm362_vm1, %v8149_v13, 0.0  ;;  %v8160_v16 = vadd.f32 %v8075_v47, %v3229_v38 }
 0x4e4   : > { %v3324_v40 = vadd.f32 %v3323_v7, %v3322_v24  ;;  %v3343_v3 = vsel %vm362_vm1, %v8157_v42, 0.0  ;;  %v8168_v53 = vadd.f32 %v8046_v28, %v8075_v47 }
 0x4e5   : > { %v3345_v37 = vsel %vm362_vm1, %v8160_v16, 0.0 }
 0x4e6   : > { %v3326_v27 = vadd.f32 %v3325_v41, %v3324_v40  ;;  %v3347_v38 = vsel %vm362_vm1, %v8168_v53, 0.0 }
 0x4e8   : > { %v3328_v39 = vadd.f32 %v3327_v50, %v3326_v27 }
 0x4ea   : > { %v3330_v23 = vadd.f32 %v3329_v45, %v3328_v39 }
 0x4ec   : > { %v3332_v4 = vadd.f32 %v3331_v43, %v3330_v23 }
 0x4ee   : > { %v3334_v36 = vadd.f32 %v3333_v12, %v3332_v4 }
 0x4f0   : > { %v3336_v63 = vadd.f32 %v3335_v17, %v3334_v36 }
 0x4f2   : > { %v3338_v18 = vadd.f32 %v3337_v52, %v3336_v63 }
 0x4f4   : > { %v3340_v58 = vadd.f32 %v3339_v9, %v3338_v18 }
 0x4f6   : > { %v6081_v46 = vpop.f32.mrb[40].mxu1  ;;  %v3342_v59 = vadd.f32 %v3341_v2, %v3340_v58 }
 0x4f7   : > { %v3239_v25 = vpop.f32.mrb[41].mxu1  ;;  %v8178_v7 = vadd.f32 %v6081_v46, %v8075_v47 }
 0x4f8   : > { %v3344_v10 = vadd.f32 %v3343_v3, %v3342_v59  ;;  %v8171_v51 = vadd.f32 %v8075_v47, %v3239_v25 }
 0x4f9   : > { %v3351_v25 = vsel %vm362_vm1, %v8178_v7, 0.0 }
 0x4fa   : > { %v3346_v48 = vadd.f32 %v3345_v37, %v3344_v10  ;;  %v3349_v55 = vsel %vm362_vm1, %v8171_v51, 0.0 }
 0x4fc   : > { %v3348_v24 = vadd.f32 %v3347_v38, %v3346_v48 }
 0x4fe   : > { %v3350_v28 = vadd.f32 %v3349_v55, %v3348_v24 }
 0x500   : > { %v3352_v27 = vadd.f32 %v3351_v25, %v3350_v28 }
 0x516   : > { %v8068_v44 = vpop.f32.mrb[42].mxu1 }
 0x517   : > { %v3249_v54 = vpop.f32.mrb[43].mxu1  ;;  %v8189_v50 = vadd.f32 %v8068_v44, %v8075_v47 }
 0x518   : > { %v8181_v41 = vadd.f32 %v8075_v47, %v3249_v54 }
 0x519   : > { %v3355_v54 = vsel %vm362_vm1, %v8189_v50, 0.0 }
 0x51a   : > { %v3353_v40 = vsel %vm362_vm1, %v8181_v41, 0.0 }
 0x51b   : > { %v3354_v46 = vadd.f32 %v3353_v40, %v3352_v27 }
 0x51d   : > { %v3356_v23 = vadd.f32 %v3355_v54, %v3354_v46 }
 0x536   : > { %v8070_v35 = vpop.f32.mrb[44].mxu1 }
 0x537   : > { %v3259_v1 = vpop.f32.mrb[45].mxu1  ;;  %v8200_v43 = vadd.f32 %v8070_v35, %v8075_v47 }
 0x538   : > { %v8192_v45 = vadd.f32 %v8075_v47, %v3259_v1 }
 0x539   : > { %v3359_v1 = vsel %vm362_vm1, %v8200_v43, 0.0 }
 0x53a   : > { %v3357_v39 = vsel %vm362_vm1, %v8192_v45, 0.0 }
 0x53b   : > { %v3358_v44 = vadd.f32 %v3357_v39, %v3356_v23 }
 0x53d   : > { %v3360_v36 = vadd.f32 %v3359_v1, %v3358_v44 }
 0x556   : > { %v6090_v20 = vpop.f32.mrb[46].mxu1 }
 0x557   : > { %v3269_v29 = vpop.f32.mrb[47].mxu1  ;;  %v8210_v17 = vadd.f32 %v6090_v20, %v8075_v47 }
 0x558   : > { %v8203_v12 = vadd.f32 %v8075_v47, %v3269_v29 }
 0x559   : > { %v3363_v35 = vsel %vm362_vm1, %v8210_v17, 0.0 }
 0x55a   : > { %v3361_v4 = vsel %vm362_vm1, %v8203_v12, 0.0 }
 0x55b   : > { %v3362_v63 = vadd.f32 %v3361_v4, %v3360_v36 }
 0x55d   : > { %v3364_v18 = vadd.f32 %v3363_v35, %v3362_v63 }
 0x572   : > { %v6093_v19 = vpop.f32.mrb[48].mxu1 }
 0x573   : > { %v3279_v6 = vpop.f32.mrb[49].mxu1  ;;  %v8220_v9 = vadd.f32 %v6093_v19, %v8075_v47 }
 0x574   : > { %v8213_v52 = vadd.f32 %v8075_v47, %v3279_v6 }
 0x575   : > { %v3367_v20 = vsel %vm362_vm1, %v8220_v9, 0.0 }
 0x576   : > { %v3365_v29 = vsel %vm362_vm1, %v8213_v52, 0.0 }
 0x577   : > { %v3366_v2 = vadd.f32 %v3365_v29, %v3364_v18 }
 0x579   : > { %v3368_v10 = vadd.f32 %v3367_v20, %v3366_v2 }
 0x58f   : > { %v6096_v58 = vpop.f32.mrb[50].mxu1 }
 0x590   : > { %v3289_v59 = vpop.f32.mrb[51].mxu1  ;;  %v3295_v3 = vadd.f32 %v6096_v58, %v8075_v47 }
 0x591   : > { %v3290_v37 = vadd.f32 %v8075_v47, %v3289_v59 }
 0x592   : > { %v3371_v55 = vsel %vm362_vm1, %v3295_v3, 0.0 }
 0x593   : > { %v3369_v48 = vsel %vm362_vm1, %v3290_v37, 0.0 }
 0x594   : > { %v3370_v38 = vadd.f32 %v3369_v48, %v3368_v10 }
 0x596   : > { %v3372_v6 = vadd.f32 %v3371_v55, %v3370_v38 }
 0x5ab   : > { %v6099_v24 = vpop.f32.mrb[52].mxu1 }
 0x5ac   : > { %v3299_v19 = vpop.f32.mrb[53].mxu1  ;;  %v3305_v28 = vadd.f32 %v6099_v24, %v8075_v47 }
 0x5ad   : > { %v3300_v25 = vadd.f32 %v8075_v47, %v3299_v19 }
 0x5ae   : > { %v3375_v46 = vsel %vm362_vm1, %v3305_v28, 0.0 }
 0x5af   : > { %v3373_v40 = vsel %vm362_vm1, %v3300_v25, 0.0 }
 0x5b0   : > { %v3374_v27 = vadd.f32 %v3373_v40, %v3372_v6 }
 0x5b1   : > { %v6102_v54 = vpop.f32.mrb[54].mxu1 }
 0x5b2   : > { %v3309_v39 = vpop.f32.mrb[55].mxu1  ;;  %v3376_v23 = vadd.f32 %v3375_v46, %v3374_v27  ;;  %v3315_v44 = vadd.f32 %v6102_v54, %v8075_v47 }
 0x5b3   : > { %v3310_v1 = vadd.f32 %v8075_v47, %v3309_v39 }
 0x5b4   : > { %v3379_v63 = vsel %vm362_vm1, %v3315_v44, 0.0 }
 0x5b5   : > { %v3377_v4 = vsel %vm362_vm1, %v3310_v1, 0.0 }
 0x5b6   : > { %v3378_v36 = vadd.f32 %v3377_v4, %v3376_v23 }
 0x5b8   : > { %v3380_v35 = vadd.f32 %v3379_v63, %v3378_v36 }
 0x5ba   : > { %v3381_v29 = vrot.slane %v3380_v35, 4 }
 0x5bc   : > { %v3382_v18 = vadd.f32 %v3381_v29, %v3380_v35 }
 0x5be   : > { %v3383_v2 = vrot.slane %v3382_v18, 2 }
 0x5c0   : > { %v3384_v58 = vadd.f32 %v3383_v2, %v3382_v18 }
 0x5c2   : > { %v3385_v59 = vrot.slane %v3384_v58, 1 }
 0x5c4   : > { %v3386_v20 = vadd.f32 %v3385_v59, %v3384_v58 }
 0x5c6   : > { %v8236_v10 = vmul.f32 0.00390625, %v3386_v20 }
 0x5c8   : > { %v8239_v48 = vsub.f32 %v3290_v37, %v8236_v10  ;;  %v8242_v38 = vsub.f32 %v3295_v3, %v8236_v10  ;;  %v8245_v47 = vsub.f32 %v3300_v25, %v8236_v10  ;;  %v8248_v55 = vsub.f32 %v3305_v28, %v8236_v10 }
 0x5c9   : > { %v8251_v6 = vsub.f32 %v3310_v1, %v8236_v10  ;;  %v8254_v24 = vsub.f32 %v3315_v44, %v8236_v10  ;;  %v8258_v19 = vsub.f32 %v8083_v62, %v8236_v10  ;;  %v8262_v3 = vsub.f32 %v8079_v57, %v8236_v10 }
 0x5ca   : > { %v8266_v37 = vsub.f32 %v8087_v22, %v8236_v10  ;;  %v8270_v28 = vsub.f32 %v8097_v30, %v8236_v10  ;;  %v8278_v62 = vsub.f32 %v8101_v49, %v8236_v10  ;;  %v8284_v22 = vsub.f32 %v8109_v0, %v8236_v10 }
 0x5cb   : > { %v3421_v25 = vmul.f32 %v8258_v19, %v8258_v19  ;;  %v3422_v40 = vmul.f32 %v8262_v3, %v8262_v3  ;;  %v8292_v39 = vsub.f32 %v8113_v32, %v8236_v10  ;;  %v8299_v0 = vsub.f32 %v8121_v31, %v8236_v10 }
 0x5cc   : > { %v3423_v57 = vmul.f32 %v8266_v37, %v8266_v37  ;;  %v3424_v30 = vmul.f32 %v8270_v28, %v8270_v28  ;;  %v3425_v49 = vmul.f32 %v8278_v62, %v8278_v62  ;;  %v3426_v1 = vmul.f32 %v8284_v22, %v8284_v22 }
 0x5cd   : > { %v3453_v27 = vsel %vm362_vm1, %v3421_v25, 0.0  ;;  %v3454_v46 = vsel %vm362_vm1, %v3422_v40, 0.0  ;;  %v8306_v32 = vsub.f32 %v8125_v34, %v8236_v10  ;;  %v3427_v63 = vmul.f32 %v8292_v39, %v8292_v39 }
 0x5ce   : > { %v3455_v54 = vadd.f32 %v3454_v46, %v3453_v27  ;;  %v3456_v23 = vsel %vm362_vm1, %v3423_v57, 0.0  ;;  %v3458_v4 = vsel %vm362_vm1, %v3424_v30, 0.0  ;;  %v3460_v35 = vsel %vm362_vm1, %v3425_v49, 0.0 }
 0x5cf   : > { %v8313_v31 = vsub.f32 %v8133_v60, %v8236_v10  ;;  %v3428_v18 = vmul.f32 %v8299_v0, %v8299_v0  ;;  %v3462_v2 = vsel %vm362_vm1, %v3426_v1, 0.0  ;;  %v8320_v34 = vsub.f32 %v8137_v11, %v8236_v10 }
 0x5d0   : > { %v3457_v44 = vadd.f32 %v3456_v23, %v3455_v54  ;;  %v3429_v59 = vmul.f32 %v8306_v32, %v8306_v32  ;;  %v3464_v20 = vsel %vm362_vm1, %v3427_v63, 0.0  ;;  %v8327_v60 = vsub.f32 %v8145_v56, %v8236_v10 }
 0x5d1   : > { %v3430_v40 = vmul.f32 %v8313_v31, %v8313_v31  ;;  %v3466_v57 = vsel %vm362_vm1, %v3428_v18, 0.0  ;;  %v8334_v11 = vsub.f32 %v8149_v13, %v8236_v10  ;;  %v3431_v27 = vmul.f32 %v8320_v34, %v8320_v34 }
 0x5d2   : > { %v3459_v36 = vadd.f32 %v3458_v4, %v3457_v44  ;;  %v3468_v46 = vsel %vm362_vm1, %v3429_v59, 0.0  ;;  %v8341_v56 = vsub.f32 %v8157_v42, %v8236_v10  ;;  %v3432_v49 = vmul.f32 %v8327_v60, %v8327_v60 }
 0x5d3   : > { %v3470_v23 = vsel %vm362_vm1, %v3430_v40, 0.0  ;;  %v8348_v13 = vsub.f32 %v8160_v16, %v8236_v10  ;;  %v3433_v1 = vmul.f32 %v8334_v11, %v8334_v11  ;;  %v3472_v4 = vsel %vm362_vm1, %v3431_v27, 0.0 }
 0x5d4   : > { %v3461_v29 = vadd.f32 %v3460_v35, %v3459_v36  ;;  %v8355_v42 = vsub.f32 %v8168_v53, %v8236_v10  ;;  %v3434_v63 = vmul.f32 %v8341_v56, %v8341_v56  ;;  %v3474_v35 = vsel %vm362_vm1, %v3432_v49, 0.0 }
 0x5d5   : > { %v8362_v16 = vsub.f32 %v8171_v51, %v8236_v10  ;;  %v3435_v18 = vmul.f32 %v8348_v13, %v8348_v13  ;;  %v8369_v53 = vsub.f32 %v8178_v7, %v8236_v10  ;;  %v8376_v51 = vsub.f32 %v8181_v41, %v8236_v10 }
 0x5d6   : > { %v3463_v58 = vadd.f32 %v3462_v2, %v3461_v29  ;;  %v3476_v2 = vsel %vm362_vm1, %v3433_v1, 0.0  ;;  %v3436_v59 = vmul.f32 %v8355_v42, %v8355_v42  ;;  %v8383_v7 = vsub.f32 %v8189_v50, %v8236_v10 }
 0x5d7   : > { %v3437_v40 = vmul.f32 %v8362_v16, %v8362_v16  ;;  %v3438_v27 = vmul.f32 %v8369_v53, %v8369_v53  ;;  %v8390_v41 = vsub.f32 %v8192_v45, %v8236_v10  ;;  %v3439_v49 = vmul.f32 %v8376_v51, %v8376_v51 }
 0x5d8   : > { %v3465_v25 = vadd.f32 %v3464_v20, %v3463_v58  ;;  %v3478_v20 = vsel %vm362_vm1, %v3434_v63, 0.0  ;;  %v8397_v50 = vsub.f32 %v8200_v43, %v8236_v10  ;;  %v3440_v1 = vmul.f32 %v8383_v7, %v8383_v7 }
 0x5d9   : > { %v8404_v45 = vsub.f32 %v8203_v12, %v8236_v10  ;;  %v3441_v63 = vmul.f32 %v8390_v41, %v8390_v41  ;;  %v8411_v43 = vsub.f32 %v8210_v17, %v8236_v10  ;;  %v8418_v12 = vsub.f32 %v8213_v52, %v8236_v10 }
 0x5da   : > { %v3467_v30 = vadd.f32 %v3466_v57, %v3465_v25  ;;  %v3480_v57 = vsel %vm362_vm1, %v3435_v18, 0.0  ;;  %v3442_v18 = vmul.f32 %v8397_v50, %v8397_v50  ;;  %v8425_v17 = vsub.f32 %v8220_v9, %v8236_v10 }
 0x5db   : > { %v3445_v52 = vmul.f32 %v8418_v12, %v8418_v12  ;;  %v3447_v9 = vmul.f32 %v8239_v48, %v8239_v48 }
 0x5dc   : > { %v3469_v54 = vadd.f32 %v3468_v46, %v3467_v30  ;;  %v3482_v46 = vsel %vm362_vm1, %v3436_v59, 0.0  ;;  %v3443_v59 = vmul.f32 %v8404_v45, %v8404_v45 }
 0x5dd   : > { %v3500_v10 = vsel %vm362_vm1, %v3445_v52, 0.0 }
 0x5de   : > { %v3471_v44 = vadd.f32 %v3470_v23, %v3469_v54  ;;  %v3484_v23 = vsel %vm362_vm1, %v3437_v40, 0.0  ;;  %v3444_v40 = vmul.f32 %v8411_v43, %v8411_v43 }
 0x5e0   : > { %v3473_v36 = vadd.f32 %v3472_v4, %v3471_v44  ;;  %v3486_v4 = vsel %vm362_vm1, %v3438_v27, 0.0  ;;  %v3496_v27 = vsel %vm362_vm1, %v3443_v59, 0.0  ;;  %v3451_v59 = vmul.f32 %v8251_v6, %v8251_v6 }
 0x5e2   : > { %v3475_v29 = vadd.f32 %v3474_v35, %v3473_v36  ;;  %v3488_v35 = vsel %vm362_vm1, %v3439_v49, 0.0  ;;  %v3498_v49 = vsel %vm362_vm1, %v3444_v40, 0.0  ;;  %v3452_v40 = vmul.f32 %v8254_v24, %v8254_v24 }
 0x5e3   : > { %v3512_v52 = vsel %vm362_vm1, %v3451_v59, 0.0 }
 0x5e4   : > { %v3477_v58 = vadd.f32 %v3476_v2, %v3475_v29  ;;  %v3490_v2 = vsel %vm362_vm1, %v3440_v1, 0.0  ;;  %v3448_v1 = vmul.f32 %v8242_v38, %v8242_v38 }
 0x5e6   : > { %v3479_v25 = vadd.f32 %v3478_v20, %v3477_v58  ;;  %v3492_v20 = vsel %vm362_vm1, %v3441_v63, 0.0  ;;  %v3449_v63 = vmul.f32 %v8245_v47, %v8245_v47 }
 0x5e8   : > { %v3481_v30 = vadd.f32 %v3480_v57, %v3479_v25  ;;  %v3494_v57 = vsel %vm362_vm1, %v3442_v18, 0.0  ;;  %v3450_v18 = vmul.f32 %v8248_v55, %v8248_v55 }
 0x5ea   : > { %v3483_v54 = vadd.f32 %v3482_v46, %v3481_v30 }
 0x5ec   : > { %v3485_v44 = vadd.f32 %v3484_v23, %v3483_v54  ;;  %v3446_v54 = vmul.f32 %v8425_v17, %v8425_v17 }
 0x5ee   : > { %v3487_v36 = vadd.f32 %v3486_v4, %v3485_v44  ;;  %v3502_v4 = vsel %vm362_vm1, %v3446_v54, 0.0 }
 0x5f0   : > { %v3489_v29 = vadd.f32 %v3488_v35, %v3487_v36  ;;  %v3504_v35 = vsel %vm362_vm1, %v3447_v9, 0.0 }
 0x5f2   : > { %v3491_v58 = vadd.f32 %v3490_v2, %v3489_v29  ;;  %v3506_v2 = vsel %vm362_vm1, %v3448_v1, 0.0 }
 0x5f4   : > { %v3493_v25 = vadd.f32 %v3492_v20, %v3491_v58  ;;  %v3508_v20 = vsel %vm362_vm1, %v3449_v63, 0.0 }
 0x5f6   : > { %v3495_v30 = vadd.f32 %v3494_v57, %v3493_v25  ;;  %v3510_v57 = vsel %vm362_vm1, %v3450_v18, 0.0 }
 0x5f8   : > { %v3497_v46 = vadd.f32 %v3496_v27, %v3495_v30 }
 0x5fa   : > { %v3499_v23 = vadd.f32 %v3498_v49, %v3497_v46  ;;  %v3514_v46 = vsel %vm362_vm1, %v3452_v40, 0.0 }
 0x5fc   : > { %v3501_v44 = vadd.f32 %v3500_v10, %v3499_v23 }
 0x5fe   : > { %v3503_v36 = vadd.f32 %v3502_v4, %v3501_v44 }
 0x600   : > { %v3505_v29 = vadd.f32 %v3504_v35, %v3503_v36 }
 0x602   : > { %v3507_v58 = vadd.f32 %v3506_v2, %v3505_v29 }
 0x604   : > { %v3509_v25 = vadd.f32 %v3508_v20, %v3507_v58 }
 0x606   : > { %v3511_v30 = vadd.f32 %v3510_v57, %v3509_v25 }
 0x608   : > { %v3513_v27 = vadd.f32 %v3512_v52, %v3511_v30 }
 0x60a   : > { %v3515_v54 = vadd.f32 %v3514_v46, %v3513_v27 }
 0x60c   : > { %v3516_v49 = vrot.slane %v3515_v54, 4 }
 0x60e   : > { %v3517_v23 = vadd.f32 %v3516_v49, %v3515_v54 }
 0x610   : > { %v3518_v9 = vrot.slane %v3517_v23, 2 }
 0x612   : > { %v3519_v10 = vadd.f32 %v3518_v9, %v3517_v23 }
 0x614   : > { %v3520_v44 = vrot.slane %v3519_v10, 1 }
 0x616   : > { %v3521_v1 = vadd.f32 %v3520_v44, %v3519_v10 }
 0x618   : > { %v3522_v4 = vmul.f32 0.00390625, %v3521_v1 }
 0x61a   : > { %v3523_v36 = vadd.f32 1e-05, %v3522_v4 }
 0x61c   : > { %6257 = vrsqrt.f32 %v3523_v36 }
 0x626   : > { %v6258_v63 = vpop.eup %6257 }
 0x627   : > { %v3555_v35 = vmul.f32 %v6258_v63, %v8251_v6  ;;  %v3525_v29 = vmul.f32 %v6258_v63, %v8258_v19  ;;  %v3526_v18 = vmul.f32 %v6258_v63, %v8262_v3  ;;  %v3527_v2 = vmul.f32 %v6258_v63, %v8266_v37 }
 0x628   : > { %v3528_v58 = vmul.f32 %v6258_v63, %v8270_v28  ;;  %v3529_v59 = vmul.f32 %v6258_v63, %v8278_v62  ;;  %v3530_v20 = vmul.f32 %v6258_v63, %v8284_v22  ;;  %v3531_v25 = vmul.f32 %v6258_v63, %v8292_v39 }
 0x629   : > { %v3587_v40 = vmax.f32 %v3555_v35, 0.0  ;;  %v3532_v57 = vmul.f32 %v6258_v63, %v8299_v0  ;;  %v3533_v30 = vmul.f32 %v6258_v63, %v8306_v32  ;;  %v3534_v6 = vmul.f32 %v6258_v63, %v8313_v31 }
 0x62a   : > { %v3535_v19 = vmul.f32 %v6258_v63, %v8320_v34  ;;  %v3536_v3 = vmul.f32 %v6258_v63, %v8327_v60  ;;  %v3537_v37 = vmul.f32 %v6258_v63, %v8334_v11  ;;  %v3538_v28 = vmul.f32 %v6258_v63, %v8341_v56 }
 0x62b   : > { %3675 = vst.msk [vmem:[#allocation3 + $0x181] sm:$0xff] %vm362_vm1, %v3587_v40  ;;  %v3539_v62 = vmul.f32 %v6258_v63, %v8348_v13  ;;  %v3540_v22 = vmul.f32 %v6258_v63, %v8355_v42  ;;  %v3541_v39 = vmul.f32 %v6258_v63, %v8362_v16  ;;  %v3542_v0 = vmul.f32 %v6258_v63, %v8369_v53 }
 0x62c   : > { %v3543_v32 = vmul.f32 %v6258_v63, %v8376_v51  ;;  %v8478_v31 = vmul.f32 %v6258_v63, %v8383_v7  ;;  %v8481_v34 = vmul.f32 %v6258_v63, %v8390_v41  ;;  %v8484_v60 = vmul.f32 %v6258_v63, %v8397_v50 }
 0x62d   : > { %v8487_v11 = vmul.f32 %v6258_v63, %v8404_v45  ;;  %v8490_v56 = vmul.f32 %v6258_v63, %v8411_v43  ;;  %v8493_v13 = vmul.f32 %v6258_v63, %v8418_v12  ;;  %v8496_v42 = vmul.f32 %v6258_v63, %v8425_v17 }
 0x62e   : > { %v8499_v16 = vmul.f32 %v6258_v63, %v8239_v48  ;;  %v8502_v53 = vmul.f32 %v6258_v63, %v8242_v38  ;;  %v8505_v51 = vmul.f32 %v6258_v63, %v8245_v47  ;;  %v8508_v7 = vmul.f32 %v6258_v63, %v8248_v55 }
 0x62f   : > { %v8511_v41 = vmul.f32 %v6258_v63, %v8254_v24  ;;  %v3558_v50 = vmax.f32 %v3526_v18, 0.0  ;;  %v3557_v45 = vmax.f32 %v3525_v29, 0.0  ;;  %v3559_v43 = vmax.f32 %v3527_v2, 0.0 }
 0x630   : > { %v3560_v12 = vmax.f32 %v3528_v58, 0.0  ;;  %v3561_v17 = vmax.f32 %v3529_v59, 0.0  ;;  %v3562_v52 = vmax.f32 %v3530_v20, 0.0  ;;  %v3563_v48 = vmax.f32 %v3531_v25, 0.0 }
 0x631   : > { %3646 = vst.msk [vmem:[#allocation3 + $0x21] sm:$0xff] %vm362_vm1, %v3558_v50  ;;  %v3564_v38 = vmax.f32 %v3532_v57, 0.0  ;;  %v3565_v27 = vmax.f32 %v3533_v30, 0.0  ;;  %v3566_v46 = vmax.f32 %v3534_v6, 0.0  ;;  %v3567_v47 = vmax.f32 %v3535_v19, 0.0  ;;  %3645 = vst.msk [vmem:[#allocation3 + $0x19] sm:$0xff] %vm362_vm1, %v3557_v45 }
 0x632   : > { %3647 = vst.msk [vmem:[#allocation3 + $0x31] sm:$0xff] %vm362_vm1, %v3559_v43  ;;  %v3568_v55 = vmax.f32 %v3536_v3, 0.0  ;;  %v3569_v24 = vmax.f32 %v3537_v37, 0.0  ;;  %v3570_v54 = vmax.f32 %v3538_v28, 0.0  ;;  %v3571_v49 = vmax.f32 %v3539_v62, 0.0  ;;  %3648 = vst.msk [vmem:[#allocation3 + $0x39] sm:$0xff] %vm362_vm1, %v3560_v12 }
 0x633   : > { %3649 = vst.msk [vmem:[#allocation3 + $0x49] sm:$0xff] %vm362_vm1, %v3561_v17  ;;  %3650 = vst.msk [vmem:[#allocation3 + $0x51] sm:$0xff] %vm362_vm1, %v3562_v52  ;;  %v3572_v23 = vmax.f32 %v3540_v22, 0.0  ;;  %v3573_v9 = vmax.f32 %v3541_v39, 0.0  ;;  %v3574_v10 = vmax.f32 %v3542_v0, 0.0  ;;  %v3575_v44 = vmax.f32 %v3543_v32, 0.0 }
 0x634   : > { %3651 = vst.msk [vmem:[#allocation3 + $0x61] sm:$0xff] %vm362_vm1, %v3563_v48  ;;  %3652 = vst.msk [vmem:[#allocation3 + $0x69] sm:$0xff] %vm362_vm1, %v3564_v38  ;;  %v3576_v1 = vmax.f32 %v8478_v31, 0.0  ;;  %v3577_v4 = vmax.f32 %v8481_v34, 0.0  ;;  %v3578_v36 = vmax.f32 %v8484_v60, 0.0  ;;  %v3579_v63 = vmax.f32 %v8487_v11, 0.0 }
 0x635   : > { %3653 = vst.msk [vmem:[#allocation3 + $0x79] sm:$0xff] %vm362_vm1, %v3565_v27  ;;  %3654 = vst.msk [vmem:[#allocation3 + $0x81] sm:$0xff] %vm362_vm1, %v3566_v46  ;;  %v3580_v35 = vmax.f32 %v8490_v56, 0.0  ;;  %v3581_v29 = vmax.f32 %v8493_v13, 0.0  ;;  %v3582_v18 = vmax.f32 %v8496_v42, 0.0  ;;  %v3583_v2 = vmax.f32 %v8499_v16, 0.0 }
 0x636   : > { %3655 = vst.msk [vmem:[#allocation3 + $0x91] sm:$0xff] %vm362_vm1, %v3567_v47  ;;  %3656 = vst.msk [vmem:[#allocation3 + $0x99] sm:$0xff] %vm362_vm1, %v3568_v55  ;;  %v3584_v58 = vmax.f32 %v8502_v53, 0.0  ;;  %v3585_v59 = vmax.f32 %v8505_v51, 0.0  ;;  %v3586_v20 = vmax.f32 %v8508_v7, 0.0  ;;  %v3588_v25 = vmax.f32 %v8511_v41, 0.0 }
 0x637   : > { %3657 = vst.msk [vmem:[#allocation3 + $0xa9] sm:$0xff] %vm362_vm1, %v3569_v24  ;;  %3658 = vst.msk [vmem:[#allocation3 + $0xb1] sm:$0xff] %vm362_vm1, %v3570_v54  ;;  %v3677_v47 = vld [vmem:[%s9594_s7] sm:$0xff]  ;;  %v3678_v55 = vld [vmem:[%s9594_s7 + $0x8] sm:$0xff] }
 0x638   : > { %3659 = vst.msk [vmem:[#allocation3 + $0xc1] sm:$0xff] %vm362_vm1, %v3571_v49  ;;  %3660 = vst.msk [vmem:[#allocation3 + $0xc9] sm:$0xff] %vm362_vm1, %v3572_v23  ;;  %v8552_v40 = vld [vmem:[#allocation3 + $0x21] sm:$0xff]  ;;  %v8554_v57 = vld [vmem:[#allocation3 + $0x19] sm:$0xff]  ;;  %v6225_v24 = vpack.c.bf16 %v3678_v55, %v3677_v47 }
 0x639   : > { %3661 = vst.msk [vmem:[#allocation3 + $0xd9] sm:$0xff] %vm362_vm1, %v3573_v9  ;;  %3662 = vst.msk [vmem:[#allocation3 + $0xe1] sm:$0xff] %vm362_vm1, %v3574_v10  ;;  %4009 = vrot.lane.b32.xlu1 %v8552_v40, %s6276_s24  ;;  %4007 = vrot.lane.b32.xlu0 %v8554_v57, %s6276_s24  ;;  %v8564_v30 = vld [vmem:[#allocation3 + $0x39] sm:$0xff]  ;;  %v8566_v6 = vld [vmem:[#allocation3 + $0x31] sm:$0xff] }
 0x63a   : > { %3663 = vst.msk [vmem:[#allocation3 + $0xf1] sm:$0xff] %vm362_vm1, %v3575_v44  ;;  %3664 = vst.msk [vmem:[#allocation3 + $0xf9] sm:$0xff] %vm362_vm1, %v3576_v1  ;;  %v8572_v19 = vld [vmem:[#allocation3 + $0x51] sm:$0xff]  ;;  %v8574_v3 = vld [vmem:[#allocation3 + $0x49] sm:$0xff]  ;;  %6226 = vmatprep.subr.bf16.mxu1 %v6225_v24 }
 0x63b   : > { %3665 = vst.msk [vmem:[#allocation3 + $0x109] sm:$0xff] %vm362_vm1, %v3577_v4  ;;  %3666 = vst.msk [vmem:[#allocation3 + $0x111] sm:$0xff] %vm362_vm1, %v3578_v36  ;;  %v8580_v37 = vld [vmem:[#allocation3 + $0x69] sm:$0xff]  ;;  %v8582_v28 = vld [vmem:[#allocation3 + $0x61] sm:$0xff]  ;;  %6228 = vmatpush3.bf16.msra.mxu1 %v6225_v24 }
 0x63c   : > { %3667 = vst.msk [vmem:[#allocation3 + $0x121] sm:$0xff] %vm362_vm1, %v3579_v63  ;;  %3668 = vst.msk [vmem:[#allocation3 + $0x129] sm:$0xff] %vm362_vm1, %v3580_v35  ;;  %v8588_v62 = vld [vmem:[#allocation3 + $0x81] sm:$0xff]  ;;  %v8590_v22 = vld [vmem:[#allocation3 + $0x79] sm:$0xff] }
 0x63d   : > { %3669 = vst.msk [vmem:[#allocation3 + $0x139] sm:$0xff] %vm362_vm1, %v3581_v29  ;;  %3670 = vst.msk [vmem:[#allocation3 + $0x141] sm:$0xff] %vm362_vm1, %v3582_v18  ;;  %4013 = vrot.lane.b32.xlu1 %v8564_v30, %s6276_s24  ;;  %4011 = vrot.lane.b32.xlu0 %v8566_v6, %s6276_s24  ;;  %v8596_v39 = vld [vmem:[#allocation3 + $0x99] sm:$0xff]  ;;  %v8598_v0 = vld [vmem:[#allocation3 + $0x91] sm:$0xff] }
 0x63e   : > { %3671 = vst.msk [vmem:[#allocation3 + $0x151] sm:$0xff] %vm362_vm1, %v3583_v2  ;;  %3672 = vst.msk [vmem:[#allocation3 + $0x159] sm:$0xff] %vm362_vm1, %v3584_v58  ;;  %v8604_v32 = vld [vmem:[#allocation3 + $0xb1] sm:$0xff]  ;;  %v8606_v31 = vld [vmem:[#allocation3 + $0xa9] sm:$0xff] }
 0x63f   : > { %3673 = vst.msk [vmem:[#allocation3 + $0x169] sm:$0xff] %vm362_vm1, %v3585_v59  ;;  %3674 = vst.msk [vmem:[#allocation3 + $0x171] sm:$0xff] %vm362_vm1, %v3586_v20  ;;  %v8612_v34 = vld [vmem:[#allocation3 + $0xc9] sm:$0xff]  ;;  %v8614_v60 = vld [vmem:[#allocation3 + $0xc1] sm:$0xff] }
 0x640   : > { %3676 = vst.msk [vmem:[#allocation3 + $0x189] sm:$0xff] %vm362_vm1, %v3588_v25  ;;  %v8620_v11 = vld [vmem:[#allocation3 + $0xe1] sm:$0xff]  ;;  %v8622_v56 = vld [vmem:[#allocation3 + $0xd9] sm:$0xff]  ;;  %v8662_v54 = vld [vmem:[#allocation3 + $0x30] sm:$0xff] }
 0x641   : > { %4017 = vrot.lane.b32.xlu1 %v8572_v19, %s6276_s24  ;;  %4015 = vrot.lane.b32.xlu0 %v8574_v3, %s6276_s24  ;;  %v3735_v13 = vld [vmem:[#allocation3 + $0xf9] sm:$0xff]  ;;  %v3734_v42 = vld [vmem:[#allocation3 + $0xf1] sm:$0xff]  ;;  %v3749_v52 = vld [vmem:[#allocation3 + $0x22] sm:$0xff] }
 0x642   : > { %v3737_v16 = vld [vmem:[#allocation3 + $0x111] sm:$0xff]  ;;  %v3736_v53 = vld [vmem:[#allocation3 + $0x109] sm:$0xff]  ;;  %v3748_v48 = vld [vmem:[#allocation3 + $0x1a] sm:$0xff] }
 0x643   : > { %v3739_v51 = vld [vmem:[#allocation3 + $0x129] sm:$0xff]  ;;  %v3738_v7 = vld [vmem:[#allocation3 + $0x121] sm:$0xff]  ;;  %v8642_v38 = vld [vmem:[#allocation3 + $0x18] sm:$0xff] }
 0x644   : > { %v3741_v41 = vld [vmem:[#allocation3 + $0x141] sm:$0xff]  ;;  %v3740_v50 = vld [vmem:[#allocation3 + $0x139] sm:$0xff]  ;;  %v3681_v44 = vld [vmem:[%s9594_s7 + $0x20] sm:$0xf] }
 0x645   : > { %4021 = vrot.lane.b32.xlu1 %v8580_v37, %s6276_s24  ;;  %4019 = vrot.lane.b32.xlu0 %v8582_v28, %s6276_s24  ;;  %v3743_v45 = vld [vmem:[#allocation3 + $0x159] sm:$0xff]  ;;  %v3742_v43 = vld [vmem:[#allocation3 + $0x151] sm:$0xff]  ;;  %v3680_v23 = vld [vmem:[%s9594_s7 + $0x18] sm:$0xff] }
 0x646   : > { %v3745_v12 = vld [vmem:[#allocation3 + $0x171] sm:$0xff]  ;;  %v3744_v17 = vld [vmem:[#allocation3 + $0x169] sm:$0xff]  ;;  %v8647_v46 = vld [vmem:[#allocation3 + $0x20] sm:$0xff] }
 0x647   : > { %v3750_v27 = vld [vmem:[#allocation3 + $0x32] sm:$0xff]  ;;  %v3679_v49 = vld [vmem:[%s9594_s7 + $0x10] sm:$0xff]  ;;  %v8697_v4 = vld [vmem:[#allocation3 + $0x48] sm:$0xff] }
 0x648   : > { %v6229_v9 = vpack.c.bf16 %v3680_v23, %v3679_v49  ;;  %v8673_v10 = vld [vmem:[#allocation3 + $0x38] sm:$0xff]  ;;  %v8705_v36 = vld [vmem:[#allocation3 + $0x50] sm:$0xff]  ;;  %v8809_v55 = vld [vmem:[#allocation3 + $0x80] sm:$0xff] }
 0x649   : > { %4025 = vrot.lane.b32.xlu1 %v8588_v62, %s6276_s24  ;;  %4023 = vrot.lane.b32.xlu0 %v8590_v22, %s6276_s24  ;;  %v3940_v1 = vld [vmem:[#allocation3 + $0x3a] sm:$0xff]  ;;  %v3941_v29 = vld [vmem:[#allocation3 + $0x4a] sm:$0xff]  ;;  %v3942_v20 = vld [vmem:[#allocation3 + $0x52] sm:$0xff] }
 0x64a   : > { %6230 = vmatprep.subr.bf16.mxu1 %v6229_v9  ;;  %v8841_v33 = vld [vmem:[#allocation3 + $0x90] sm:$0xff] }
 0x64b   : > { %6232 = vmatpush3.bf16.msra.mxu1 %v6229_v9 }
 0x64c   : > { %6111 = vmatprep.subr.msk.mxu1 %vm387_vm0, %v3681_v44 }
 0x64d   : > { %4029 = vrot.lane.b32.xlu1 %v8596_v39, %s6276_s24  ;;  %4027 = vrot.lane.b32.xlu0 %v8598_v0, %s6276_s24 }
 0x64f   : > { %6112 = vmatpush3.msk.msra.mxu1 %vm387_vm0, %v3681_v44  ;;  %v3945_v44 = vld [vmem:[#allocation3 + $0x7a] sm:$0xff] }
 0x651   : > { %4033 = vrot.lane.b32.xlu1 %v8604_v32, %s6276_s24  ;;  %4031 = vrot.lane.b32.xlu0 %v8606_v31, %s6276_s24 }
 0x655   : > { %4037 = vrot.lane.b32.xlu1 %v8612_v34, %s6276_s24  ;;  %4035 = vrot.lane.b32.xlu0 %v8614_v60, %s6276_s24 }
 0x659   : > { %4041 = vrot.lane.b32.xlu1 %v8620_v11, %s6276_s24  ;;  %4039 = vrot.lane.b32.xlu0 %v8622_v56, %s6276_s24 }
 0x65d   : > { %4045 = vrot.lane.b32.xlu1 %v3735_v13, %s6276_s24  ;;  %4043 = vrot.lane.b32.xlu0 %v3734_v42, %s6276_s24  ;;  %v8755_v13 = vld [vmem:[#allocation3 + $0x68] sm:$0xff] }
 0x661   : > { %4049 = vrot.lane.b32.xlu1 %v3737_v16, %s6276_s24  ;;  %4047 = vrot.lane.b32.xlu0 %v3736_v53, %s6276_s24 }
 0x665   : > { %4053 = vrot.lane.b32.xlu1 %v3739_v51, %s6276_s24  ;;  %4051 = vrot.lane.b32.xlu0 %v3738_v7, %s6276_s24  ;;  %v3943_v7 = vld [vmem:[#allocation3 + $0x62] sm:$0xff] }
 0x669   : > { %4057 = vrot.lane.b32.xlu1 %v3741_v41, %s6276_s24  ;;  %4055 = vrot.lane.b32.xlu0 %v3740_v50, %s6276_s24 }
 0x66d   : > { %4061 = vrot.lane.b32.xlu1 %v3743_v45, %s6276_s24  ;;  %4059 = vrot.lane.b32.xlu0 %v3742_v43, %s6276_s24  ;;  %v3944_v43 = vld [vmem:[#allocation3 + $0x6a] sm:$0xff] }
 0x671   : > { %4065 = vrot.lane.b32.xlu1 %v3745_v12, %s6276_s24  ;;  %4063 = vrot.lane.b32.xlu0 %v3744_v17, %s6276_s24  ;;  %s6282_s24 = smov 20  }
 0x675   : > { %4137 = vrot.lane.b32.xlu1 %v3749_v52, %s6271_s16  ;;  %4135 = vrot.lane.b32.xlu0 %v3748_v48, %s6271_s16 }
 0x679   : > { %4259 = vrot.lane.b32.xlu1 %v8642_v38, %s6281_s18  ;;  %4139 = vrot.lane.b32.xlu0 %v3750_v27, %s6271_s16 }
 0x67d   : > { %4387 = vrot.lane.b32.xlu1 %v8554_v57, %s6272_s21  ;;  %4261 = vrot.lane.b32.xlu0 %v8647_v46, %s6281_s18  ;;  %v8739_v57 = vld [vmem:[#allocation3 + $0x60] sm:$0xff] }
 0x681   : > { %4515 = vrot.lane.b32.xlu1 %v3748_v48, %s6282_s24  ;;  %4389 = vrot.lane.b32.xlu0 %v8552_v40, %s6272_s21 }
 0x685   : > { %4643 = vrot.lane.b32.xlu1 %v8662_v54, %s6277_s17  ;;  %4517 = vrot.lane.b32.xlu0 %v3749_v52, %s6282_s24  ;;  %v8793_v52 = vld [vmem:[#allocation3 + $0x78] sm:$0xff] }
 0x689   : > { %4645 = vrot.lane.b32.xlu1 %v8673_v10, %s6277_s17  ;;  %4263 = vrot.lane.b32.xlu0 %v8662_v54, %s6281_s18 }
 0x68d   : > { %4265 = vrot.lane.b32.xlu1 %v8673_v10, %s6281_s18  ;;  %4771 = vrot.lane.b32.xlu0 %v8566_v6, %s6278_s25 }
 0x691   : > { %4773 = vrot.lane.b32.xlu1 %v8564_v30, %s6278_s25  ;;  %4391 = vrot.lane.b32.xlu0 %v8566_v6, %s6272_s21 }
 0x695   : > { %4393 = vrot.lane.b32.xlu1 %v8564_v30, %s6272_s21  ;;  %4899 = vrot.lane.b32.xlu0 %v3750_v27, %s6279_s29 }
 0x699   : > { %4901 = vrot.lane.b32.xlu1 %v3940_v1, %s6279_s29  ;;  %4519 = vrot.lane.b32.xlu0 %v3750_v27, %s6282_s24 }
 0x69d   : > { %4647 = vrot.lane.b32.xlu1 %v8697_v4, %s6277_s17  ;;  %4521 = vrot.lane.b32.xlu0 %v3940_v1, %s6282_s24 }
 0x6a1   : > { %4267 = vrot.lane.b32.xlu1 %v8697_v4, %s6281_s18  ;;  %4141 = vrot.lane.b32.xlu0 %v3940_v1, %s6271_s16 }
 0x6a5   : > { %4775 = vrot.lane.b32.xlu1 %v8574_v3, %s6278_s25  ;;  %4649 = vrot.lane.b32.xlu0 %v8705_v36, %s6277_s17 }
 0x6a9   : > { %4395 = vrot.lane.b32.xlu1 %v8574_v3, %s6272_s21  ;;  %4269 = vrot.lane.b32.xlu0 %v8705_v36, %s6281_s18 }
 0x6ab   : > { %v8715_v63 = vpop.permute.xlu1 %4009  ;;  %v8717_v35 = vpop.permute.xlu0 %4007 }
 0x6ad   : > { %4903 = vrot.lane.b32.xlu1 %v3941_v29, %s6279_s29  ;;  %4777 = vrot.lane.b32.xlu0 %v8572_v19, %s6278_s25 }
 0x6af   : > { %v8722_v18 = vpop.permute.xlu1 %4013  ;;  %v8724_v2 = vpop.permute.xlu0 %4011 }
 0x6b1   : > { %4523 = vrot.lane.b32.xlu1 %v3941_v29, %s6282_s24  ;;  %4397 = vrot.lane.b32.xlu0 %v8572_v19, %s6272_s21 }
 0x6b3   : > { %v8729_v58 = vpop.permute.xlu1 %4017  ;;  %v8731_v59 = vpop.permute.xlu0 %4015 }
 0x6b5   : > { %4143 = vrot.lane.b32.xlu1 %v3941_v29, %s6271_s16  ;;  %4905 = vrot.lane.b32.xlu0 %v3942_v20, %s6279_s29 }
 0x6b7   : > { %v8735_v25 = vpop.permute.xlu1 %4021  ;;  %v8737_v40 = vpop.permute.xlu0 %4019 }
 0x6b9   : > { %4651 = vrot.lane.b32.xlu1 %v8739_v57, %s6277_s17  ;;  %4525 = vrot.lane.b32.xlu0 %v3942_v20, %s6282_s24 }
 0x6bb   : > { %v8744_v30 = vpop.permute.xlu1 %4025  ;;  %v8746_v6 = vpop.permute.xlu0 %4023 }
 0x6bd   : > { %4271 = vrot.lane.b32.xlu1 %v8739_v57, %s6281_s18  ;;  %4145 = vrot.lane.b32.xlu0 %v3942_v20, %s6271_s16 }
 0x6bf   : > { %v8751_v19 = vpop.permute.xlu1 %4029  ;;  %v8753_v3 = vpop.permute.xlu0 %4027 }
 0x6c1   : > { %4779 = vrot.lane.b32.xlu1 %v8582_v28, %s6278_s25  ;;  %4653 = vrot.lane.b32.xlu0 %v8755_v13, %s6277_s17 }
 0x6c3   : > { %v8761_v42 = vpop.permute.xlu1 %4033  ;;  %v8763_v16 = vpop.permute.xlu0 %4031 }
 0x6c5   : > { %4399 = vrot.lane.b32.xlu1 %v8582_v28, %s6272_s21  ;;  %4273 = vrot.lane.b32.xlu0 %v8755_v13, %s6281_s18 }
 0x6c7   : > { %v8769_v53 = vpop.permute.xlu1 %4037  ;;  %v8771_v51 = vpop.permute.xlu0 %4035 }
 0x6c9   : > { %4907 = vrot.lane.b32.xlu1 %v3943_v7, %s6279_s29  ;;  %4781 = vrot.lane.b32.xlu0 %v8580_v37, %s6278_s25 }
 0x6cb   : > { %v8776_v41 = vpop.permute.xlu1 %4041  ;;  %v8778_v50 = vpop.permute.xlu0 %4039 }
 0x6cd   : > { %4527 = vrot.lane.b32.xlu1 %v3943_v7, %s6282_s24  ;;  %4401 = vrot.lane.b32.xlu0 %v8580_v37, %s6272_s21 }
 0x6cf   : > { %v8783_v28 = vpop.permute.xlu1 %4045  ;;  %v8785_v45 = vpop.permute.xlu0 %4043 }
 0x6d0   : > { %9601 = vst [vmem:[#allocation8_spill] sm:$0xff] %v8783_v28  ;;  %9602 = vst [vmem:[#allocation9_spill] sm:$0xff] %v8785_v45 }
 0x6d1   : > { %4147 = vrot.lane.b32.xlu1 %v3943_v7, %s6271_s16  ;;  %4909 = vrot.lane.b32.xlu0 %v3944_v43, %s6279_s29  ;;  %v3946_v7 = vld [vmem:[#allocation3 + $0x82] sm:$0xff] }
 0x6d3   : > { %v8789_v12 = vpop.permute.xlu1 %4049  ;;  %v8791_v17 = vpop.permute.xlu0 %4047 }
 0x6d4   : > { %9603 = vst [vmem:[#allocation10_spill] sm:$0xff] %v8789_v12  ;;  %9604 = vst [vmem:[#allocation11_spill] sm:$0xff] %v8791_v17 }
 0x6d5   : > { %4655 = vrot.lane.b32.xlu1 %v8793_v52, %s6277_s17  ;;  %4529 = vrot.lane.b32.xlu0 %v3944_v43, %s6282_s24 }
 0x6d7   : > { %v8798_v37 = vpop.permute.xlu1 %4053  ;;  %v8800_v48 = vpop.permute.xlu0 %4051 }
 0x6d8   : > { %9605 = vst [vmem:[#allocation12_spill] sm:$0xff] %v8798_v37  ;;  %9606 = vst [vmem:[#allocation13_spill] sm:$0xff] %v8800_v48  ;;  %v3683_v37 = vld [vmem:[#allocation3 + $0x8] sm:$0xff]  ;;  %v3947_v48 = vld [vmem:[#allocation3 + $0x92] sm:$0xff] }
 0x6d9   : > { %4275 = vrot.lane.b32.xlu1 %v8793_v52, %s6281_s18  ;;  %4149 = vrot.lane.b32.xlu0 %v3944_v43, %s6271_s16  ;;  %v4996_v12 = vsel %vm362_vm1, %v3683_v37, %v6987_v8 }
 0x6db   : > { %v8805_v27 = vpop.permute.xlu1 %4057  ;;  %v8807_v47 = vpop.permute.xlu0 %4055 }
 0x6dc   : > { %9607 = vst [vmem:[#allocation14_spill] sm:$0xff] %v8805_v27  ;;  %9608 = vst [vmem:[#allocation15_spill] sm:$0xff] %v8807_v47 }
 0x6dd   : > { %4783 = vrot.lane.b32.xlu1 %v8590_v22, %s6278_s25  ;;  %4657 = vrot.lane.b32.xlu0 %v8809_v55, %s6277_s17 }
 0x6df   : > { %v8815_v24 = vpop.permute.xlu1 %4061  ;;  %v8817_v49 = vpop.permute.xlu0 %4059 }
 0x6e0   : > { %9609 = vst [vmem:[#allocation16_spill] sm:$0xff] %v8815_v24  ;;  %9610 = vst [vmem:[#allocation17_spill] sm:$0xff] %v8817_v49  ;;  %v3682_v49 = vld [vmem:[#allocation3] sm:$0xff] }
 0x6e1   : > { %4403 = vrot.lane.b32.xlu1 %v8590_v22, %s6272_s21  ;;  %4277 = vrot.lane.b32.xlu0 %v8809_v55, %s6281_s18 }
 0x6e3   : > { %v8823_v23 = vpop.permute.xlu1 %4065  ;;  %v8825_v9 = vpop.permute.xlu0 %4063 }
 0x6e4   : > { %9611 = vst [vmem:[#allocation18_spill] sm:$0xff] %v8823_v23  ;;  %9612 = vst [vmem:[#allocation19_spill] sm:$0xff] %v8825_v9  ;;  %v8849_v23 = vld [vmem:[#allocation3 + $0x98] sm:$0xff] }
 0x6e5   : > { %4911 = vrot.lane.b32.xlu1 %v3945_v44, %s6279_s29  ;;  %4785 = vrot.lane.b32.xlu0 %v8588_v62, %s6278_s25 }
 0x6e7   : > { %v8830_v1 = vpop.permute.xlu1 %4137  ;;  %v8832_v29 = vpop.permute.xlu0 %4135 }
 0x6e9   : > { %4531 = vrot.lane.b32.xlu1 %v3945_v44, %s6282_s24  ;;  %4405 = vrot.lane.b32.xlu0 %v8588_v62, %s6272_s21 }
 0x6eb   : > { %v4260_v22 = vpop.permute.xlu1 %4259  ;;  %v8837_v20 = vpop.permute.xlu0 %4139 }
 0x6ed   : > { %4151 = vrot.lane.b32.xlu1 %v3945_v44, %s6271_s16  ;;  %4913 = vrot.lane.b32.xlu0 %v3946_v7, %s6279_s29 }
 0x6ef   : > { %v4388_v43 = vpop.permute.xlu1 %4387  ;;  %v4262_v21 = vpop.permute.xlu0 %4261 }
 0x6f1   : > { %4659 = vrot.lane.b32.xlu1 %v8841_v33, %s6277_s17  ;;  %4533 = vrot.lane.b32.xlu0 %v3946_v7, %s6282_s24 }
 0x6f3   : > { %v4516_v26 = vpop.permute.xlu1 %4515  ;;  %v4390_v14 = vpop.permute.xlu0 %4389 }
 0x6f5   : > { %4279 = vrot.lane.b32.xlu1 %v8841_v33, %s6281_s18  ;;  %4153 = vrot.lane.b32.xlu0 %v3946_v7, %s6271_s16  ;;  %v4995_v7 = vsel %vm362_vm1, %v3682_v49, %v6973_v61 }
 0x6f7   : > { %v4644_v62 = vpop.permute.xlu1 %4643  ;;  %v4518_v44 = vpop.permute.xlu0 %4517 }
 0x6f9   : > { %4787 = vrot.lane.b32.xlu1 %v8598_v0, %s6278_s25  ;;  %4661 = vrot.lane.b32.xlu0 %v8849_v23, %s6277_s17 }
 0x6fb   : > { %v4646_v9 = vpop.permute.xlu1 %4645  ;;  %v4264_v24 = vpop.permute.xlu0 %4263 }
 0x6fd   : > { %4407 = vrot.lane.b32.xlu1 %v8598_v0, %s6272_s21  ;;  %4281 = vrot.lane.b32.xlu0 %v8849_v23, %s6281_s18  ;;  %v5027_v0 = vsel %vm1122_vm2, %v4995_v7, %v6984_v5  ;;  %v5028_v5 = vsel %vm1122_vm2, %v4996_v12, %v6998_v15  ;;  %v8889_v12 = vld [vmem:[#allocation3 + $0xa8] sm:$0xff] }
 0x6fe   : > { %v5060_v61 = vsel %vm5059_vm14, %v5027_v0, %v4260_v22  ;;  %v5061_v8 = vsel %vm5059_vm14, %v5028_v5, %v4262_v21 }
 0x6ff   : > { %v8861_v27 = vpop.permute.xlu1 %4265  ;;  %v4772_v47 = vpop.permute.xlu0 %4771  ;;  %v5092_v28 = vsel %vm2758_vm6, %v5060_v61, %v4388_v43  ;;  %v5093_v43 = vsel %vm2758_vm6, %v5061_v8, %v4390_v14 }
 0x700   : > { %v5125_v45 = vsel %vm5124_vm15, %v5092_v28, %v4516_v26  ;;  %v3948_v28 = vld [vmem:[#allocation3 + $0x9a] sm:$0xff]  ;;  %v5126_v61 = vsel %vm5124_vm15, %v5093_v43, %v4518_v44  ;;  %v8901_v44 = vld [vmem:[#allocation3 + $0xb0] sm:$0xff] }
 0x701   : > { %4915 = vrot.lane.b32.xlu1 %v3947_v48, %s6279_s29  ;;  %4789 = vrot.lane.b32.xlu0 %v8596_v39, %s6278_s25  ;;  %v5157_v7 = vsel %vm2791_vm7, %v5125_v45, %v4644_v62  ;;  %v5158_v15 = vsel %vm2791_vm7, %v5126_v61, %v4646_v9 }
 0x702   : > { %v5190_v37 = vsel %vm5189_vm3, %v5157_v7, %v4772_v47  ;;  %v4997_v7 = vsel %vm362_vm1, %v8642_v38, %v8717_v35 }
 0x703   : > { %v4774_v49 = vpop.permute.xlu1 %4773  ;;  %v4392_v17 = vpop.permute.xlu0 %4391  ;;  %v5029_v8 = vsel %vm1122_vm2, %v4997_v7, %v8832_v29  ;;  %v8946_v7 = vld [vmem:[#allocation3 + $0xc0] sm:$0xff] }
 0x704   : > { %v5191_v21 = vsel %vm5189_vm3, %v5158_v15, %v4774_v49 }
 0x705   : > { %4535 = vrot.lane.b32.xlu1 %v3947_v48, %s6282_s24  ;;  %4409 = vrot.lane.b32.xlu0 %v8596_v39, %s6272_s21 }
 0x707   : > { %v4394_v22 = vpop.permute.xlu1 %4393  ;;  %v4900_v0 = vpop.permute.xlu0 %4899 }
 0x708   : > { %v5222_v26 = vsel %vm2824_vm8, %v5190_v37, %v4900_v0  ;;  %v5062_v37 = vsel %vm5059_vm14, %v5029_v8, %v4264_v24 }
 0x709   : > { %4155 = vrot.lane.b32.xlu1 %v3947_v48, %s6271_s16  ;;  %4917 = vrot.lane.b32.xlu0 %v3948_v28, %s6279_s29 }
 0x70a   : > { %6113 = vmatprep.mubr.msk.f32.mxu1 %vm5254_vm4, %v5222_v26  ;;  %v5094_v26 = vsel %vm2758_vm6, %v5062_v37, %v4392_v17  ;;  %v4998_v17 = vsel %vm362_vm1, %v8647_v46, %v8715_v63  ;;  %v8958_v37 = vld [vmem:[#allocation3 + $0xc8] sm:$0xff] }
 0x70b   : > { %v4902_v39 = vpop.permute.xlu1 %4901  ;;  %v4520_v45 = vpop.permute.xlu0 %4519  ;;  %v5030_v15 = vsel %vm1122_vm2, %v4998_v17, %v8830_v1  ;;  %v3951_v17 = vld [vmem:[#allocation3 + $0xc2] sm:$0xff] }
 0x70c   : > { %v5223_v14 = vsel %vm2824_vm8, %v5191_v21, %v4902_v39  ;;  %v5127_v61 = vsel %vm5124_vm15, %v5094_v26, %v4520_v45  ;;  %v5063_v21 = vsel %vm5059_vm14, %v5030_v15, %v8861_v27 }
 0x70d   : > { %4663 = vrot.lane.b32.xlu1 %v8889_v12, %s6277_s17  ;;  %4537 = vrot.lane.b32.xlu0 %v3948_v28, %s6282_s24 }
 0x70e   : > { %6114 = vmatmul.mubr.msk.f32.vlgmr.msra.gmra.mrb[56].mxu1 %vm5254_vm4, %v5223_v14  ;;  %v5095_v14 = vsel %vm2758_vm6, %v5063_v21, %v4394_v22 }
 0x70f   : > { %v4648_v48 = vpop.permute.xlu1 %4647  ;;  %v4522_v47 = vpop.permute.xlu0 %4521 }
 0x710   : > { %v5128_v46 = vsel %vm5124_vm15, %v5095_v14, %v4522_v47 }
 0x711   : > { %4283 = vrot.lane.b32.xlu1 %v8889_v12, %s6281_s18  ;;  %4157 = vrot.lane.b32.xlu0 %v3948_v28, %s6271_s16  ;;  %v3949_v28 = vld [vmem:[#allocation3 + $0xaa] sm:$0xff] }
 0x713   : > { %v4268_v9 = vpop.permute.xlu1 %4267  ;;  %v8899_v62 = vpop.permute.xlu0 %4141 }
 0x715   : > { %4791 = vrot.lane.b32.xlu1 %v8606_v31, %s6278_s25  ;;  %4665 = vrot.lane.b32.xlu0 %v8901_v44, %s6277_s17 }
 0x717   : > { %v4776_v49 = vpop.permute.xlu1 %4775  ;;  %v4650_v5 = vpop.permute.xlu0 %4649 }
 0x719   : > { %4411 = vrot.lane.b32.xlu1 %v8606_v31, %s6272_s21  ;;  %4285 = vrot.lane.b32.xlu0 %v8901_v44, %s6281_s18  ;;  %v5159_v31 = vsel %vm2791_vm7, %v5127_v61, %v4648_v48  ;;  %v3950_v48 = vld [vmem:[#allocation3 + $0xb2] sm:$0xff]  ;;  %v4999_v61 = vsel %vm362_vm1, %v8662_v54, %v8724_v2 }
 0x71a   : > { %v5192_v38 = vsel %vm5189_vm3, %v5159_v31, %v4776_v49  ;;  %v5031_v31 = vsel %vm1122_vm2, %v4999_v61, %v8837_v20 }
 0x71b   : > { %v4396_v0 = vpop.permute.xlu1 %4395  ;;  %v8917_v43 = vpop.permute.xlu0 %4269 }
 0x71d   : > { %4919 = vrot.lane.b32.xlu1 %v3949_v28, %s6279_s29  ;;  %4793 = vrot.lane.b32.xlu0 %v8604_v32, %s6278_s25 }
 0x71f   : > { %v4904_v35 = vpop.permute.xlu1 %4903  ;;  %v4778_v29 = vpop.permute.xlu0 %4777 }
 0x720   : > { %v5224_v24 = vsel %vm2824_vm8, %v5192_v38, %v4904_v35  ;;  %v5064_v38 = vsel %vm5059_vm14, %v5031_v31, %v4268_v9  ;;  %v5001_v31 = vsel %vm362_vm1, %v8697_v4, %v8731_v59 }
 0x721   : > { %4539 = vrot.lane.b32.xlu1 %v3949_v28, %s6282_s24  ;;  %4413 = vrot.lane.b32.xlu0 %v8604_v32, %s6272_s21  ;;  %v5160_v32 = vsel %vm2791_vm7, %v5128_v46, %v4650_v5 }
 0x722   : > { %6116 = vmatprep.mubr.msk.f32.mxu1 %vm5254_vm4, %v5224_v24  ;;  %v5193_v63 = vsel %vm5189_vm3, %v5160_v32, %v4778_v29  ;;  %v5096_v24 = vsel %vm2758_vm6, %v5064_v38, %v4396_v0  ;;  %v5000_v0 = vsel %vm362_vm1, %v8673_v10, %v8722_v18  ;;  %v3952_v32 = vld [vmem:[#allocation3 + $0xca] sm:$0xff] }
 0x723   : > { %v4524_v39 = vpop.permute.xlu1 %4523  ;;  %v4398_v45 = vpop.permute.xlu0 %4397  ;;  %v5032_v21 = vsel %vm1122_vm2, %v5000_v0, %v8899_v62 }
 0x724   : > { %v5129_v15 = vsel %vm5124_vm15, %v5096_v24, %v4524_v39  ;;  %v5065_v39 = vsel %vm5059_vm14, %v5032_v21, %v8917_v43 }
 0x725   : > { %4159 = vrot.lane.b32.xlu1 %v3949_v28, %s6271_s16  ;;  %4921 = vrot.lane.b32.xlu0 %v3950_v48, %s6279_s29  ;;  %v5097_v46 = vsel %vm2758_vm6, %v5065_v39, %v4398_v45 }
 0x727   : > { %v8944_v1 = vpop.permute.xlu1 %4143  ;;  %v4906_v49 = vpop.permute.xlu0 %4905 }
 0x728   : > { %v5225_v27 = vsel %vm2824_vm8, %v5193_v63, %v4906_v49  ;;  %v9003_v49 = vld [vmem:[#allocation3 + $0xd8] sm:$0xff]  ;;  %v5033_v38 = vsel %vm1122_vm2, %v5001_v31, %v8944_v1 }
 0x729   : > { %4667 = vrot.lane.b32.xlu1 %v8946_v7, %s6277_s17  ;;  %4541 = vrot.lane.b32.xlu0 %v3950_v48, %s6282_s24 }
 0x72a   : > { %6117 = vmatmul.mubr.msk.f32.gmra.mrb[58].mxu1 %vm5254_vm4, %v5225_v27 }
 0x72b   : > { %v4652_v22 = vpop.permute.xlu1 %4651  ;;  %v4526_v47 = vpop.permute.xlu0 %4525 }
 0x72c   : > { %v5130_v10 = vsel %vm5124_vm15, %v5097_v46, %v4526_v47 }
 0x72d   : > { %4287 = vrot.lane.b32.xlu1 %v8946_v7, %s6281_s18  ;;  %4161 = vrot.lane.b32.xlu0 %v3950_v48, %s6271_s16 }
 0x72f   : > { %v4272_v5 = vpop.permute.xlu1 %4271  ;;  %v8956_v8 = vpop.permute.xlu0 %4145 }
 0x730   : > { %v5066_v24 = vsel %vm5059_vm14, %v5033_v38, %v4272_v5 }
 0x731   : > { %4795 = vrot.lane.b32.xlu1 %v8614_v60, %s6278_s25  ;;  %4669 = vrot.lane.b32.xlu0 %v8958_v37, %s6277_s17 }
 0x733   : > { %v4780_v26 = vpop.permute.xlu1 %4779  ;;  %v4654_v28 = vpop.permute.xlu0 %4653 }
 0x735   : > { %4415 = vrot.lane.b32.xlu1 %v8614_v60, %s6272_s21  ;;  %4289 = vrot.lane.b32.xlu0 %v8958_v37, %s6281_s18  ;;  %v5161_v60 = vsel %vm2791_vm7, %v5129_v15, %v4652_v22 }
 0x736   : > { %v5194_v54 = vsel %vm5189_vm3, %v5161_v60, %v4780_v26  ;;  %v9017_v26 = vld [vmem:[#allocation3 + $0xe0] sm:$0xff] }
 0x737   : > { %v4400_v35 = vpop.permute.xlu1 %4399  ;;  %v8974_v29 = vpop.permute.xlu0 %4273 }
 0x738   : > { %v5098_v60 = vsel %vm2758_vm6, %v5066_v24, %v4400_v35  ;;  %v5002_v35 = vsel %vm362_vm1, %v8705_v36, %v8729_v58 }
 0x739   : > { %4923 = vrot.lane.b32.xlu1 %v3951_v17, %s6279_s29  ;;  %4797 = vrot.lane.b32.xlu0 %v8612_v34, %s6278_s25 }
 0x73b   : > { %v4908_v2 = vpop.permute.xlu1 %4907  ;;  %v4782_v20 = vpop.permute.xlu0 %4781 }
 0x73c   : > { %v5226_v9 = vsel %vm2824_vm8, %v5194_v54, %v4908_v2  ;;  %v3953_v54 = vld [vmem:[#allocation3 + $0xda] sm:$0xff] }
 0x73d   : > { %4543 = vrot.lane.b32.xlu1 %v3951_v17, %s6282_s24  ;;  %4417 = vrot.lane.b32.xlu0 %v8612_v34, %s6272_s21  ;;  %v5162_v34 = vsel %vm2791_vm7, %v5130_v10, %v4654_v28 }
 0x73e   : > { %6119 = vmatprep.mubr.msk.f32.mxu1 %vm5254_vm4, %v5226_v9  ;;  %v5195_v18 = vsel %vm5189_vm3, %v5162_v34, %v4782_v20  ;;  %v5034_v20 = vsel %vm1122_vm2, %v5002_v35, %v8956_v8 }
 0x73f   : > { %v4528_v14 = vpop.permute.xlu1 %4527  ;;  %v4402_v48 = vpop.permute.xlu0 %4401  ;;  %v5067_v9 = vsel %vm5059_vm14, %v5034_v20, %v8974_v29 }
 0x740   : > { %v5131_v2 = vsel %vm5124_vm15, %v5098_v60, %v4528_v14  ;;  %v5099_v39 = vsel %vm2758_vm6, %v5067_v9, %v4402_v48  ;;  %v3954_v14 = vld [vmem:[#allocation3 + $0xe2] sm:$0xff]  ;;  %v3956_v9 = vld [vmem:[#allocation3 + $0xfa] sm:$0xff] }
 0x741   : > { %4163 = vrot.lane.b32.xlu1 %v3951_v17, %s6271_s16  ;;  %4925 = vrot.lane.b32.xlu0 %v3952_v32, %s6279_s29 }
 0x743   : > { %v9001_v62 = vpop.permute.xlu1 %4147  ;;  %v4910_v63 = vpop.permute.xlu0 %4909 }
 0x744   : > { %v5227_v43 = vsel %vm2824_vm8, %v5195_v18, %v4910_v63  ;;  %v9076_v63 = vld [vmem:[#allocation3 + $0xf8] sm:$0xff] }
 0x745   : > { %4671 = vrot.lane.b32.xlu1 %v9003_v49, %s6277_s17  ;;  %4545 = vrot.lane.b32.xlu0 %v3952_v32, %s6282_s24 }
 0x746   : > { %6120 = vmatmul.mubr.msk.f32.gmra.mrb[60].mxu1 %vm5254_vm4, %v5227_v43  ;;  %v3923_v43 = vld [vmem:[#allocation3 + $0xf1] sm:$0xff] }
 0x747   : > { %v4656_v45 = vpop.permute.xlu1 %4655  ;;  %v4530_v27 = vpop.permute.xlu0 %4529 }
 0x748   : > { %v5132_v36 = vsel %vm5124_vm15, %v5099_v39, %v4530_v27 }
 0x749   : > { %4291 = vrot.lane.b32.xlu1 %v9003_v49, %s6281_s18  ;;  %4165 = vrot.lane.b32.xlu0 %v3952_v32, %s6271_s16  ;;  %v9062_v32 = vld [vmem:[#allocation3 + $0xf0] sm:$0xff] }
 0x74b   : > { %v9013_v22 = vpop.permute.xlu1 %4275  ;;  %v9015_v47 = vpop.permute.xlu0 %4149 }
 0x74d   : > { %4799 = vrot.lane.b32.xlu1 %v8622_v56, %s6278_s25  ;;  %4673 = vrot.lane.b32.xlu0 %v9017_v26, %s6277_s17 }
 0x74f   : > { %v4784_v28 = vpop.permute.xlu1 %4783  ;;  %v4658_v61 = vpop.permute.xlu0 %4657 }
 0x751   : > { %4419 = vrot.lane.b32.xlu1 %v8622_v56, %s6272_s21  ;;  %4293 = vrot.lane.b32.xlu0 %v9017_v26, %s6281_s18  ;;  %v5163_v56 = vsel %vm2791_vm7, %v5131_v2, %v4656_v45  ;;  %v3924_v2 = vld [vmem:[#allocation3 + $0xf9] sm:$0xff] }
 0x752   : > { %v5196_v4 = vsel %vm5189_vm3, %v5163_v56, %v4784_v28  ;;  %v5003_v28 = vsel %vm362_vm1, %v8739_v57, %v8737_v40 }
 0x753   : > { %v4404_v17 = vpop.permute.xlu1 %4403  ;;  %v9033_v15 = vpop.permute.xlu0 %4277 }
 0x755   : > { %4927 = vrot.lane.b32.xlu1 %v3953_v54, %s6279_s29  ;;  %4801 = vrot.lane.b32.xlu0 %v8620_v11, %s6278_s25 }
 0x757   : > { %v4912_v59 = vpop.permute.xlu1 %4911  ;;  %v4786_v1 = vpop.permute.xlu0 %4785 }
 0x758   : > { %v5228_v5 = vsel %vm2824_vm8, %v5196_v4, %v4912_v59 }
 0x759   : > { %4547 = vrot.lane.b32.xlu1 %v3953_v54, %s6282_s24  ;;  %4421 = vrot.lane.b32.xlu0 %v8620_v11, %s6272_s21  ;;  %v5164_v11 = vsel %vm2791_vm7, %v5132_v36, %v4658_v61  ;;  %v5035_v61 = vsel %vm1122_vm2, %v5003_v28, %v9001_v62 }
 0x75a   : > { %6122 = vmatprep.mubr.msk.f32.mxu1 %vm5254_vm4, %v5228_v5  ;;  %v5197_v58 = vsel %vm5189_vm3, %v5164_v11, %v4786_v1  ;;  %v5068_v31 = vsel %vm5059_vm14, %v5035_v61, %v9013_v22 }
 0x75b   : > { %v4532_v0 = vpop.permute.xlu1 %4531  ;;  %v4406_v21 = vpop.permute.xlu0 %4405  ;;  %v5100_v60 = vsel %vm2758_vm6, %v5068_v31, %v4404_v17  ;;  %v5004_v17 = vsel %vm362_vm1, %v8755_v13, %v8735_v25 }
 0x75c   : > { %v5133_v40 = vsel %vm5124_vm15, %v5100_v60, %v4532_v0  ;;  %v5036_v59 = vsel %vm1122_vm2, %v5004_v17, %v9015_v47  ;;  %v3957_v60 = vld [vmem:[#allocation3 + $0x10a] sm:$0xff]  ;;  %v3958_v17 = vld [vmem:[#allocation3 + $0x112] sm:$0xff] }
 0x75d   : > { %4167 = vrot.lane.b32.xlu1 %v3953_v54, %s6271_s16  ;;  %4929 = vrot.lane.b32.xlu0 %v3954_v14, %s6279_s29  ;;  %v3955_v54 = vld [vmem:[#allocation3 + $0xf2] sm:$0xff]  ;;  %v5069_v1 = vsel %vm5059_vm14, %v5036_v59, %v9033_v15 }
 0x75e   : > { %v5101_v20 = vsel %vm2758_vm6, %v5069_v1, %v4406_v21 }
 0x75f   : > { %v9060_v8 = vpop.permute.xlu1 %4151  ;;  %v4914_v46 = vpop.permute.xlu0 %4913 }
 0x760   : > { %v5229_v29 = vsel %vm2824_vm8, %v5197_v58, %v4914_v46  ;;  %v9132_v46 = vld [vmem:[#allocation3 + $0x110] sm:$0xff] }
 0x761   : > { %4675 = vrot.lane.b32.xlu1 %v9062_v32, %s6277_s17  ;;  %4549 = vrot.lane.b32.xlu0 %v3954_v14, %s6282_s24 }
 0x762   : > { %6123 = vmatmul.mubr.msk.f32.gmra.mrb[62].mxu1 %vm5254_vm4, %v5229_v29  ;;  %v3925_v29 = vld [vmem:[#allocation3 + $0x109] sm:$0xff] }
 0x763   : > { %v4660_v48 = vpop.permute.xlu1 %4659  ;;  %v4534_v10 = vpop.permute.xlu0 %4533 }
 0x764   : > { %v5165_v57 = vsel %vm2791_vm7, %v5133_v40, %v4660_v48  ;;  %v5134_v0 = vsel %vm5124_vm15, %v5101_v20, %v4534_v10 }
 0x765   : > { %4295 = vrot.lane.b32.xlu1 %v9062_v32, %s6281_s18  ;;  %4169 = vrot.lane.b32.xlu0 %v3954_v14, %s6271_s16  ;;  %v9118_v14 = vld [vmem:[#allocation3 + $0x108] sm:$0xff] }
 0x767   : > { %v9072_v34 = vpop.permute.xlu1 %4279  ;;  %v9074_v18 = vpop.permute.xlu0 %4153 }
 0x769   : > { %4803 = vrot.lane.b32.xlu1 %v3923_v43, %s6278_s25  ;;  %4677 = vrot.lane.b32.xlu0 %v9076_v63, %s6277_s17 }
 0x76b   : > { %v4788_v45 = vpop.permute.xlu1 %4787  ;;  %v4662_v27 = vpop.permute.xlu0 %4661 }
 0x76c   : > { %v5198_v62 = vsel %vm5189_vm3, %v5165_v57, %v4788_v45  ;;  %v5166_v25 = vsel %vm2791_vm7, %v5134_v0, %v4662_v27 }
 0x76d   : > { %4423 = vrot.lane.b32.xlu1 %v3923_v43, %s6272_s21  ;;  %4297 = vrot.lane.b32.xlu0 %v9076_v63, %s6281_s18  ;;  %v5005_v43 = vsel %vm362_vm1, %v8793_v52, %v8746_v6 }
 0x76e   : > { %v5037_v45 = vsel %vm1122_vm2, %v5005_v43, %v9060_v8 }
 0x76f   : > { %v4408_v38 = vpop.permute.xlu1 %4407  ;;  %v9091_v24 = vpop.permute.xlu0 %4281  ;;  %v5070_v27 = vsel %vm5059_vm14, %v5037_v45, %v9072_v34  ;;  %v3959_v45 = vld [vmem:[#allocation3 + $0x122] sm:$0xff] }
 0x770   : > { %v5102_v31 = vsel %vm2758_vm6, %v5070_v27, %v4408_v38  ;;  %v5006_v38 = vsel %vm362_vm1, %v8809_v55, %v8744_v30  ;;  %v3928_v27 = vld [vmem:[#allocation3 + $0x129] sm:$0xff] }
 0x771   : > { %4931 = vrot.lane.b32.xlu1 %v3955_v54, %s6279_s29  ;;  %4805 = vrot.lane.b32.xlu0 %v3924_v2, %s6278_s25  ;;  %v5038_v57 = vsel %vm1122_vm2, %v5006_v38, %v9074_v18 }
 0x773   : > { %v4916_v56 = vpop.permute.xlu1 %4915  ;;  %v4790_v4 = vpop.permute.xlu0 %4789 }
 0x774   : > { %v5230_v22 = vsel %vm2824_vm8, %v5198_v62, %v4916_v56  ;;  %v5199_v13 = vsel %vm5189_vm3, %v5166_v25, %v4790_v4  ;;  %v5071_v62 = vsel %vm5059_vm14, %v5038_v57, %v9091_v24  ;;  %v9188_v25 = vld [vmem:[#allocation3 + $0x128] sm:$0xff]  ;;  %v9230_v57 = vld [vmem:[#allocation3 + $0x138] sm:$0xff] }
 0x775   : > { %4551 = vrot.lane.b32.xlu1 %v3955_v54, %s6282_s24  ;;  %4425 = vrot.lane.b32.xlu0 %v3924_v2, %s6272_s21 }
 0x776   : > { %6125 = vmatprep.mubr.msk.f32.mxu1 %vm5254_vm4, %v5230_v22 }
 0x777   : > { %v4536_v5 = vpop.permute.xlu1 %4535  ;;  %v4410_v35 = vpop.permute.xlu0 %4409 }
 0x778   : > { %v5135_v6 = vsel %vm5124_vm15, %v5102_v31, %v4536_v5  ;;  %v5103_v22 = vsel %vm2758_vm6, %v5071_v62, %v4410_v35  ;;  %v9174_v5 = vld [vmem:[#allocation3 + $0x120] sm:$0xff] }
 0x779   : > { %4171 = vrot.lane.b32.xlu1 %v3955_v54, %s6271_s16  ;;  %4933 = vrot.lane.b32.xlu0 %v3956_v9, %s6279_s29  ;;  %v3926_v54 = vld [vmem:[#allocation3 + $0x111] sm:$0xff] }
 0x77b   : > { %v9116_v47 = vpop.permute.xlu1 %4155  ;;  %v4918_v39 = vpop.permute.xlu0 %4917 }
 0x77c   : > { %v5231_v15 = vsel %vm2824_vm8, %v5199_v13, %v4918_v39  ;;  %v3927_v13 = vld [vmem:[#allocation3 + $0x121] sm:$0xff] }
 0x77d   : > { %4679 = vrot.lane.b32.xlu1 %v9118_v14, %s6277_s17  ;;  %4553 = vrot.lane.b32.xlu0 %v3956_v9, %s6282_s24 }
 0x77e   : > { %6126 = vmatmul.mubr.msk.f32.gmra.mrb[64].mxu1 %vm5254_vm4, %v5231_v15 }
 0x77f   : > { %v4664_v21 = vpop.permute.xlu1 %4663  ;;  %v4538_v36 = vpop.permute.xlu0 %4537 }
 0x780   : > { %v5167_v52 = vsel %vm2791_vm7, %v5135_v6, %v4664_v21  ;;  %v5136_v59 = vsel %vm5124_vm15, %v5103_v22, %v4538_v36  ;;  %v5007_v21 = vsel %vm362_vm1, %v8841_v33, %v8753_v3 }
 0x781   : > { %4299 = vrot.lane.b32.xlu1 %v9118_v14, %s6281_s18  ;;  %4173 = vrot.lane.b32.xlu0 %v3956_v9, %s6271_s16  ;;  %v5039_v36 = vsel %vm1122_vm2, %v5007_v21, %v9116_v47  ;;  %v3930_v21 = vld [vmem:[#allocation3 + $0x141] sm:$0xff] }
 0x783   : > { %v9128_v11 = vpop.permute.xlu1 %4283  ;;  %v9130_v58 = vpop.permute.xlu0 %4157 }
 0x785   : > { %4807 = vrot.lane.b32.xlu1 %v3925_v29, %s6278_s25  ;;  %4681 = vrot.lane.b32.xlu0 %v9132_v46, %s6277_s17 }
 0x787   : > { %v4792_v48 = vpop.permute.xlu1 %4791  ;;  %v4666_v10 = vpop.permute.xlu0 %4665 }
 0x788   : > { %v5200_v8 = vsel %vm5189_vm3, %v5167_v52, %v4792_v48  ;;  %v5168_v30 = vsel %vm2791_vm7, %v5136_v59, %v4666_v10  ;;  %v3929_v59 = vld [vmem:[#allocation3 + $0x139] sm:$0xff] }
 0x789   : > { %4427 = vrot.lane.b32.xlu1 %v3925_v29, %s6272_s21  ;;  %4301 = vrot.lane.b32.xlu0 %v9132_v46, %s6281_s18  ;;  %v5072_v29 = vsel %vm5059_vm14, %v5039_v36, %v9128_v11 }
 0x78b   : > { %v4412_v28 = vpop.permute.xlu1 %4411  ;;  %v9147_v61 = vpop.permute.xlu0 %4285 }
 0x78c   : > { %v5104_v43 = vsel %vm2758_vm6, %v5072_v29, %v4412_v28  ;;  %v5008_v28 = vsel %vm362_vm1, %v8849_v23, %v8751_v19 }
 0x78d   : > { %4935 = vrot.lane.b32.xlu1 %v3957_v60, %s6279_s29  ;;  %4809 = vrot.lane.b32.xlu0 %v3926_v54, %s6278_s25 }
 0x78f   : > { %v4920_v2 = vpop.permute.xlu1 %4919  ;;  %v4794_v40 = vpop.permute.xlu0 %4793 }
 0x790   : > { %v5232_v34 = vsel %vm2824_vm8, %v5200_v8, %v4920_v2  ;;  %v5201_v55 = vsel %vm5189_vm3, %v5168_v30, %v4794_v40  ;;  %v3960_v40 = vld [vmem:[#allocation3 + $0x12a] sm:$0xff] }
 0x791   : > { %4555 = vrot.lane.b32.xlu1 %v3957_v60, %s6282_s24  ;;  %4429 = vrot.lane.b32.xlu0 %v3926_v54, %s6272_s21  ;;  %v5040_v54 = vsel %vm1122_vm2, %v5008_v28, %v9130_v58 }
 0x792   : > { %6128 = vmatprep.mubr.msk.f32.mxu1 %vm5254_vm4, %v5232_v34  ;;  %v5073_v6 = vsel %vm5059_vm14, %v5040_v54, %v9147_v61 }
 0x793   : > { %v4540_v56 = vpop.permute.xlu1 %4539  ;;  %v4414_v4 = vpop.permute.xlu0 %4413 }
 0x794   : > { %v5137_v33 = vsel %vm5124_vm15, %v5104_v43, %v4540_v56  ;;  %v5105_v2 = vsel %vm2758_vm6, %v5073_v6, %v4414_v4 }
 0x795   : > { %4175 = vrot.lane.b32.xlu1 %v3957_v60, %s6271_s16  ;;  %4937 = vrot.lane.b32.xlu0 %v3958_v17, %s6279_s29 }
 0x797   : > { %v9172_v18 = vpop.permute.xlu1 %4159  ;;  %v4922_v1 = vpop.permute.xlu0 %4921 }
 0x798   : > { %v5233_v24 = vsel %vm2824_vm8, %v5201_v55, %v4922_v1  ;;  %v5009_v1 = vsel %vm362_vm1, %v8889_v12, %v8763_v16 }
 0x799   : > { %4683 = vrot.lane.b32.xlu1 %v9174_v5, %s6277_s17  ;;  %4557 = vrot.lane.b32.xlu0 %v3958_v17, %s6282_s24 }
 0x79a   : > { %6129 = vmatmul.mubr.msk.f32.gmra.mrb[66].mxu1 %vm5254_vm4, %v5233_v24  ;;  %v5041_v24 = vsel %vm1122_vm2, %v5009_v1, %v9172_v18 }
 0x79b   : > { %v4668_v35 = vpop.permute.xlu1 %4667  ;;  %v4542_v20 = vpop.permute.xlu0 %4541 }
 0x79c   : > { %v5169_v3 = vsel %vm2791_vm7, %v5137_v33, %v4668_v35  ;;  %v5138_v34 = vsel %vm5124_vm15, %v5105_v2, %v4542_v20  ;;  %v3900_v2 = vld [vmem:[#allocation3 + $0x158] sm:$0xff] }
 0x79d   : > { %4303 = vrot.lane.b32.xlu1 %v9174_v5, %s6281_s18  ;;  %4177 = vrot.lane.b32.xlu0 %v3958_v17, %s6271_s16  ;;  %v9244_v17 = vld [vmem:[#allocation3 + $0x140] sm:$0xff] }
 0x79f   : > { %v9184_v9 = vpop.permute.xlu1 %4287  ;;  %v9186_v0 = vpop.permute.xlu0 %4161 }
 0x7a0   : > { %v5074_v35 = vsel %vm5059_vm14, %v5041_v24, %v9184_v9 }
 0x7a1   : > { %4811 = vrot.lane.b32.xlu1 %v3927_v13, %s6278_s25  ;;  %4685 = vrot.lane.b32.xlu0 %v9188_v25, %s6277_s17 }
 0x7a3   : > { %v4796_v39 = vpop.permute.xlu1 %4795  ;;  %v4670_v15 = vpop.permute.xlu0 %4669 }
 0x7a4   : > { %v5202_v47 = vsel %vm5189_vm3, %v5169_v3, %v4796_v39  ;;  %v5170_v19 = vsel %vm2791_vm7, %v5138_v34, %v4670_v15  ;;  %v3961_v15 = vld [vmem:[#allocation3 + $0x13a] sm:$0xff] }
 0x7a5   : > { %4431 = vrot.lane.b32.xlu1 %v3927_v13, %s6272_s21  ;;  %4305 = vrot.lane.b32.xlu0 %v9188_v25, %s6281_s18 }
 0x7a7   : > { %v4416_v48 = vpop.permute.xlu1 %4415  ;;  %v9203_v10 = vpop.permute.xlu0 %4289 }
 0x7a8   : > { %v5106_v39 = vsel %vm2758_vm6, %v5074_v35, %v4416_v48  ;;  %v5010_v48 = vsel %vm362_vm1, %v8901_v44, %v8761_v42 }
 0x7a9   : > { %4939 = vrot.lane.b32.xlu1 %v3959_v45, %s6279_s29  ;;  %4813 = vrot.lane.b32.xlu0 %v3928_v27, %s6278_s25  ;;  %v5042_v43 = vsel %vm1122_vm2, %v5010_v48, %v9186_v0 }
 0x7ab   : > { %v4924_v31 = vpop.permute.xlu1 %4923  ;;  %v4798_v60 = vpop.permute.xlu0 %4797 }
 0x7ac   : > { %v5234_v11 = vsel %vm2824_vm8, %v5202_v47, %v4924_v31  ;;  %v5203_v23 = vsel %vm5189_vm3, %v5170_v19, %v4798_v60  ;;  %v3962_v47 = vld [vmem:[#allocation3 + $0x142] sm:$0xff]  ;;  %v5011_v19 = vsel %vm362_vm1, %v8946_v7, %v8771_v51 }
 0x7ad   : > { %4559 = vrot.lane.b32.xlu1 %v3959_v45, %s6282_s24  ;;  %4433 = vrot.lane.b32.xlu0 %v3928_v27, %s6272_s21 }
 0x7ae   : > { %6131 = vmatprep.mubr.msk.f32.mxu1 %vm5254_vm4, %v5234_v11  ;;  %v3899_v11 = vld [vmem:[#allocation3 + $0x150] sm:$0xff] }
 0x7af   : > { %v4544_v52 = vpop.permute.xlu1 %4543  ;;  %v4418_v8 = vpop.permute.xlu0 %4417 }
 0x7b0   : > { %v5139_v16 = vsel %vm5124_vm15, %v5106_v39, %v4544_v52 }
 0x7b1   : > { %4179 = vrot.lane.b32.xlu1 %v3959_v45, %s6271_s16  ;;  %4941 = vrot.lane.b32.xlu0 %v3960_v40, %s6279_s29  ;;  %v5075_v45 = vsel %vm5059_vm14, %v5042_v43, %v9203_v10 }
 0x7b2   : > { %v5107_v3 = vsel %vm2758_vm6, %v5075_v45, %v4418_v8  ;;  %v3931_v8 = vld [vmem:[#allocation3 + $0x151] sm:$0xff] }
 0x7b3   : > { %v9228_v58 = vpop.permute.xlu1 %4163  ;;  %v4926_v38 = vpop.permute.xlu0 %4925 }
 0x7b4   : > { %v5235_v61 = vsel %vm2824_vm8, %v5203_v23, %v4926_v38  ;;  %v5043_v23 = vsel %vm1122_vm2, %v5011_v19, %v9228_v58 }
 0x7b5   : > { %4687 = vrot.lane.b32.xlu1 %v9230_v57, %s6277_s17  ;;  %4561 = vrot.lane.b32.xlu0 %v3960_v40, %s6282_s24 }
 0x7b6   : > { %6132 = vmatmul.mubr.msk.f32.gmra.mrb[68].mxu1 %vm5254_vm4, %v5235_v61 }
 0x7b7   : > { %v4672_v62 = vpop.permute.xlu1 %4671  ;;  %v4546_v56 = vpop.permute.xlu0 %4545 }
 0x7b8   : > { %v5171_v12 = vsel %vm2791_vm7, %v5139_v16, %v4672_v62  ;;  %v5140_v31 = vsel %vm5124_vm15, %v5107_v3, %v4546_v56  ;;  %v3902_v3 = vld [vmem:[#allocation3 + $0x170] sm:$0xff] }
 0x7b9   : > { %4307 = vrot.lane.b32.xlu1 %v9230_v57, %s6281_s18  ;;  %4181 = vrot.lane.b32.xlu0 %v3960_v40, %s6271_s16 }
 0x7bb   : > { %v9240_v4 = vpop.permute.xlu1 %4291  ;;  %v9242_v22 = vpop.permute.xlu0 %4165 }
 0x7bc   : > { %v5076_v38 = vsel %vm5059_vm14, %v5043_v23, %v9240_v4  ;;  %v5014_v23 = vsel %vm362_vm1, %v9017_v26, %v8776_v41 }
 0x7bd   : > { %4815 = vrot.lane.b32.xlu1 %v3929_v59, %s6278_s25  ;;  %4689 = vrot.lane.b32.xlu0 %v9244_v17, %s6277_s17 }
 0x7bf   : > { %v4800_v30 = vpop.permute.xlu1 %4799  ;;  %v4674_v55 = vpop.permute.xlu0 %4673 }
 0x7c0   : > { %v5204_v18 = vsel %vm5189_vm3, %v5171_v12, %v4800_v30  ;;  %v5172_v42 = vsel %vm2791_vm7, %v5140_v31, %v4674_v55  ;;  %v3932_v30 = vld [vmem:[#allocation3 + $0x159] sm:$0xff] }
 0x7c1   : > { %4435 = vrot.lane.b32.xlu1 %v3929_v59, %s6272_s21  ;;  %4309 = vrot.lane.b32.xlu0 %v9244_v17, %s6281_s18  ;;  %v3963_v59 = vld [vmem:[#allocation3 + $0x152] sm:$0xff] }
 0x7c3   : > { %v4420_v20 = vpop.permute.xlu1 %4419  ;;  %v9259_v13 = vpop.permute.xlu0 %4293 }
 0x7c4   : > { %v5108_v56 = vsel %vm2758_vm6, %v5076_v38, %v4420_v20  ;;  %v5012_v20 = vsel %vm362_vm1, %v8958_v37, %v8769_v53 }
 0x7c5   : > { %4943 = vrot.lane.b32.xlu1 %v3961_v15, %s6279_s29  ;;  %4817 = vrot.lane.b32.xlu0 %v3930_v21, %s6278_s25  ;;  %v5044_v39 = vsel %vm1122_vm2, %v5012_v20, %v9242_v22 }
 0x7c7   : > { %v4928_v36 = vpop.permute.xlu1 %4927  ;;  %v4802_v29 = vpop.permute.xlu0 %4801 }
 0x7c8   : > { %v5236_v9 = vsel %vm2824_vm8, %v5204_v18, %v4928_v36  ;;  %v5205_v44 = vsel %vm5189_vm3, %v5172_v42, %v4802_v29  ;;  %v3964_v18 = vld [vmem:[#allocation3 + $0x15a] sm:$0xff]  ;;  %v5013_v42 = vsel %vm362_vm1, %v9003_v49, %v8778_v50 }
 0x7c9   : > { %4563 = vrot.lane.b32.xlu1 %v3961_v15, %s6282_s24  ;;  %4437 = vrot.lane.b32.xlu0 %v3930_v21, %s6272_s21 }
 0x7ca   : > { %6134 = vmatprep.mubr.msk.f32.mxu1 %vm5254_vm4, %v5236_v9  ;;  %v3901_v9 = vld [vmem:[#allocation3 + $0x168] sm:$0xff] }
 0x7cb   : > { %v4548_v27 = vpop.permute.xlu1 %4547  ;;  %v4422_v33 = vpop.permute.xlu0 %4421 }
 0x7cc   : > { %v5141_v55 = vsel %vm5124_vm15, %v5108_v56, %v4548_v27 }
 0x7cd   : > { %4183 = vrot.lane.b32.xlu1 %v3961_v15, %s6271_s16  ;;  %4945 = vrot.lane.b32.xlu0 %v3962_v47, %s6279_s29  ;;  %v5077_v15 = vsel %vm5059_vm14, %v5044_v39, %v9259_v13 }
 0x7ce   : > { %v5109_v12 = vsel %vm2758_vm6, %v5077_v15, %v4422_v33  ;;  %v3933_v33 = vld [vmem:[#allocation3 + $0x169] sm:$0xff]  ;;  %v3935_v15 = vld [vmem:[#allocation3 + $0x181] sm:$0xff] }
 0x7cf   : > { %v9284_v0 = vpop.permute.xlu1 %4167  ;;  %v4930_v60 = vpop.permute.xlu0 %4929 }
 0x7d0   : > { %v5237_v10 = vsel %vm2824_vm8, %v5205_v44, %v4930_v60  ;;  %v5045_v44 = vsel %vm1122_vm2, %v5013_v42, %v9284_v0  ;;  %v6283_v42 = vmov 0  }
 0x7d1   : > { %4691 = vrot.lane.b32.xlu1 %v3899_v11, %s6277_s17  ;;  %4565 = vrot.lane.b32.xlu0 %v3962_v47, %s6282_s24 }
 0x7d2   : > { %6135 = vmatmul.mubr.msk.f32.gmra.mrb[70].mxu1 %vm5254_vm4, %v5237_v10  ;;  %6256 = vset.pattern.permute.xlu0 %v6283_v42 }
 0x7d3   : > { %v4676_v28 = vpop.permute.xlu1 %4675  ;;  %v4550_v54 = vpop.permute.xlu0 %4549 }
 0x7d4   : > { %v5173_v7 = vsel %vm2791_vm7, %v5141_v55, %v4676_v28  ;;  %v5142_v36 = vsel %vm5124_vm15, %v5109_v12, %v4550_v54  ;;  %v3965_v54 = vld [vmem:[#allocation3 + $0x16a] sm:$0xff]  ;;  %v3966_v55 = vld [vmem:[#allocation3 + $0x172] sm:$0xff] }
 0x7d5   : > { %4311 = vrot.lane.b32.xlu1 %v3899_v11, %s6281_s18  ;;  %4185 = vrot.lane.b32.xlu0 %v3962_v47, %s6271_s16 }
 0x7d7   : > { %v9292_v6 = vpop.permute.xlu1 %4295  ;;  %v9294_v52 = vpop.permute.xlu0 %4169 }
 0x7d8   : > { %v5078_v60 = vsel %vm5059_vm14, %v5045_v44, %v9292_v6  ;;  %v5046_v38 = vsel %vm1122_vm2, %v5014_v23, %v9294_v52 }
 0x7d9   : > { %4819 = vrot.lane.b32.xlu1 %v3931_v8, %s6278_s25  ;;  %4693 = vrot.lane.b32.xlu0 %v3900_v2, %s6277_s17 }
 0x7db   : > { %v4804_v40 = vpop.permute.xlu1 %4803  ;;  %v4678_v34 = vpop.permute.xlu0 %4677 }
 0x7dc   : > { %v5206_v4 = vsel %vm5189_vm3, %v5173_v7, %v4804_v40  ;;  %v5174_v53 = vsel %vm2791_vm7, %v5142_v36, %v4678_v34 }
 0x7dd   : > { %4439 = vrot.lane.b32.xlu1 %v3931_v8, %s6272_s21  ;;  %4313 = vrot.lane.b32.xlu0 %v3900_v2, %s6281_s18  ;;  %v3934_v8 = vld [vmem:[#allocation3 + $0x171] sm:$0xff] }
 0x7df   : > { %v4424_v61 = vpop.permute.xlu1 %4423  ;;  %v9307_v62 = vpop.permute.xlu0 %4297 }
 0x7e0   : > { %v5110_v28 = vsel %vm2758_vm6, %v5078_v60, %v4424_v61  ;;  %v5079_v61 = vsel %vm5059_vm14, %v5046_v38, %v9307_v62  ;;  %v9614_v60 = vld [vmem:[#allocation8_spill] sm:$0xff] }
 0x7e1   : > { %v9311_v51 = vpop.f32.mrb[56].mxu1  ;;  %4947 = vrot.lane.b32.xlu1 %v3963_v59, %s6279_s29  ;;  %4821 = vrot.lane.b32.xlu0 %v3932_v30, %s6278_s25 }
 0x7e2   : > { %v9316_v58 = vpop.f32.mrb[57].mxu1 }
 0x7e3   : > { %v4932_v1 = vpop.permute.xlu1 %4931  ;;  %v4806_v24 = vpop.permute.xlu0 %4805 }
 0x7e4   : > { %v5238_v35 = vsel %vm2824_vm8, %v5206_v4, %v4932_v1  ;;  %v5207_v37 = vsel %vm5189_vm3, %v5174_v53, %v4806_v24  ;;  %v3903_v1 = vld [vmem:[#allocation3 + $0x180] sm:$0xff] }
 0x7e5   : > { %4567 = vrot.lane.b32.xlu1 %v3963_v59, %s6282_s24  ;;  %4441 = vrot.lane.b32.xlu0 %v3932_v30, %s6272_s21 }
 0x7e6   : > { %6137 = vmatprep.mubr.msk.f32.mxu1 %vm5254_vm4, %v5238_v35 }
 0x7e7   : > { %v4552_v21 = vpop.permute.xlu1 %4551  ;;  %v4426_v16 = vpop.permute.xlu0 %4425 }
 0x7e8   : > { %v5143_v2 = vsel %vm5124_vm15, %v5110_v28, %v4552_v21  ;;  %v5111_v30 = vsel %vm2758_vm6, %v5079_v61, %v4426_v16  ;;  %v3904_v21 = vld [vmem:[#allocation3 + $0x188] sm:$0xff]  ;;  %v5643_v61 = vld [vmem:[%s9595_s8] sm:$0xf] }
 0x7e9   : > { %4187 = vrot.lane.b32.xlu1 %v3963_v59, %s6271_s16  ;;  %4949 = vrot.lane.b32.xlu0 %v3964_v18, %s6279_s29 }
 0x7eb   : > { %v9336_v22 = vpop.permute.xlu1 %4171  ;;  %v4934_v29 = vpop.permute.xlu0 %4933 }
 0x7ec   : > { %v5239_v13 = vsel %vm2824_vm8, %v5207_v37, %v4934_v29 }
 0x7ed   : > { %4695 = vrot.lane.b32.xlu1 %v3901_v9, %s6277_s17  ;;  %4569 = vrot.lane.b32.xlu0 %v3964_v18, %s6282_s24 }
 0x7ee   : > { %6138 = vmatmul.mubr.msk.f32.gmra.mrb[72].mxu1 %vm5254_vm4, %v5239_v13 }
 0x7ef   : > { %v4680_v48 = vpop.permute.xlu1 %4679  ;;  %v4554_v43 = vpop.permute.xlu0 %4553 }
 0x7f0   : > { %v5175_v49 = vsel %vm2791_vm7, %v5143_v2, %v4680_v48  ;;  %v5144_v7 = vsel %vm5124_vm15, %v5111_v30, %v4554_v43  ;;  %v3967_v48 = vld [vmem:[#allocation3 + $0x182] sm:$0xff] }
 0x7f1   : > { %4315 = vrot.lane.b32.xlu1 %v3901_v9, %s6281_s18  ;;  %4189 = vrot.lane.b32.xlu0 %v3964_v18, %s6271_s16  ;;  %v9613_v18 = vld [vmem:[#allocation9_spill] sm:$0xff]  ;;  %v3936_v43 = vld [vmem:[#allocation3 + $0x189] sm:$0xff] }
 0x7f2   : > { %v5015_v36 = vsel %vm362_vm1, %v9062_v32, %v9613_v18 }
 0x7f3   : > { %v9344_v45 = vpop.permute.xlu1 %4299  ;;  %v9346_v27 = vpop.permute.xlu0 %4173  ;;  %v5047_v53 = vsel %vm1122_vm2, %v5015_v36, %v9336_v22 }
 0x7f4   : > { %v5080_v37 = vsel %vm5059_vm14, %v5047_v53, %v9344_v45 }
 0x7f5   : > { %4823 = vrot.lane.b32.xlu1 %v3933_v33, %s6278_s25  ;;  %4697 = vrot.lane.b32.xlu0 %v3902_v3, %s6277_s17 }
 0x7f7   : > { %v4808_v47 = vpop.permute.xlu1 %4807  ;;  %v4682_v31 = vpop.permute.xlu0 %4681 }
 0x7f8   : > { %v5208_v6 = vsel %vm5189_vm3, %v5175_v49, %v4808_v47  ;;  %v5176_v41 = vsel %vm2791_vm7, %v5144_v7, %v4682_v31 }
 0x7f9   : > { %4443 = vrot.lane.b32.xlu1 %v3933_v33, %s6272_s21  ;;  %4317 = vrot.lane.b32.xlu0 %v3902_v3, %s6281_s18 }
 0x7fb   : > { %v4428_v10 = vpop.permute.xlu1 %4427  ;;  %v9359_v11 = vpop.permute.xlu0 %4301 }
 0x7fc   : > { %v5112_v9 = vsel %vm2758_vm6, %v5080_v37, %v4428_v10  ;;  %v5016_v10 = vsel %vm362_vm1, %v9076_v63, %v9614_v60  ;;  %v9616_v37 = vld [vmem:[#allocation10_spill] sm:$0xff] }
 0x7fd   : > { %v9363_v50 = vpop.f32.mrb[58].mxu1  ;;  %4951 = vrot.lane.b32.xlu1 %v3965_v54, %s6279_s29  ;;  %4825 = vrot.lane.b32.xlu0 %v3934_v8, %s6278_s25  ;;  %v5048_v28 = vsel %vm1122_vm2, %v5016_v10, %v9346_v27  ;;  %v3969_v27 = vld [vmem:[#allocation3 + $0x19a] sm:$0xff] }
 0x7fe   : > { %v9368_v0 = vpop.f32.mrb[59].mxu1 }
 0x7ff   : > { %v4936_v40 = vpop.permute.xlu1 %4935  ;;  %v4810_v34 = vpop.permute.xlu0 %4809 }
 0x800   : > { %v5240_v19 = vsel %vm2824_vm8, %v5208_v6, %v4936_v40  ;;  %v5209_v26 = vsel %vm5189_vm3, %v5176_v41, %v4810_v34  ;;  %v3873_v6 = vld [vmem:[#allocation3 + $0x18a] sm:$0xff]  ;;  %v3970_v34 = vld [vmem:[#allocation3 + $0x1a2] sm:$0xff] }
 0x801   : > { %4571 = vrot.lane.b32.xlu1 %v3965_v54, %s6282_s24  ;;  %4445 = vrot.lane.b32.xlu0 %v3934_v8, %s6272_s21 }
 0x802   : > { %6140 = vmatprep.mubr.msk.f32.mxu1 %vm5254_vm4, %v5240_v19 }
 0x803   : > { %v4556_v56 = vpop.permute.xlu1 %4555  ;;  %v4430_v59 = vpop.permute.xlu0 %4429 }
 0x804   : > { %v5145_v33 = vsel %vm5124_vm15, %v5112_v9, %v4556_v56 }
 0x805   : > { %4191 = vrot.lane.b32.xlu1 %v3965_v54, %s6271_s16  ;;  %4953 = vrot.lane.b32.xlu0 %v3966_v55, %s6279_s29  ;;  %v5081_v54 = vsel %vm5059_vm14, %v5048_v28, %v9359_v11 }
 0x806   : > { %v5113_v49 = vsel %vm2758_vm6, %v5081_v54, %v4430_v59  ;;  %v9617_v54 = vld [vmem:[#allocation13_spill] sm:$0xff] }
 0x807   : > { %v9388_v52 = vpop.permute.xlu1 %4175  ;;  %v4938_v4 = vpop.permute.xlu0 %4937 }
 0x808   : > { %v5241_v62 = vsel %vm2824_vm8, %v5209_v26, %v4938_v4  ;;  %v9615_v26 = vld [vmem:[#allocation11_spill] sm:$0xff] }
 0x809   : > { %4699 = vrot.lane.b32.xlu1 %v3903_v1, %s6277_s17  ;;  %4573 = vrot.lane.b32.xlu0 %v3966_v55, %s6282_s24  ;;  %v5017_v4 = vsel %vm362_vm1, %v9118_v14, %v9615_v26 }
 0x80a   : > { %6141 = vmatmul.mubr.msk.f32.gmra.mrb[74].mxu1 %vm5254_vm4, %v5241_v62  ;;  %v5049_v62 = vsel %vm1122_vm2, %v5017_v4, %v9388_v52 }
 0x80b   : > { %v4684_v24 = vpop.permute.xlu1 %4683  ;;  %v4558_v35 = vpop.permute.xlu0 %4557 }
 0x80c   : > { %v5177_v22 = vsel %vm2791_vm7, %v5145_v33, %v4684_v24  ;;  %v5146_v40 = vsel %vm5124_vm15, %v5113_v49, %v4558_v35 }
 0x80d   : > { %4319 = vrot.lane.b32.xlu1 %v3903_v1, %s6281_s18  ;;  %4193 = vrot.lane.b32.xlu0 %v3966_v55, %s6271_s16 }
 0x80f   : > { %v9396_v20 = vpop.permute.xlu1 %4303  ;;  %v9398_v39 = vpop.permute.xlu0 %4177 }
 0x810   : > { %v5082_v1 = vsel %vm5059_vm14, %v5049_v62, %v9396_v20  ;;  %v5018_v20 = vsel %vm362_vm1, %v9132_v46, %v9616_v37 }
 0x811   : > { %4827 = vrot.lane.b32.xlu1 %v3935_v15, %s6278_s25  ;;  %4701 = vrot.lane.b32.xlu0 %v3904_v21, %s6277_s17  ;;  %s5866_s17 = sshll.u32 %s9630_s10, 3 }
 0x812   : > { %s352_s26 = scalar_lea.vmem %s9596_s9, %s5866_s17 }
 0x813   : > { %v4812_v16 = vpop.permute.xlu1 %4811  ;;  %v4686_v12 = vpop.permute.xlu0 %4685 }
 0x814   : > { %v5210_v45 = vsel %vm5189_vm3, %v5177_v22, %v4812_v16  ;;  %v5178_v63 = vsel %vm2791_vm7, %v5146_v40, %v4686_v12 }
 0x815   : > { %4447 = vrot.lane.b32.xlu1 %v3935_v15, %s6272_s21  ;;  %4321 = vrot.lane.b32.xlu0 %v3904_v21, %s6281_s18 }
 0x817   : > { %v4432_v29 = vpop.permute.xlu1 %4431  ;;  %v9411_v13 = vpop.permute.xlu0 %4305 }
 0x818   : > { %v5114_v15 = vsel %vm2758_vm6, %v5082_v1, %v4432_v29  ;;  %v5050_v29 = vsel %vm1122_vm2, %v5018_v20, %v9398_v39 }
 0x819   : > { %v9415_v32 = vpop.f32.mrb[60].mxu1  ;;  %4955 = vrot.lane.b32.xlu1 %v3967_v48, %s6279_s29  ;;  %4829 = vrot.lane.b32.xlu0 %v3936_v43, %s6278_s25  ;;  %v5083_v9 = vsel %vm5059_vm14, %v5050_v29, %v9411_v13 }
 0x81a   : > { %v9420_v3 = vpop.f32.mrb[61].mxu1 }
 0x81b   : > { %v4940_v47 = vpop.permute.xlu1 %4939  ;;  %v4814_v31 = vpop.permute.xlu0 %4813 }
 0x81c   : > { %v5242_v44 = vsel %vm2824_vm8, %v5210_v45, %v4940_v47  ;;  %v5211_v19 = vsel %vm5189_vm3, %v5178_v63, %v4814_v31 }
 0x81d   : > { %4575 = vrot.lane.b32.xlu1 %v3967_v48, %s6282_s24  ;;  %4449 = vrot.lane.b32.xlu0 %v3936_v43, %s6272_s21 }
 0x81e   : > { %6143 = vmatprep.mubr.msk.f32.mxu1 %vm5254_vm4, %v5242_v44 }
 0x81f   : > { %v4560_v8 = vpop.permute.xlu1 %4559  ;;  %v4434_v2 = vpop.permute.xlu0 %4433 }
 0x820   : > { %v5147_v21 = vsel %vm5124_vm15, %v5114_v15, %v4560_v8  ;;  %v5115_v33 = vsel %vm2758_vm6, %v5083_v9, %v4434_v2  ;;  %v5019_v8 = vsel %vm362_vm1, %v9174_v5, %v9617_v54 }
 0x821   : > { %4577 = vrot.lane.b32.xlu1 %v3873_v6, %s6282_s24  ;;  %4957 = vrot.lane.b32.xlu0 %v3873_v6, %s6279_s29 }
 0x823   : > { %v4180_v23 = vpop.permute.xlu1 %4179  ;;  %v4942_v38 = vpop.permute.xlu0 %4941 }
 0x824   : > { %v5243_v11 = vsel %vm2824_vm8, %v5211_v19, %v4942_v38  ;;  %v5051_v2 = vsel %vm1122_vm2, %v5019_v8, %v4180_v23 }
 0x825   : > { %4961 = vrot.lane.b32.xlu1 %v3970_v34, %s6279_s29  ;;  %4959 = vrot.lane.b32.xlu0 %v3969_v27, %s6279_s29 }
 0x826   : > { %6144 = vmatmul.mubr.msk.f32.gmra.mrb[76].mxu1 %vm5254_vm4, %v5243_v11 }
 0x827   : > { %v4688_v56 = vpop.permute.xlu1 %4687  ;;  %v4562_v59 = vpop.permute.xlu0 %4561 }
 0x828   : > { %v5179_v12 = vsel %vm2791_vm7, %v5147_v21, %v4688_v56  ;;  %v5148_v22 = vsel %vm5124_vm15, %v5115_v33, %v4562_v59 }
 0x829   : > { %5646 = vperm.xlu0 %6256, %v5643_v61   ;;  %v9618_v61 = vld [vmem:[#allocation12_spill] sm:$0xff] }
 0x82a   : > { %v5020_v56 = vsel %vm362_vm1, %v9188_v25, %v9618_v61 }
 0x82b   : > { %v4308_v30 = vpop.permute.xlu1 %4307  ;;  %v4182_v55 = vpop.permute.xlu0 %4181 }
 0x82c   : > { %v5084_v49 = vsel %vm5059_vm14, %v5051_v2, %v4308_v30  ;;  %v5052_v59 = vsel %vm1122_vm2, %v5020_v56, %v4182_v55 }
 0x82f   : > { %v4816_v7 = vpop.permute.xlu1 %4815  ;;  %v4690_v41 = vpop.permute.xlu0 %4689 }
 0x830   : > { %v5212_v36 = vsel %vm5189_vm3, %v5179_v12, %v4816_v7  ;;  %v5180_v45 = vsel %vm2791_vm7, %v5148_v22, %v4690_v41  ;;  %v9619_v12 = vld [vmem:[#allocation15_spill] sm:$0xff] }
 0x833   : > { %v4436_v24 = vpop.permute.xlu1 %4435  ;;  %v4310_v35 = vpop.permute.xlu0 %4309 }
 0x834   : > { %v5116_v63 = vsel %vm2758_vm6, %v5084_v49, %v4436_v24  ;;  %v5085_v30 = vsel %vm5059_vm14, %v5052_v59, %v4310_v35 }
 0x835   : > { %v9456_v16 = vpop.f32.mrb[62].mxu1 }
 0x836   : > { %v5450_v18 = vpop.f32.mrb[63].mxu1 }
 0x837   : > { %v4944_v14 = vpop.permute.xlu1 %4943  ;;  %v4818_v53 = vpop.permute.xlu0 %4817 }
 0x838   : > { %v5244_v52 = vsel %vm2824_vm8, %v5212_v36, %v4944_v14  ;;  %v5213_v47 = vsel %vm5189_vm3, %v5180_v45, %v4818_v53  ;;  %v5021_v36 = vsel %vm362_vm1, %v9230_v57, %v9619_v12  ;;  %v9624_v12 = vld [vmem:[#allocation18_spill] sm:$0xff] }
 0x839   : > { %6146 = vmatprep.mubr.msk.f32.mxu1 %vm5254_vm4, %v5244_v52 }
 0x83b   : > { %v4564_v48 = vpop.permute.xlu1 %4563  ;;  %v4438_v43 = vpop.permute.xlu0 %4437 }
 0x83c   : > { %v5149_v34 = vsel %vm5124_vm15, %v5116_v63, %v4564_v48  ;;  %v5117_v41 = vsel %vm2758_vm6, %v5085_v30, %v4438_v43 }
 0x83f   : > { %v4184_v31 = vpop.permute.xlu1 %4183  ;;  %v4946_v46 = vpop.permute.xlu0 %4945 }
 0x840   : > { %v5245_v42 = vsel %vm2824_vm8, %v5213_v47, %v4946_v46  ;;  %v5053_v14 = vsel %vm1122_vm2, %v5021_v36, %v4184_v31 }
 0x841   : > { %6147 = vmatmul.mubr.msk.f32.gmra.mrb[78].mxu1 %vm5254_vm4, %v5245_v42 }
 0x843   : > { %v4692_v39 = vpop.permute.xlu1 %4691  ;;  %v4566_v44 = vpop.permute.xlu0 %4565 }
 0x844   : > { %v5181_v19 = vsel %vm2791_vm7, %v5149_v34, %v4692_v39  ;;  %v5150_v26 = vsel %vm5124_vm15, %v5117_v41, %v4566_v44 }
 0x847   : > { %v4312_v60 = vpop.permute.xlu1 %4311  ;;  %v9475_v13 = vpop.permute.xlu0 %4185 }
 0x84b   : > { %v4820_v10 = vpop.permute.xlu1 %4819  ;;  %v4694_v28 = vpop.permute.xlu0 %4693 }
 0x84c   : > { %v5214_v5 = vsel %vm5189_vm3, %v5181_v19, %v4820_v10  ;;  %v5182_v4 = vsel %vm2791_vm7, %v5150_v26, %v4694_v28  ;;  %v9622_v26 = vld [vmem:[#allocation16_spill] sm:$0xff] }
 0x84e   : > { %5579 = vxpose.xlu1.b32.start [1/16] (narrow) %v9316_v58, 8 }
 0x84f   : > { %v4440_v6 = vpop.permute.xlu1 %4439  ;;  %v4314_v40 = vpop.permute.xlu0 %4313 }
 0x851   : > { %v6127_v27 = vpop.f32.mrb[64].mxu1 }
 0x852   : > { %v5460_v38 = vpop.f32.mrb[65].mxu1  ;;  %5580 = vxpose.xlu1.b32.cont [2/16] (narrow) %v9311_v51, 8 }
 0x853   : > { %v4948_v11 = vpop.permute.xlu1 %4947  ;;  %v4822_v23 = vpop.permute.xlu0 %4821 }
 0x854   : > { %v5246_v58 = vsel %vm2824_vm8, %v5214_v5, %v4948_v11  ;;  %v5215_v25 = vsel %vm5189_vm3, %v5182_v4, %v4822_v23 }
 0x855   : > { %6149 = vmatprep.mubr.msk.f32.mxu1 %vm5254_vm4, %v5246_v58 }
 0x856   : > { %5581 = vxpose.xlu1.b32.cont [3/16] (narrow) %v9368_v0, 8 }
 0x857   : > { %v4568_v7 = vpop.permute.xlu1 %4567  ;;  %v4442_v51 = vpop.permute.xlu0 %4441 }
 0x85a   : > { %5582 = vxpose.xlu1.b32.cont [4/16] (narrow) %v9363_v50, 8 }
 0x85b   : > { %v4188_v62 = vpop.permute.xlu1 %4187  ;;  %v4950_v1 = vpop.permute.xlu0 %4949 }
 0x85c   : > { %v5247_v55 = vsel %vm2824_vm8, %v5215_v25, %v4950_v1  ;;  %v9623_v25 = vld [vmem:[#allocation19_spill] sm:$0xff] }
 0x85d   : > { %6150 = vmatmul.mubr.msk.f32.gmra.mrb[80].mxu1 %vm5254_vm4, %v5247_v55 }
 0x85e   : > { %5583 = vxpose.xlu1.b32.cont [5/16] (narrow) %v9420_v3, 8  ;;  %v5086_v3 = vsel %vm5059_vm14, %v5053_v14, %v4312_v60 }
 0x85f   : > { %v4696_v0 = vpop.permute.xlu1 %4695  ;;  %v4570_v24 = vpop.permute.xlu0 %4569 }
 0x862   : > { %5584 = vxpose.xlu1.b32.cont [6/16] (narrow) %v9415_v32, 8  ;;  %v5118_v32 = vsel %vm2758_vm6, %v5086_v3, %v4440_v6  ;;  %v3710_v6 = vld [vmem:[#allocation3 + $0x150] sm:$0xff] }
 0x863   : > { %v4316_v35 = vpop.permute.xlu1 %4315  ;;  %v9505_v15 = vpop.permute.xlu0 %4189  ;;  %v5151_v37 = vsel %vm5124_vm15, %v5118_v32, %v4568_v7  ;;  %v3711_v7 = vld [vmem:[#allocation3 + $0x158] sm:$0xff] }
 0x864   : > { %v5024_v4 = vsel %vm362_vm1, %v3711_v7, %v9622_v26 }
 0x865   : > { %v5056_v1 = vsel %vm1122_vm2, %v5024_v4, %v9505_v15 }
 0x866   : > { %5585 = vxpose.xlu1.b32.cont [7/16] (narrow) %v5450_v18, 8  ;;  %v5183_v18 = vsel %vm2791_vm7, %v5151_v37, %v4696_v0  ;;  %v3713_v0 = vld [vmem:[#allocation3 + $0x170] sm:$0xff] }
 0x867   : > { %v4824_v21 = vpop.permute.xlu1 %4823  ;;  %v4698_v50 = vpop.permute.xlu0 %4697  ;;  %v5026_v36 = vsel %vm362_vm1, %v3713_v0, %v9624_v12 }
 0x868   : > { %v5216_v9 = vsel %vm5189_vm3, %v5183_v18, %v4824_v21 }
 0x86a   : > { %5586 = vxpose.xlu1.b32.cont [8/16] (narrow) %v9456_v16, 8  ;;  %v9620_v16 = vld [vmem:[#allocation14_spill] sm:$0xff] }
 0x86b   : > { %v4444_v53 = vpop.permute.xlu1 %4443  ;;  %v4318_v52 = vpop.permute.xlu0 %4317  ;;  %v5022_v33 = vsel %vm362_vm1, %v9244_v17, %v9620_v16 }
 0x86c   : > { %v5054_v22 = vsel %vm1122_vm2, %v5022_v33, %v9475_v13  ;;  %v9626_v33 = vld [vmem:[#allocation6_spill] sm:$0xff] }
 0x86d   : > { %v6130_v20 = vpop.f32.mrb[66].mxu1  ;;  %v5087_v45 = vsel %vm5059_vm14, %v5054_v22, %v4314_v40  ;;  %v9621_v40 = vld [vmem:[#allocation17_spill] sm:$0xff] }
 0x86e   : > { %v5470_v29 = vpop.f32.mrb[67].mxu1  ;;  %5587 = vxpose.xlu1.b32.cont [9/16] (narrow) %v5460_v38, 8  ;;  %v5119_v46 = vsel %vm2758_vm6, %v5087_v45, %v4442_v51  ;;  %v5023_v63 = vsel %vm362_vm1, %v3710_v6, %v9621_v40  ;;  %v3712_v51 = vld [vmem:[#allocation3 + $0x168] sm:$0xff] }
 0x86f   : > { %v4952_v57 = vpop.permute.xlu1 %4951  ;;  %v4826_v48 = vpop.permute.xlu0 %4825  ;;  %v5152_v42 = vsel %vm5124_vm15, %v5119_v46, %v4570_v24  ;;  %v5055_v34 = vsel %vm1122_vm2, %v5023_v63, %v4188_v62  ;;  %v5025_v62 = vsel %vm362_vm1, %v3712_v51, %v9623_v25  ;;  %v5089_v24 = vsel %vm5059_vm14, %v5056_v1, %v4318_v52  ;;  %v9627_v45 = vld [vmem:[#allocation7_spill] sm:$0xff]  ;;  %v9628_v46 = vld [vmem:[#allocation5_spill] sm:$0xff] }
 0x870   : > { %v5248_v43 = vsel %vm2824_vm8, %v5216_v9, %v4952_v57  ;;  %v5184_v39 = vsel %vm2791_vm7, %v5152_v42, %v4698_v50  ;;  %v9625_v57 = vld [vmem:[#allocation4_spill] sm:$0xff] }
 0x871   : > { %6152 = vmatprep.mubr.msk.f32.mxu1 %vm5254_vm4, %v5248_v43  ;;  %v5217_v44 = vsel %vm5189_vm3, %v5184_v39, %v4826_v48 }
 0x872   : > { %5588 = vxpose.xlu1.b32.cont [10/16] (narrow) %v6127_v27, 8  ;;  %v5088_v27 = vsel %vm5059_vm14, %v5055_v34, %v4316_v35 }
 0x873   : > { %v4572_v47 = vpop.permute.xlu1 %4571  ;;  %v4446_v31 = vpop.permute.xlu0 %4445  ;;  %v5120_v5 = vsel %vm2758_vm6, %v5088_v27, %v4444_v53 }
 0x874   : > { %v5153_v11 = vsel %vm5124_vm15, %v5120_v5, %v4572_v47  ;;  %v5121_v14 = vsel %vm2758_vm6, %v5089_v24, %v4446_v31 }
 0x876   : > { %5589 = vxpose.xlu1.b32.cont [11/16] (narrow) %v5470_v29, 8 }
 0x877   : > { %v4192_v17 = vpop.permute.xlu1 %4191  ;;  %v4954_v60 = vpop.permute.xlu0 %4953 }
 0x878   : > { %v5249_v10 = vsel %vm2824_vm8, %v5217_v44, %v4954_v60  ;;  %v5057_v55 = vsel %vm1122_vm2, %v5025_v62, %v4192_v17 }
 0x879   : > { %6153 = vmatmul.mubr.msk.f32.gmra.mrb[82].mxu1 %vm5254_vm4, %v5249_v10 }
 0x87a   : > { %5590 = vxpose.xlu1.b32.cont [12/16] (narrow) %v6130_v20, 8 }
 0x87b   : > { %v4700_v13 = vpop.permute.xlu1 %4699  ;;  %v4574_v28 = vpop.permute.xlu0 %4573 }
 0x87c   : > { %v5185_v58 = vsel %vm2791_vm7, %v5153_v11, %v4700_v13  ;;  %v5154_v53 = vsel %vm5124_vm15, %v5121_v14, %v4574_v28 }
 0x87f   : > { %v4320_v54 = vpop.permute.xlu1 %4319  ;;  %v4194_v8 = vpop.permute.xlu0 %4193 }
 0x880   : > { %v5090_v35 = vsel %vm5059_vm14, %v5057_v55, %v4320_v54  ;;  %v5058_v15 = vsel %vm1122_vm2, %v5026_v36, %v4194_v8 }
 0x883   : > { %v4828_v2 = vpop.permute.xlu1 %4827  ;;  %v4702_v49 = vpop.permute.xlu0 %4701 }
 0x884   : > { %v5218_v56 = vsel %vm5189_vm3, %v5185_v58, %v4828_v2  ;;  %v5186_v52 = vsel %vm2791_vm7, %v5154_v53, %v4702_v49 }
 0x887   : > { %v4448_v19 = vpop.permute.xlu1 %4447  ;;  %v4322_v38 = vpop.permute.xlu0 %4321 }
 0x888   : > { %v5122_v3 = vsel %vm2758_vm6, %v5090_v35, %v4448_v19  ;;  %v5091_v37 = vsel %vm5059_vm14, %v5058_v15, %v4322_v38 }
 0x889   : > { %v6133_v23 = vpop.f32.mrb[68].mxu1 }
 0x88a   : > { %v5480_v61 = vpop.f32.mrb[69].mxu1 }
 0x88b   : > { %5591 = vxpose.xlu1.b32.cont [13/16] (narrow) %v5480_v61, 8  ;;  %v4956_v59 = vpop.permute.xlu1 %4955  ;;  %v4830_v30 = vpop.permute.xlu0 %4829 }
 0x88c   : > { %v5250_v41 = vsel %vm2824_vm8, %v5218_v56, %v4956_v59  ;;  %v5219_v20 = vsel %vm5189_vm3, %v5186_v52, %v4830_v30 }
 0x88d   : > { %6155 = vmatprep.mubr.msk.f32.mxu1 %vm5254_vm4, %v5250_v41 }
 0x88f   : > { %5592 = vxpose.xlu1.b32.cont [14/16] (narrow) %v6133_v23, 8  ;;  %v4576_v21 = vpop.permute.xlu1 %4575  ;;  %v4450_v50 = vpop.permute.xlu0 %4449 }
 0x890   : > { %v5155_v32 = vsel %vm5124_vm15, %v5122_v3, %v4576_v21  ;;  %v5123_v18 = vsel %vm2758_vm6, %v5091_v37, %v4450_v50 }
 0x891   : > { %v5187_v48 = vsel %vm2791_vm7, %v5155_v32, %v9625_v57 }
 0x892   : > { %v5220_v42 = vsel %vm5189_vm3, %v5187_v48, %v9628_v46 }
 0x893   : > { %v4578_v29 = vpop.permute.xlu1 %4577  ;;  %v4958_v9 = vpop.permute.xlu0 %4957 }
 0x894   : > { %v5156_v43 = vsel %vm5124_vm15, %v5123_v18, %v4578_v29  ;;  %v5251_v16 = vsel %vm2824_vm8, %v5219_v20, %v4958_v9 }
 0x895   : > { %v5188_v22 = vsel %vm2791_vm7, %v5156_v43, %v9626_v33  ;;  %6156 = vmatmul.mubr.msk.f32.gmra.mrb[84].mxu1 %vm5254_vm4, %v5251_v16 }
 0x896   : > { %v5221_v47 = vsel %vm5189_vm3, %v5188_v22, %v9627_v45 }
 0x897   : > { %v4962_v31 = vpop.permute.xlu1 %4961  ;;  %v4960_v39 = vpop.permute.xlu0 %4959 }
 0x898   : > { %v5253_v44 = vsel %vm2824_vm8, %v5221_v47, %v4962_v31  ;;  %v5252_v17 = vsel %vm2824_vm8, %v5220_v42, %v4960_v39 }
 0x899   : > { %6158 = vmatprep.mubr.msk.f32.mxu1 %vm5254_vm4, %v5252_v17 }
 0x89a   : > { %6159 = vmatmul.mubr.msk.f32.gmra.mrb[86].mxu1 %vm5254_vm4, %v5253_v44 }
 0x8a5   : > { %v6136_v60 = vpop.f32.mrb[70].mxu1 }
 0x8a6   : > { %v5490_v10 = vpop.f32.mrb[71].mxu1 }
 0x8a7   : > { %5593 = vxpose.xlu1.b32.cont [15/16] (narrow) %v5490_v10, 8 }
 0x8a8   : > { %v5647_v58 = vpop.permute.xlu0 %5646 }
 0x8ab   : > { %5594 = vxpose.xlu1.b32.end [16/16] (narrow) %v6136_v60, 8 }
 0x8c1   : > { %v6139_v13 = vpop.f32.mrb[72].mxu1 }
 0x8c2   : > { %v5500_v28 = vpop.f32.mrb[73].mxu1 }
 0x8c3   : > { %5611 = vxpose.xlu0.b32.start [1/16] (narrow) %v5500_v28, 8 }
 0x8c7   : > { %5612 = vxpose.xlu0.b32.cont [2/16] (narrow) %v6139_v13, 8 }
 0x8dd   : > { %v6142_v54 = vpop.f32.mrb[74].mxu1 }
 0x8de   : > { %v5510_v8 = vpop.f32.mrb[75].mxu1 }
 0x8df   : > { %5613 = vxpose.xlu0.b32.cont [3/16] (narrow) %v5510_v8, 8 }
 0x8e3   : > { %5614 = vxpose.xlu0.b32.cont [4/16] (narrow) %v6142_v54, 8 }
 0x8ef   : > { %v5595_v61 = vpop.trf.xlu1 }
 0x8f0   : > { %v5649_v56 = vadd.f32 %v5647_v58, %v5595_v61 }
 0x8f2   : > { %v5651_v7 = vsel %vm387_vm0, %v5649_v56, 0.0 }
 0x8f9   : > { %v6145_v2 = vpop.f32.mrb[76].mxu1 }
 0x8fa   : > { %v5520_v49 = vpop.f32.mrb[77].mxu1 }
 0x8fb   : > { %5615 = vxpose.xlu0.b32.cont [5/16] (narrow) %v5520_v49, 8 }
 0x8ff   : > { %5616 = vxpose.xlu0.b32.cont [6/16] (narrow) %v6145_v2, 8 }
 0x914   : > { %v6148_v6 = vpop.f32.mrb[78].mxu1 }
 0x915   : > { %v5530_v40 = vpop.f32.mrb[79].mxu1 }
 0x916   : > { %5617 = vxpose.xlu0.b32.cont [7/16] (narrow) %v5530_v40, 8 }
 0x91a   : > { %5618 = vxpose.xlu0.b32.cont [8/16] (narrow) %v6148_v6, 8 }
 0x930   : > { %v6151_v63 = vpop.f32.mrb[80].mxu1 }
 0x931   : > { %v5540_v34 = vpop.f32.mrb[81].mxu1 }
 0x932   : > { %5619 = vxpose.xlu0.b32.cont [9/16] (narrow) %v5540_v34, 8 }
 0x936   : > { %5620 = vxpose.xlu0.b32.cont [10/16] (narrow) %v6151_v63, 8 }
 0x94c   : > { %v6154_v27 = vpop.f32.mrb[82].mxu1 }
 0x94d   : > { %v5550_v19 = vpop.f32.mrb[83].mxu1 }
 0x94e   : > { %5621 = vxpose.xlu0.b32.cont [11/16] (narrow) %v5550_v19, 8 }
 0x952   : > { %5622 = vxpose.xlu0.b32.cont [12/16] (narrow) %v6154_v27, 8 }
 0x968   : > { %v6157_v38 = vpop.f32.mrb[84].mxu1 }
 0x969   : > { %v5560_v5 = vpop.f32.mrb[85].mxu1 }
 0x96a   : > { %5623 = vxpose.xlu0.b32.cont [13/16] (narrow) %v5560_v5, 8 }
 0x96d   : > { %v6160_v11 = vpop.f32.mrb[86].mxu1 }
 0x96e   : > { %5624 = vxpose.xlu0.b32.cont [14/16] (narrow) %v6157_v38, 8  ;;  %v5570_v23 = vpop.f32.mrb[87].mxu1 }
 0x972   : > { %5625 = vxpose.xlu0.b32.cont [15/16] (narrow) %v5570_v23, 8 }
 0x976   : > { %5626 = vxpose.xlu0.b32.end [16/16] (narrow) %v6160_v11, 8 }
 0x9ba   : > { %v5627_v59 = vpop.trf.xlu0 }
 0x9bb   : > { %v5650_v30 = vadd.f32 %v5647_v58, %v5627_v59 }
 0x9bd   : > { %v5652_v51 = vsel %vm387_vm0, %v5650_v30, 0.0 }
 0x9be   : > { %v5653_v41 = vadd.f32 %v5652_v51, %v5651_v7 }
 0x9c0   : > { %5654 = vadd.xlane.f32.xlu0 %v5653_v41 }
 0xa4d   : > { %v5655_v26 = vpop.xlane.xlu0 %5654 }
 0xa4e   : > { %v5656_v4 = vmul.f32 0.00390625, %v5655_v26 }
 0xa50   : > { %v5657_v25 = vsub.f32 %v5649_v56, %v5656_v4  ;;  %v5658_v62 = vsub.f32 %v5650_v30, %v5656_v4 }
 0xa52   : > { %v5659_v1 = vmul.f32 %v5657_v25, %v5657_v25  ;;  %v5660_v55 = vmul.f32 %v5658_v62, %v5658_v62 }
 0xa54   : > { %v5661_v0 = vsel %vm387_vm0, %v5659_v1, 0.0  ;;  %v5662_v24 = vsel %vm387_vm0, %v5660_v55, 0.0 }
 0xa55   : > { %v5663_v35 = vadd.f32 %v5662_v24, %v5661_v0 }
 0xa57   : > { %5664 = vadd.xlane.f32.xlu1 %v5663_v35 }
 0xae4   : > { %v5665_v21 = vpop.xlane.xlu1 %5664 }
 0xae5   : > { %v5666_v50 = vmul.f32 0.00390625, %v5665_v21 }
 0xae7   : > { %v5667_v12 = vadd.f32 1e-05, %v5666_v50 }
 0xae9   : > { %6259 = vrsqrt.f32 %v5667_v12 }
 0xaf3   : > { %v6260_v36 = vpop.eup %6259 }
 0xaf4   : > { %v5669_v14 = vmul.f32 %v6260_v36, %v5657_v25  ;;  %v5670_v3 = vmul.f32 %v6260_v36, %v5658_v62 }
 0xaf6   : > { %v5671_v53 = vmax.f32 %v5669_v14, 0.0  ;;  %v5672_v15 = vmax.f32 %v5670_v3, 0.0 }
 0xaf8   : > { %v5675_v32 = vcombine.low %v5671_v53, %v5672_v15 }
 0xafa   : > { %5677 = vst [vmem:[%s352_s26] sm:$0xff] %v5675_v32 }
 0xafb PF: > { %s19_s30 = sadd.s32 1, %s6267_s30  }
 0xafc   : > { %p16_p4 = scmp.ge.s32.totalorder %s19_s30, 4  }
 0xafe   :  { %18 = sbr.rel (!%p16_p4) target bundleno = 1 (0x1), region = 96 }

</bundles_post_ra>
